<compile_context>
chip_gen: v7x
topology: tpu7x:2x2x1
jax: 0.10.0
libtpu: 0.0.40
codegen_flags: <defaults>
</compile_context>

<pallas_src>
import functools

import jax
import jax.numpy as jnp
from jax.experimental import pallas as pl
from jax.experimental.pallas import tpu as pltpu

EPS = 1e-6  # DeepSeek RMSNorm eps


# --------------------------------------------------------------------------
# Model config (small, deterministic, consistent with the module's __init__)
# --------------------------------------------------------------------------
class Args:
    dim = 64
    inter_dim = 128
    n_layers = 2
    n_dense_layers = 2          # all layers dense -> MLP ffn everywhere
    n_heads = 4
    q_lora_rank = 0
    kv_lora_rank = 32
    qk_nope_head_dim = 32
    qk_rope_head_dim = 16
    v_head_dim = 32
    max_seq_len = 16
    original_seq_len = 16       # no YaRN correction (max_seq_len <= original)
    rope_theta = 10000.0
    rnn_hidden_dim = 32         # output dim of the head (vocab-like)


def _rmsnorm(x, w):
    var = jnp.mean(x * x, axis=-1, keepdims=True)
    return x * jax.lax.rsqrt(var + EPS) * w


# --------------------------------------------------------------------------
# Single fused kernel: all layers + final norm + head.
#   x_ref        (B*S, D)        f32   residual stream input
#   cos/sin_ref  (S, H*dr + dr)  f32   rope tables (q head-major | k)
#   anorm/fnorm  (L, D),  kvnorm (L, kvr)                 f32 norm weights
#   wa_ref       (L, D, H*dn + 2*H*dr + kvr + 2*dr) bf16  fused attn-in proj
#                  columns: [q_nope | q_pe | q_pe@P | kv_c | k_pe | k_pe@P]
#                  (softmax scale pre-folded into the q columns)
#   wkvb_ref     (L, kvr, H*(dn+dv)) bf16   columns: [k_nope | v]
#   wo_ref       (L, H*dv, D)        bf16
#   w13_ref      (L, D, 2*inter)     bf16   columns: [w1 | w3]
#   w2_ref       (L, inter, D)       bf16
#   outnorm_ref  (1, D) f32, headw_ref (D, V) bf16, headb_ref (1, V) f32
#   o_ref        (B, V) f32   logits of the last token of each sequence
# --------------------------------------------------------------------------
def _fused_transformer_kernel(x_ref, cos_ref, sin_ref,
                              anorm_ref, kvnorm_ref, fnorm_ref,
                              wa_ref, wkvb_ref, wo_ref, w13_ref, w2_ref,
                              outnorm_ref, headw_ref, headb_ref,
                              o_ref, *,
                              n_layers, n_heads, dn, dr, dv, kvr, inter,
                              bsz, seq):
    hq = n_heads * dn          # width of q_nope / k_nope / v slabs (128)
    hp = n_heads * dr          # width of q_pe slab (64)

    x = x_ref[...]                                           # (N, D) f32
    d = x.shape[1]

    # RoPE tables tiled over batch once (cheap sublane copy, hoisted).
    cos = jnp.concatenate([cos_ref[...]] * bsz, axis=0)      # (N, hp + dr)
    sin = jnp.concatenate([sin_ref[...]] * bsz, axis=0)
    cq, sq = cos[:, :hp], sin[:, :hp]
    ck, sk = cos[:, hp:], sin[:, hp:]

    # Causal mask for one sequence, shared by all layers / batches / heads.
    row = jax.lax.broadcasted_iota(jnp.int32, (seq, seq), 0)
    col = jax.lax.broadcasted_iota(jnp.int32, (seq, seq), 1)
    neg = jnp.where(col > row, -1e30, 0.0).astype(jnp.float32)

    anorm = anorm_ref[...]                                   # (L, D)
    kvnorm = kvnorm_ref[...]                                 # (L, kvr)
    fnorm = fnorm_ref[...]                                   # (L, D)

    for l in range(n_layers):                                # unrolled
        # ---------------- MLA attention ----------------
        xn = _rmsnorm(x, anorm[l:l + 1]).astype(jnp.bfloat16)
        proj = jnp.dot(xn, wa_ref[l], preferred_element_type=jnp.float32)

        q_nope = proj[:, :hq]
        q_pe = proj[:, hq:hq + hp] * cq + proj[:, hq + hp:hq + 2 * hp] * sq
        kv_c = proj[:, hq + 2 * hp:hq + 2 * hp + kvr]
        k_pe = (proj[:, hq + 2 * hp + kvr:hq + 2 * hp + kvr + dr] * ck
                + proj[:, hq + 2 * hp + kvr + dr:] * sk)

        kvn = _rmsnorm(kv_c, kvnorm[l:l + 1]).astype(jnp.bfloat16)
        kvb = jnp.dot(kvn, wkvb_ref[l], preferred_element_type=jnp.float32)

        # Cast the big slabs to bf16 once (not per head).
        q_nope = q_nope.astype(jnp.bfloat16)
        q_pe = q_pe.astype(jnp.bfloat16)
        k_pe = k_pe.astype(jnp.bfloat16)
        k_nope = kvb[:, :hq].astype(jnp.bfloat16)
        v_all = kvb[:, hq:].astype(jnp.bfloat16)

        wo_l = wo_ref[l]                                     # (H*dv, D) bf16

        attn_rows = []
        for b in range(bsz):                                 # unrolled
            r0 = b * seq
            kpe_b = k_pe[r0:r0 + seq]                        # shared by heads
            acc = jnp.zeros((seq, d), jnp.float32)
            for hh in range(n_heads):                        # unrolled
                qn = q_nope[r0:r0 + seq, hh * dn:(hh + 1) * dn]
                qp = q_pe[r0:r0 + seq, hh * dr:(hh + 1) * dr]
                kn = k_nope[r0:r0 + seq, hh * dn:(hh + 1) * dn]
                v = v_all[r0:r0 + seq, hh * dv:(hh + 1) * dv]
                sc = (jax.lax.dot_general(qn, kn, (((1,), (1,)), ((), ())),
                                          preferred_element_type=jnp.float32)
                      + jax.lax.dot_general(qp, kpe_b, (((1,), (1,)), ((), ())),
                                            preferred_element_type=jnp.float32))
                sc = sc + neg          # softmax scale already folded into wa
                m = jnp.max(sc, axis=-1, keepdims=True)
                e = jnp.exp(sc - m)                          # f32 softmax
                ssum = jnp.sum(e, axis=-1, keepdims=True)
                p = (e * pl.reciprocal(ssum, approx=True)).astype(jnp.bfloat16)
                pv = jnp.dot(p, v, preferred_element_type=jnp.float32)
                # Accumulate through wo's per-head sublane rows (no lane concat).
                acc = acc + jnp.dot(pv.astype(jnp.bfloat16),
                                    wo_l[hh * dv:(hh + 1) * dv, :],
                                    preferred_element_type=jnp.float32)
            attn_rows.append(acc)
        x = x + jnp.concatenate(attn_rows, axis=0)           # residual add

        # ---------------- SwiGLU MLP ----------------
        xn = _rmsnorm(x, fnorm[l:l + 1]).astype(jnp.bfloat16)
        h13 = jnp.dot(xn, w13_ref[l], preferred_element_type=jnp.float32)
        h1, h3 = h13[:, :inter], h13[:, inter:]               # lane-aligned split
        g = (h1 * jax.nn.sigmoid(h1) * h3).astype(jnp.bfloat16)
        x = x + jnp.dot(g, w2_ref[l], preferred_element_type=jnp.float32)

    # ---------------- final norm + head (last token of each sequence) -------
    last = jnp.concatenate(
        [x[b * seq + seq - 1:b * seq + seq] for b in range(bsz)], axis=0)  # (B, D)
    ln = _rmsnorm(last, outnorm_ref[...]).astype(jnp.bfloat16)
    o_ref[...] = (jnp.dot(ln, headw_ref[...], preferred_element_type=jnp.float32)
                  + headb_ref[...])


# --------------------------------------------------------------------------
# RoPE precompute (interleaved complex-pair convention, as in DeepSeek) and
# pair-swap matrix so rotation can be baked into the projection weights:
#   rot(x)[2i] = -x[2i+1], rot(x)[2i+1] = x[2i]   ==>   rot(x) = x @ P
# --------------------------------------------------------------------------
def precompute_rope(args):
    dr = args.qk_rope_head_dim
    inv = 1.0 / (args.rope_theta **
                 (jnp.arange(0, dr, 2, dtype=jnp.float32) / dr))
    t = jnp.arange(args.max_seq_len, dtype=jnp.float32)
    ang = jnp.outer(t, inv)                              # (L, dr/2)
    cos2 = jnp.repeat(jnp.cos(ang), 2, axis=1)           # [c0,c0,c1,c1,...]
    sin2 = jnp.repeat(jnp.sin(ang), 2, axis=1)
    return cos2, sin2


def _pair_swap(n):
    i = jnp.arange(n)[:, None]
    j = jnp.arange(n)[None, :]
    up = ((i % 2 == 0) & (j == i + 1)).astype(jnp.float32)
    dn_ = ((i % 2 == 1) & (j == i - 1)).astype(jnp.float32)
    return up - dn_


# --------------------------------------------------------------------------
# Parameter init (deterministic, synthetic) + packing into fused bf16 layouts
# --------------------------------------------------------------------------
def init_params(key, args):
    d, h = args.dim, args.n_heads
    dn, dr, dv = args.qk_nope_head_dim, args.qk_rope_head_dim, args.v_head_dim
    dh = dn + dr
    kvr = args.kv_lora_rank
    inter = args.inter_dim
    vocab = args.rnn_hidden_dim
    scale = float(dh ** -0.5)        # softmax scale, folded into q columns

    def dense(k, shape):
        return 0.02 * jax.random.normal(k, shape, jnp.float32)

    Pq = _pair_swap(h * dr)
    Pk = _pair_swap(dr)

    wa_l, wkvb_l, wo_l, w13_l, w2_l = [], [], [], [], []
    anorm_l, fnorm_l, kvnorm_l = [], [], []
    for lid in range(args.n_layers):
        ks = jax.random.split(jax.random.fold_in(key, lid), 8)
        wq = dense(ks[0], (d, h * dh)) * scale               # scale folded here
        wkv_a = dense(ks[1], (d, kvr + dr))
        wkv_b = dense(ks[2], (kvr, h * (dn + dv)))
        wo = dense(ks[3], (h * dv, d))
        w1 = dense(ks[4], (d, inter))
        w2 = dense(ks[5], (inter, d))
        w3 = dense(ks[6], (d, inter))

        # pack wa: [q_nope | q_pe | q_pe@P | kv_c | k_pe | k_pe@P]  (width 320)
        wq3 = wq.reshape(d, h, dh)
        wq_nope = wq3[:, :, :dn].reshape(d, h * dn)
        wq_pe = wq3[:, :, dn:].reshape(d, h * dr)
        wkv_c = wkv_a[:, :kvr]
        wk_pe = wkv_a[:, kvr:]
        wa = jnp.concatenate(
            [wq_nope, wq_pe, wq_pe @ Pq, wkv_c, wk_pe, wk_pe @ Pk],
            axis=1).astype(jnp.bfloat16)

        # pack wkv_b: [k_nope (H*dn) | v (H*dv)]  (width 256)
        wb3 = wkv_b.reshape(kvr, h, dn + dv)
        wkvb = jnp.concatenate(
            [wb3[:, :, :dn].reshape(kvr, h * dn),
             wb3[:, :, dn:].reshape(kvr, h * dv)], axis=1).astype(jnp.bfloat16)

        wa_l.append(wa)
        wkvb_l.append(wkvb)
        wo_l.append(wo.astype(jnp.bfloat16))
        w13_l.append(jnp.concatenate([w1, w3], axis=1).astype(jnp.bfloat16))
        w2_l.append(w2.astype(jnp.bfloat16))
        anorm_l.append(jnp.ones((d,), jnp.float32))
        fnorm_l.append(jnp.ones((d,), jnp.float32))
        kvnorm_l.append(jnp.ones((kvr,), jnp.float32))

    kh, kb = jax.random.split(jax.random.fold_in(key, 1000), 2)
    cos2, sin2 = precompute_rope(args)
    return dict(
        attn_norm=jnp.stack(anorm_l),        # (L, D)
        ffn_norm=jnp.stack(fnorm_l),         # (L, D)
        kv_norm=jnp.stack(kvnorm_l),         # (L, kvr)
        wa=jnp.stack(wa_l),                  # (L, D, 320) bf16
        wkv_b=jnp.stack(wkvb_l),             # (L, kvr, 256) bf16
        wo=jnp.stack(wo_l),                  # (L, H*dv, D) bf16
        w13=jnp.stack(w13_l),                # (L, D, 2*inter) bf16
        w2=jnp.stack(w2_l),                  # (L, inter, D) bf16
        norm=jnp.ones((d,), jnp.float32),
        head_w=dense(kh, (d, vocab)).astype(jnp.bfloat16),
        head_b=dense(kb, (vocab,)),
        rope_cos=cos2, rope_sin=sin2)


# --------------------------------------------------------------------------
# Forward pass (mirrors Transformer.forward; start_pos = 0 prefill)
# --------------------------------------------------------------------------
def transformer_forward(h, params, args, start_pos=0):
    b, s, d = h.shape
    nh, dr = args.n_heads, args.qk_rope_head_dim
    vocab = params['head_w'].shape[1]

    # rope tables laid out to match packed projection columns (head-major q | k)
    cos2 = params['rope_cos'][start_pos:start_pos + s]       # (s, dr)
    sin2 = params['rope_sin'][start_pos:start_pos + s]
    rope_cos = jnp.concatenate([jnp.tile(cos2, (1, nh)), cos2], axis=1)  # (s, nh*dr+dr)
    rope_sin = jnp.concatenate([jnp.tile(sin2, (1, nh)), sin2], axis=1)

    x2d = h.reshape(b * s, d)

    kern = functools.partial(
        _fused_transformer_kernel,
        n_layers=args.n_layers, n_heads=nh,
        dn=args.qk_nope_head_dim, dr=dr, dv=args.v_head_dim,
        kvr=args.kv_lora_rank, inter=args.inter_dim,
        bsz=b, seq=s)

    # Single fused pallas_call: no grid, every input mapped whole into VMEM
    # (total resident bytes ~0.3 MiB, far below even v7x's 32 MiB scoped VMEM).
    logits = pl.pallas_call(
        kern,
        out_shape=jax.ShapeDtypeStruct((b, vocab), jnp.float32),
    )(x2d, rope_cos, rope_sin,
      params['attn_norm'], params['kv_norm'], params['ffn_norm'],
      params['wa'], params['wkv_b'], params['wo'], params['w13'], params['w2'],
      params['norm'].reshape(1, d), params['head_w'],
      params['head_b'].reshape(1, vocab))
    return logits


# --------------------------------------------------------------------------
if __name__ == "__main__":
    args = Args()
    key = jax.random.PRNGKey(0)
    params = init_params(jax.random.fold_in(key, 7), args)

    B, S = 2, 8
    h = jax.random.normal(key, (B, S, args.dim), jnp.float32)

    fwd = jax.jit(lambda x: transformer_forward(x, params, args, start_pos=0))
    logits = fwd(h)
    jax.block_until_ready(logits)
    assert logits.shape == (B, args.rnn_hidden_dim)
    assert bool(jnp.all(jnp.isfinite(logits)))
    print("KERNEL_OK")
</pallas_src>

<mosaic_0001>
module attributes {stable_mosaic.version = 11 : i64} {
  func.func @_fused_transformer_kernel(%arg0: memref<16x64xf32, #tpu.memory_space<vmem>>, %arg1: memref<8x80xf32, #tpu.memory_space<vmem>>, %arg2: memref<8x80xf32, #tpu.memory_space<vmem>>, %arg3: memref<2x64xf32, #tpu.memory_space<vmem>>, %arg4: memref<2x32xf32, #tpu.memory_space<vmem>>, %arg5: memref<2x64xf32, #tpu.memory_space<vmem>>, %arg6: memref<2x64x320xbf16, #tpu.memory_space<vmem>>, %arg7: memref<2x32x256xbf16, #tpu.memory_space<vmem>>, %arg8: memref<2x128x64xbf16, #tpu.memory_space<vmem>>, %arg9: memref<2x64x256xbf16, #tpu.memory_space<vmem>>, %arg10: memref<2x128x64xbf16, #tpu.memory_space<vmem>>, %arg11: memref<1x64xf32, #tpu.memory_space<vmem>>, %arg12: memref<64x32xbf16, #tpu.memory_space<vmem>>, %arg13: memref<1x32xf32, #tpu.memory_space<vmem>>, %arg14: memref<2x32xf32, #tpu.memory_space<vmem>>) attributes {dimension_semantics = [], scalar_prefetch = 0 : i64, scratch_operands = 0 : i64, tpu.core_type = #tpu.core_type<tc>} {
    %c0 = arith.constant 0 : index
    %c0_0 = arith.constant 0 : index
    %0 = vector.load %arg0[%c0, %c0_0] : memref<16x64xf32, #tpu.memory_space<vmem>>, vector<16x64xf32>
    %c0_1 = arith.constant 0 : index
    %c0_2 = arith.constant 0 : index
    %1 = vector.load %arg1[%c0_1, %c0_2] : memref<8x80xf32, #tpu.memory_space<vmem>>, vector<8x80xf32>
    %2 = tpu.concatenate %1, %1 in 0 : vector<8x80xf32>, vector<8x80xf32> -> vector<16x80xf32>
    %c0_3 = arith.constant 0 : index
    %c0_4 = arith.constant 0 : index
    %3 = vector.load %arg2[%c0_3, %c0_4] : memref<8x80xf32, #tpu.memory_space<vmem>>, vector<8x80xf32>
    %4 = tpu.concatenate %3, %3 in 0 : vector<8x80xf32>, vector<8x80xf32> -> vector<16x80xf32>
    %5 = vector.extract_strided_slice %2 {offsets = [0, 0], sizes = [16, 64], strides = [1, 1]} : vector<16x80xf32> to vector<16x64xf32>
    %6 = vector.extract_strided_slice %4 {offsets = [0, 0], sizes = [16, 64], strides = [1, 1]} : vector<16x80xf32> to vector<16x64xf32>
    %7 = vector.extract_strided_slice %2 {offsets = [0, 64], sizes = [16, 16], strides = [1, 1]} : vector<16x80xf32> to vector<16x16xf32>
    %8 = vector.extract_strided_slice %4 {offsets = [0, 64], sizes = [16, 16], strides = [1, 1]} : vector<16x80xf32> to vector<16x16xf32>
    %9 = tpu.iota {dimensions = array<i32: 0>} : vector<8x8xi32>
    %10 = tpu.iota {dimensions = array<i32: 1>} : vector<8x8xi32>
    %11 = arith.cmpi sgt, %10, %9 : vector<8x8xi32>
    %cst = arith.constant -1.000000e+30 : f32
    %cst_5 = arith.constant 0.000000e+00 : f32
    %12 = vector.broadcast %cst : f32 to vector<8x8xf32>
    %13 = vector.broadcast %cst_5 : f32 to vector<8x8xf32>
    %14 = arith.select %11, %12, %13 : vector<8x8xi1>, vector<8x8xf32>
    %c0_6 = arith.constant 0 : index
    %c0_7 = arith.constant 0 : index
    %15 = vector.load %arg3[%c0_6, %c0_7] : memref<2x64xf32, #tpu.memory_space<vmem>>, vector<2x64xf32>
    %c0_8 = arith.constant 0 : index
    %c0_9 = arith.constant 0 : index
    %16 = vector.load %arg4[%c0_8, %c0_9] : memref<2x32xf32, #tpu.memory_space<vmem>>, vector<2x32xf32>
    %c0_10 = arith.constant 0 : index
    %c0_11 = arith.constant 0 : index
    %17 = vector.load %arg5[%c0_10, %c0_11] : memref<2x64xf32, #tpu.memory_space<vmem>>, vector<2x64xf32>
    %18 = vector.extract_strided_slice %15 {offsets = [0, 0], sizes = [1, 64], strides = [1, 1]} : vector<2x64xf32> to vector<1x64xf32>
    %19 = arith.mulf %0, %0 : vector<16x64xf32>
    %cst_12 = arith.constant dense<0.000000e+00> : vector<16xf32>
    %20 = vector.multi_reduction <add>, %19, %cst_12 [1] : vector<16x64xf32> to vector<16xf32>
    %21 = vector.shape_cast %20 : vector<16xf32> to vector<16x1xf32>
    %cst_13 = arith.constant 6.400000e+01 : f32
    %22 = vector.broadcast %cst_13 : f32 to vector<16x1xf32>
    %23 = arith.divf %21, %22 : vector<16x1xf32>
    %cst_14 = arith.constant 9.99999997E-7 : f32
    %24 = vector.broadcast %cst_14 : f32 to vector<16x1xf32>
    %25 = arith.addf %23, %24 : vector<16x1xf32>
    %26 = math.rsqrt %25 : vector<16x1xf32>
    %27 = vector.broadcast %26 : vector<16x1xf32> to vector<16x64xf32>
    %28 = arith.mulf %0, %27 : vector<16x64xf32>
    %29 = vector.broadcast %18 : vector<1x64xf32> to vector<16x64xf32>
    %30 = arith.mulf %28, %29 : vector<16x64xf32>
    %31 = arith.truncf %30 : vector<16x64xf32> to vector<16x64xbf16>
    %c0_15 = arith.constant 0 : index
    %c0_16 = arith.constant 0 : index
    %c0_17 = arith.constant 0 : index
    %32 = vector.load %arg6[%c0_15, %c0_16, %c0_17] : memref<2x64x320xbf16, #tpu.memory_space<vmem>>, vector<1x64x320xbf16>
    %33 = vector.shape_cast %32 : vector<1x64x320xbf16> to vector<64x320xbf16>
    %cst_18 = arith.constant dense<0.000000e+00> : vector<16x320xf32>
    %34 = tpu.matmul %31, %33, %cst_18 {dimension_numbers = #tpu.dot_dimension_numbers<[1], [0], [0], [1], [0, 0, 1, 1], [], []>} : vector<16x64xbf16>, vector<64x320xbf16>, vector<16x320xf32> -> vector<16x320xf32>
    %35 = vector.extract_strided_slice %34 {offsets = [0, 0], sizes = [16, 128], strides = [1, 1]} : vector<16x320xf32> to vector<16x128xf32>
    %36 = vector.extract_strided_slice %34 {offsets = [0, 128], sizes = [16, 64], strides = [1, 1]} : vector<16x320xf32> to vector<16x64xf32>
    %37 = arith.mulf %36, %5 : vector<16x64xf32>
    %38 = vector.extract_strided_slice %34 {offsets = [0, 192], sizes = [16, 64], strides = [1, 1]} : vector<16x320xf32> to vector<16x64xf32>
    %39 = arith.mulf %38, %6 : vector<16x64xf32>
    %40 = arith.addf %37, %39 : vector<16x64xf32>
    %41 = vector.extract_strided_slice %34 {offsets = [0, 256], sizes = [16, 32], strides = [1, 1]} : vector<16x320xf32> to vector<16x32xf32>
    %42 = vector.extract_strided_slice %34 {offsets = [0, 288], sizes = [16, 16], strides = [1, 1]} : vector<16x320xf32> to vector<16x16xf32>
    %43 = arith.mulf %42, %7 : vector<16x16xf32>
    %44 = vector.extract_strided_slice %34 {offsets = [0, 304], sizes = [16, 16], strides = [1, 1]} : vector<16x320xf32> to vector<16x16xf32>
    %45 = arith.mulf %44, %8 : vector<16x16xf32>
    %46 = arith.addf %43, %45 : vector<16x16xf32>
    %47 = vector.extract_strided_slice %16 {offsets = [0, 0], sizes = [1, 32], strides = [1, 1]} : vector<2x32xf32> to vector<1x32xf32>
    %48 = arith.mulf %41, %41 : vector<16x32xf32>
    %cst_19 = arith.constant dense<0.000000e+00> : vector<16xf32>
    %49 = vector.multi_reduction <add>, %48, %cst_19 [1] : vector<16x32xf32> to vector<16xf32>
    %50 = vector.shape_cast %49 : vector<16xf32> to vector<16x1xf32>
    %cst_20 = arith.constant 3.200000e+01 : f32
    %51 = vector.broadcast %cst_20 : f32 to vector<16x1xf32>
    %52 = arith.divf %50, %51 : vector<16x1xf32>
    %cst_21 = arith.constant 9.99999997E-7 : f32
    %53 = vector.broadcast %cst_21 : f32 to vector<16x1xf32>
    %54 = arith.addf %52, %53 : vector<16x1xf32>
    %55 = math.rsqrt %54 : vector<16x1xf32>
    %56 = vector.broadcast %55 : vector<16x1xf32> to vector<16x32xf32>
    %57 = arith.mulf %41, %56 : vector<16x32xf32>
    %58 = vector.broadcast %47 : vector<1x32xf32> to vector<16x32xf32>
    %59 = arith.mulf %57, %58 : vector<16x32xf32>
    %60 = arith.truncf %59 : vector<16x32xf32> to vector<16x32xbf16>
    %c0_22 = arith.constant 0 : index
    %c0_23 = arith.constant 0 : index
    %c0_24 = arith.constant 0 : index
    %61 = vector.load %arg7[%c0_22, %c0_23, %c0_24] : memref<2x32x256xbf16, #tpu.memory_space<vmem>>, vector<1x32x256xbf16>
    %62 = vector.shape_cast %61 : vector<1x32x256xbf16> to vector<32x256xbf16>
    %cst_25 = arith.constant dense<0.000000e+00> : vector<16x256xf32>
    %63 = tpu.matmul %60, %62, %cst_25 {dimension_numbers = #tpu.dot_dimension_numbers<[1], [0], [0], [1], [0, 0, 1, 1], [], []>} : vector<16x32xbf16>, vector<32x256xbf16>, vector<16x256xf32> -> vector<16x256xf32>
    %64 = arith.truncf %35 : vector<16x128xf32> to vector<16x128xbf16>
    %65 = arith.truncf %40 : vector<16x64xf32> to vector<16x64xbf16>
    %66 = arith.truncf %46 : vector<16x16xf32> to vector<16x16xbf16>
    %67 = vector.extract_strided_slice %63 {offsets = [0, 0], sizes = [16, 128], strides = [1, 1]} : vector<16x256xf32> to vector<16x128xf32>
    %68 = arith.truncf %67 : vector<16x128xf32> to vector<16x128xbf16>
    %69 = vector.extract_strided_slice %63 {offsets = [0, 128], sizes = [16, 128], strides = [1, 1]} : vector<16x256xf32> to vector<16x128xf32>
    %70 = arith.truncf %69 : vector<16x128xf32> to vector<16x128xbf16>
    %c0_26 = arith.constant 0 : index
    %c0_27 = arith.constant 0 : index
    %c0_28 = arith.constant 0 : index
    %71 = vector.load %arg8[%c0_26, %c0_27, %c0_28] : memref<2x128x64xbf16, #tpu.memory_space<vmem>>, vector<1x128x64xbf16>
    %72 = vector.shape_cast %71 : vector<1x128x64xbf16> to vector<128x64xbf16>
    %73 = vector.extract_strided_slice %66 {offsets = [0, 0], sizes = [8, 16], strides = [1, 1]} : vector<16x16xbf16> to vector<8x16xbf16>
    %cst_29 = arith.constant 0.000000e+00 : f32
    %74 = vector.broadcast %cst_29 : f32 to vector<8x64xf32>
    %75 = vector.extract_strided_slice %64 {offsets = [0, 0], sizes = [8, 32], strides = [1, 1]} : vector<16x128xbf16> to vector<8x32xbf16>
    %76 = vector.extract_strided_slice %65 {offsets = [0, 0], sizes = [8, 16], strides = [1, 1]} : vector<16x64xbf16> to vector<8x16xbf16>
    %77 = vector.extract_strided_slice %68 {offsets = [0, 0], sizes = [8, 32], strides = [1, 1]} : vector<16x128xbf16> to vector<8x32xbf16>
    %78 = vector.extract_strided_slice %70 {offsets = [0, 0], sizes = [8, 32], strides = [1, 1]} : vector<16x128xbf16> to vector<8x32xbf16>
    %cst_30 = arith.constant dense<0.000000e+00> : vector<8x8xf32>
    %79 = tpu.matmul %75, %77, %cst_30 {dimension_numbers = #tpu.dot_dimension_numbers<[1], [1], [0], [0], [0, 0, 1, 0], [], []>} : vector<8x32xbf16>, vector<8x32xbf16>, vector<8x8xf32> -> vector<8x8xf32>
    %cst_31 = arith.constant dense<0.000000e+00> : vector<8x8xf32>
    %80 = tpu.matmul %76, %73, %cst_31 {dimension_numbers = #tpu.dot_dimension_numbers<[1], [1], [0], [0], [0, 0, 1, 0], [], []>} : vector<8x16xbf16>, vector<8x16xbf16>, vector<8x8xf32> -> vector<8x8xf32>
    %81 = arith.addf %79, %80 : vector<8x8xf32>
    %82 = arith.addf %81, %14 : vector<8x8xf32>
    %cst_32 = arith.constant dense<0xFF800000> : vector<8xf32>
    %83 = vector.multi_reduction <maximumf>, %82, %cst_32 [1] : vector<8x8xf32> to vector<8xf32>
    %84 = vector.shape_cast %83 : vector<8xf32> to vector<8x1xf32>
    %85 = vector.broadcast %84 : vector<8x1xf32> to vector<8x8xf32>
    %86 = arith.subf %82, %85 : vector<8x8xf32>
    %87 = math.exp %86 : vector<8x8xf32>
    %cst_33 = arith.constant dense<0.000000e+00> : vector<8xf32>
    %88 = vector.multi_reduction <add>, %87, %cst_33 [1] : vector<8x8xf32> to vector<8xf32>
    %89 = vector.shape_cast %88 : vector<8xf32> to vector<8x1xf32>
    %90 = tpu.reciprocal %89 {approx = true} : vector<8x1xf32> -> vector<8x1xf32>
    %91 = vector.broadcast %90 : vector<8x1xf32> to vector<8x8xf32>
    %92 = arith.mulf %87, %91 : vector<8x8xf32>
    %93 = arith.truncf %92 : vector<8x8xf32> to vector<8x8xbf16>
    %cst_34 = arith.constant dense<0.000000e+00> : vector<8x32xf32>
    %94 = tpu.matmul %93, %78, %cst_34 {dimension_numbers = #tpu.dot_dimension_numbers<[1], [0], [0], [1], [0, 0, 1, 1], [], []>} : vector<8x8xbf16>, vector<8x32xbf16>, vector<8x32xf32> -> vector<8x32xf32>
    %95 = arith.truncf %94 : vector<8x32xf32> to vector<8x32xbf16>
    %96 = vector.extract_strided_slice %72 {offsets = [0, 0], sizes = [32, 64], strides = [1, 1]} : vector<128x64xbf16> to vector<32x64xbf16>
    %cst_35 = arith.constant dense<0.000000e+00> : vector<8x64xf32>
    %97 = tpu.matmul %95, %96, %cst_35 {dimension_numbers = #tpu.dot_dimension_numbers<[1], [0], [0], [1], [0, 0, 1, 1], [], []>} : vector<8x32xbf16>, vector<32x64xbf16>, vector<8x64xf32> -> vector<8x64xf32>
    %98 = arith.addf %74, %97 : vector<8x64xf32>
    %99 = vector.extract_strided_slice %64 {offsets = [0, 32], sizes = [8, 32], strides = [1, 1]} : vector<16x128xbf16> to vector<8x32xbf16>
    %100 = vector.extract_strided_slice %65 {offsets = [0, 16], sizes = [8, 16], strides = [1, 1]} : vector<16x64xbf16> to vector<8x16xbf16>
    %101 = vector.extract_strided_slice %68 {offsets = [0, 32], sizes = [8, 32], strides = [1, 1]} : vector<16x128xbf16> to vector<8x32xbf16>
    %102 = vector.extract_strided_slice %70 {offsets = [0, 32], sizes = [8, 32], strides = [1, 1]} : vector<16x128xbf16> to vector<8x32xbf16>
    %cst_36 = arith.constant dense<0.000000e+00> : vector<8x8xf32>
    %103 = tpu.matmul %99, %101, %cst_36 {dimension_numbers = #tpu.dot_dimension_numbers<[1], [1], [0], [0], [0, 0, 1, 0], [], []>} : vector<8x32xbf16>, vector<8x32xbf16>, vector<8x8xf32> -> vector<8x8xf32>
    %cst_37 = arith.constant dense<0.000000e+00> : vector<8x8xf32>
    %104 = tpu.matmul %100, %73, %cst_37 {dimension_numbers = #tpu.dot_dimension_numbers<[1], [1], [0], [0], [0, 0, 1, 0], [], []>} : vector<8x16xbf16>, vector<8x16xbf16>, vector<8x8xf32> -> vector<8x8xf32>
    %105 = arith.addf %103, %104 : vector<8x8xf32>
    %106 = arith.addf %105, %14 : vector<8x8xf32>
    %cst_38 = arith.constant dense<0xFF800000> : vector<8xf32>
    %107 = vector.multi_reduction <maximumf>, %106, %cst_38 [1] : vector<8x8xf32> to vector<8xf32>
    %108 = vector.shape_cast %107 : vector<8xf32> to vector<8x1xf32>
    %109 = vector.broadcast %108 : vector<8x1xf32> to vector<8x8xf32>
    %110 = arith.subf %106, %109 : vector<8x8xf32>
    %111 = math.exp %110 : vector<8x8xf32>
    %cst_39 = arith.constant dense<0.000000e+00> : vector<8xf32>
    %112 = vector.multi_reduction <add>, %111, %cst_39 [1] : vector<8x8xf32> to vector<8xf32>
    %113 = vector.shape_cast %112 : vector<8xf32> to vector<8x1xf32>
    %114 = tpu.reciprocal %113 {approx = true} : vector<8x1xf32> -> vector<8x1xf32>
    %115 = vector.broadcast %114 : vector<8x1xf32> to vector<8x8xf32>
    %116 = arith.mulf %111, %115 : vector<8x8xf32>
    %117 = arith.truncf %116 : vector<8x8xf32> to vector<8x8xbf16>
    %cst_40 = arith.constant dense<0.000000e+00> : vector<8x32xf32>
    %118 = tpu.matmul %117, %102, %cst_40 {dimension_numbers = #tpu.dot_dimension_numbers<[1], [0], [0], [1], [0, 0, 1, 1], [], []>} : vector<8x8xbf16>, vector<8x32xbf16>, vector<8x32xf32> -> vector<8x32xf32>
    %119 = arith.truncf %118 : vector<8x32xf32> to vector<8x32xbf16>
    %120 = vector.extract_strided_slice %72 {offsets = [32, 0], sizes = [32, 64], strides = [1, 1]} : vector<128x64xbf16> to vector<32x64xbf16>
    %cst_41 = arith.constant dense<0.000000e+00> : vector<8x64xf32>
    %121 = tpu.matmul %119, %120, %cst_41 {dimension_numbers = #tpu.dot_dimension_numbers<[1], [0], [0], [1], [0, 0, 1, 1], [], []>} : vector<8x32xbf16>, vector<32x64xbf16>, vector<8x64xf32> -> vector<8x64xf32>
    %122 = arith.addf %98, %121 : vector<8x64xf32>
    %123 = vector.extract_strided_slice %64 {offsets = [0, 64], sizes = [8, 32], strides = [1, 1]} : vector<16x128xbf16> to vector<8x32xbf16>
    %124 = vector.extract_strided_slice %65 {offsets = [0, 32], sizes = [8, 16], strides = [1, 1]} : vector<16x64xbf16> to vector<8x16xbf16>
    %125 = vector.extract_strided_slice %68 {offsets = [0, 64], sizes = [8, 32], strides = [1, 1]} : vector<16x128xbf16> to vector<8x32xbf16>
    %126 = vector.extract_strided_slice %70 {offsets = [0, 64], sizes = [8, 32], strides = [1, 1]} : vector<16x128xbf16> to vector<8x32xbf16>
    %cst_42 = arith.constant dense<0.000000e+00> : vector<8x8xf32>
    %127 = tpu.matmul %123, %125, %cst_42 {dimension_numbers = #tpu.dot_dimension_numbers<[1], [1], [0], [0], [0, 0, 1, 0], [], []>} : vector<8x32xbf16>, vector<8x32xbf16>, vector<8x8xf32> -> vector<8x8xf32>
    %cst_43 = arith.constant dense<0.000000e+00> : vector<8x8xf32>
    %128 = tpu.matmul %124, %73, %cst_43 {dimension_numbers = #tpu.dot_dimension_numbers<[1], [1], [0], [0], [0, 0, 1, 0], [], []>} : vector<8x16xbf16>, vector<8x16xbf16>, vector<8x8xf32> -> vector<8x8xf32>
    %129 = arith.addf %127, %128 : vector<8x8xf32>
    %130 = arith.addf %129, %14 : vector<8x8xf32>
    %cst_44 = arith.constant dense<0xFF800000> : vector<8xf32>
    %131 = vector.multi_reduction <maximumf>, %130, %cst_44 [1] : vector<8x8xf32> to vector<8xf32>
    %132 = vector.shape_cast %131 : vector<8xf32> to vector<8x1xf32>
    %133 = vector.broadcast %132 : vector<8x1xf32> to vector<8x8xf32>
    %134 = arith.subf %130, %133 : vector<8x8xf32>
    %135 = math.exp %134 : vector<8x8xf32>
    %cst_45 = arith.constant dense<0.000000e+00> : vector<8xf32>
    %136 = vector.multi_reduction <add>, %135, %cst_45 [1] : vector<8x8xf32> to vector<8xf32>
    %137 = vector.shape_cast %136 : vector<8xf32> to vector<8x1xf32>
    %138 = tpu.reciprocal %137 {approx = true} : vector<8x1xf32> -> vector<8x1xf32>
    %139 = vector.broadcast %138 : vector<8x1xf32> to vector<8x8xf32>
    %140 = arith.mulf %135, %139 : vector<8x8xf32>
    %141 = arith.truncf %140 : vector<8x8xf32> to vector<8x8xbf16>
    %cst_46 = arith.constant dense<0.000000e+00> : vector<8x32xf32>
    %142 = tpu.matmul %141, %126, %cst_46 {dimension_numbers = #tpu.dot_dimension_numbers<[1], [0], [0], [1], [0, 0, 1, 1], [], []>} : vector<8x8xbf16>, vector<8x32xbf16>, vector<8x32xf32> -> vector<8x32xf32>
    %143 = arith.truncf %142 : vector<8x32xf32> to vector<8x32xbf16>
    %144 = vector.extract_strided_slice %72 {offsets = [64, 0], sizes = [32, 64], strides = [1, 1]} : vector<128x64xbf16> to vector<32x64xbf16>
    %cst_47 = arith.constant dense<0.000000e+00> : vector<8x64xf32>
    %145 = tpu.matmul %143, %144, %cst_47 {dimension_numbers = #tpu.dot_dimension_numbers<[1], [0], [0], [1], [0, 0, 1, 1], [], []>} : vector<8x32xbf16>, vector<32x64xbf16>, vector<8x64xf32> -> vector<8x64xf32>
    %146 = arith.addf %122, %145 : vector<8x64xf32>
    %147 = vector.extract_strided_slice %64 {offsets = [0, 96], sizes = [8, 32], strides = [1, 1]} : vector<16x128xbf16> to vector<8x32xbf16>
    %148 = vector.extract_strided_slice %65 {offsets = [0, 48], sizes = [8, 16], strides = [1, 1]} : vector<16x64xbf16> to vector<8x16xbf16>
    %149 = vector.extract_strided_slice %68 {offsets = [0, 96], sizes = [8, 32], strides = [1, 1]} : vector<16x128xbf16> to vector<8x32xbf16>
    %150 = vector.extract_strided_slice %70 {offsets = [0, 96], sizes = [8, 32], strides = [1, 1]} : vector<16x128xbf16> to vector<8x32xbf16>
    %cst_48 = arith.constant dense<0.000000e+00> : vector<8x8xf32>
    %151 = tpu.matmul %147, %149, %cst_48 {dimension_numbers = #tpu.dot_dimension_numbers<[1], [1], [0], [0], [0, 0, 1, 0], [], []>} : vector<8x32xbf16>, vector<8x32xbf16>, vector<8x8xf32> -> vector<8x8xf32>
    %cst_49 = arith.constant dense<0.000000e+00> : vector<8x8xf32>
    %152 = tpu.matmul %148, %73, %cst_49 {dimension_numbers = #tpu.dot_dimension_numbers<[1], [1], [0], [0], [0, 0, 1, 0], [], []>} : vector<8x16xbf16>, vector<8x16xbf16>, vector<8x8xf32> -> vector<8x8xf32>
    %153 = arith.addf %151, %152 : vector<8x8xf32>
    %154 = arith.addf %153, %14 : vector<8x8xf32>
    %cst_50 = arith.constant dense<0xFF800000> : vector<8xf32>
    %155 = vector.multi_reduction <maximumf>, %154, %cst_50 [1] : vector<8x8xf32> to vector<8xf32>
    %156 = vector.shape_cast %155 : vector<8xf32> to vector<8x1xf32>
    %157 = vector.broadcast %156 : vector<8x1xf32> to vector<8x8xf32>
    %158 = arith.subf %154, %157 : vector<8x8xf32>
    %159 = math.exp %158 : vector<8x8xf32>
    %cst_51 = arith.constant dense<0.000000e+00> : vector<8xf32>
    %160 = vector.multi_reduction <add>, %159, %cst_51 [1] : vector<8x8xf32> to vector<8xf32>
    %161 = vector.shape_cast %160 : vector<8xf32> to vector<8x1xf32>
    %162 = tpu.reciprocal %161 {approx = true} : vector<8x1xf32> -> vector<8x1xf32>
    %163 = vector.broadcast %162 : vector<8x1xf32> to vector<8x8xf32>
    %164 = arith.mulf %159, %163 : vector<8x8xf32>
    %165 = arith.truncf %164 : vector<8x8xf32> to vector<8x8xbf16>
    %cst_52 = arith.constant dense<0.000000e+00> : vector<8x32xf32>
    %166 = tpu.matmul %165, %150, %cst_52 {dimension_numbers = #tpu.dot_dimension_numbers<[1], [0], [0], [1], [0, 0, 1, 1], [], []>} : vector<8x8xbf16>, vector<8x32xbf16>, vector<8x32xf32> -> vector<8x32xf32>
    %167 = arith.truncf %166 : vector<8x32xf32> to vector<8x32xbf16>
    %168 = vector.extract_strided_slice %72 {offsets = [96, 0], sizes = [32, 64], strides = [1, 1]} : vector<128x64xbf16> to vector<32x64xbf16>
    %cst_53 = arith.constant dense<0.000000e+00> : vector<8x64xf32>
    %169 = tpu.matmul %167, %168, %cst_53 {dimension_numbers = #tpu.dot_dimension_numbers<[1], [0], [0], [1], [0, 0, 1, 1], [], []>} : vector<8x32xbf16>, vector<32x64xbf16>, vector<8x64xf32> -> vector<8x64xf32>
    %170 = arith.addf %146, %169 : vector<8x64xf32>
    %171 = vector.extract_strided_slice %66 {offsets = [8, 0], sizes = [8, 16], strides = [1, 1]} : vector<16x16xbf16> to vector<8x16xbf16>
    %cst_54 = arith.constant 0.000000e+00 : f32
    %172 = vector.broadcast %cst_54 : f32 to vector<8x64xf32>
    %173 = vector.extract_strided_slice %64 {offsets = [8, 0], sizes = [8, 32], strides = [1, 1]} : vector<16x128xbf16> to vector<8x32xbf16>
    %174 = vector.extract_strided_slice %65 {offsets = [8, 0], sizes = [8, 16], strides = [1, 1]} : vector<16x64xbf16> to vector<8x16xbf16>
    %175 = vector.extract_strided_slice %68 {offsets = [8, 0], sizes = [8, 32], strides = [1, 1]} : vector<16x128xbf16> to vector<8x32xbf16>
    %176 = vector.extract_strided_slice %70 {offsets = [8, 0], sizes = [8, 32], strides = [1, 1]} : vector<16x128xbf16> to vector<8x32xbf16>
    %cst_55 = arith.constant dense<0.000000e+00> : vector<8x8xf32>
    %177 = tpu.matmul %173, %175, %cst_55 {dimension_numbers = #tpu.dot_dimension_numbers<[1], [1], [0], [0], [0, 0, 1, 0], [], []>} : vector<8x32xbf16>, vector<8x32xbf16>, vector<8x8xf32> -> vector<8x8xf32>
    %cst_56 = arith.constant dense<0.000000e+00> : vector<8x8xf32>
    %178 = tpu.matmul %174, %171, %cst_56 {dimension_numbers = #tpu.dot_dimension_numbers<[1], [1], [0], [0], [0, 0, 1, 0], [], []>} : vector<8x16xbf16>, vector<8x16xbf16>, vector<8x8xf32> -> vector<8x8xf32>
    %179 = arith.addf %177, %178 : vector<8x8xf32>
    %180 = arith.addf %179, %14 : vector<8x8xf32>
    %cst_57 = arith.constant dense<0xFF800000> : vector<8xf32>
    %181 = vector.multi_reduction <maximumf>, %180, %cst_57 [1] : vector<8x8xf32> to vector<8xf32>
    %182 = vector.shape_cast %181 : vector<8xf32> to vector<8x1xf32>
    %183 = vector.broadcast %182 : vector<8x1xf32> to vector<8x8xf32>
    %184 = arith.subf %180, %183 : vector<8x8xf32>
    %185 = math.exp %184 : vector<8x8xf32>
    %cst_58 = arith.constant dense<0.000000e+00> : vector<8xf32>
    %186 = vector.multi_reduction <add>, %185, %cst_58 [1] : vector<8x8xf32> to vector<8xf32>
    %187 = vector.shape_cast %186 : vector<8xf32> to vector<8x1xf32>
    %188 = tpu.reciprocal %187 {approx = true} : vector<8x1xf32> -> vector<8x1xf32>
    %189 = vector.broadcast %188 : vector<8x1xf32> to vector<8x8xf32>
    %190 = arith.mulf %185, %189 : vector<8x8xf32>
    %191 = arith.truncf %190 : vector<8x8xf32> to vector<8x8xbf16>
    %cst_59 = arith.constant dense<0.000000e+00> : vector<8x32xf32>
    %192 = tpu.matmul %191, %176, %cst_59 {dimension_numbers = #tpu.dot_dimension_numbers<[1], [0], [0], [1], [0, 0, 1, 1], [], []>} : vector<8x8xbf16>, vector<8x32xbf16>, vector<8x32xf32> -> vector<8x32xf32>
    %193 = arith.truncf %192 : vector<8x32xf32> to vector<8x32xbf16>
    %194 = vector.extract_strided_slice %72 {offsets = [0, 0], sizes = [32, 64], strides = [1, 1]} : vector<128x64xbf16> to vector<32x64xbf16>
    %cst_60 = arith.constant dense<0.000000e+00> : vector<8x64xf32>
    %195 = tpu.matmul %193, %194, %cst_60 {dimension_numbers = #tpu.dot_dimension_numbers<[1], [0], [0], [1], [0, 0, 1, 1], [], []>} : vector<8x32xbf16>, vector<32x64xbf16>, vector<8x64xf32> -> vector<8x64xf32>
    %196 = arith.addf %172, %195 : vector<8x64xf32>
    %197 = vector.extract_strided_slice %64 {offsets = [8, 32], sizes = [8, 32], strides = [1, 1]} : vector<16x128xbf16> to vector<8x32xbf16>
    %198 = vector.extract_strided_slice %65 {offsets = [8, 16], sizes = [8, 16], strides = [1, 1]} : vector<16x64xbf16> to vector<8x16xbf16>
    %199 = vector.extract_strided_slice %68 {offsets = [8, 32], sizes = [8, 32], strides = [1, 1]} : vector<16x128xbf16> to vector<8x32xbf16>
    %200 = vector.extract_strided_slice %70 {offsets = [8, 32], sizes = [8, 32], strides = [1, 1]} : vector<16x128xbf16> to vector<8x32xbf16>
    %cst_61 = arith.constant dense<0.000000e+00> : vector<8x8xf32>
    %201 = tpu.matmul %197, %199, %cst_61 {dimension_numbers = #tpu.dot_dimension_numbers<[1], [1], [0], [0], [0, 0, 1, 0], [], []>} : vector<8x32xbf16>, vector<8x32xbf16>, vector<8x8xf32> -> vector<8x8xf32>
    %cst_62 = arith.constant dense<0.000000e+00> : vector<8x8xf32>
    %202 = tpu.matmul %198, %171, %cst_62 {dimension_numbers = #tpu.dot_dimension_numbers<[1], [1], [0], [0], [0, 0, 1, 0], [], []>} : vector<8x16xbf16>, vector<8x16xbf16>, vector<8x8xf32> -> vector<8x8xf32>
    %203 = arith.addf %201, %202 : vector<8x8xf32>
    %204 = arith.addf %203, %14 : vector<8x8xf32>
    %cst_63 = arith.constant dense<0xFF800000> : vector<8xf32>
    %205 = vector.multi_reduction <maximumf>, %204, %cst_63 [1] : vector<8x8xf32> to vector<8xf32>
    %206 = vector.shape_cast %205 : vector<8xf32> to vector<8x1xf32>
    %207 = vector.broadcast %206 : vector<8x1xf32> to vector<8x8xf32>
    %208 = arith.subf %204, %207 : vector<8x8xf32>
    %209 = math.exp %208 : vector<8x8xf32>
    %cst_64 = arith.constant dense<0.000000e+00> : vector<8xf32>
    %210 = vector.multi_reduction <add>, %209, %cst_64 [1] : vector<8x8xf32> to vector<8xf32>
    %211 = vector.shape_cast %210 : vector<8xf32> to vector<8x1xf32>
    %212 = tpu.reciprocal %211 {approx = true} : vector<8x1xf32> -> vector<8x1xf32>
    %213 = vector.broadcast %212 : vector<8x1xf32> to vector<8x8xf32>
    %214 = arith.mulf %209, %213 : vector<8x8xf32>
    %215 = arith.truncf %214 : vector<8x8xf32> to vector<8x8xbf16>
    %cst_65 = arith.constant dense<0.000000e+00> : vector<8x32xf32>
    %216 = tpu.matmul %215, %200, %cst_65 {dimension_numbers = #tpu.dot_dimension_numbers<[1], [0], [0], [1], [0, 0, 1, 1], [], []>} : vector<8x8xbf16>, vector<8x32xbf16>, vector<8x32xf32> -> vector<8x32xf32>
    %217 = arith.truncf %216 : vector<8x32xf32> to vector<8x32xbf16>
    %218 = vector.extract_strided_slice %72 {offsets = [32, 0], sizes = [32, 64], strides = [1, 1]} : vector<128x64xbf16> to vector<32x64xbf16>
    %cst_66 = arith.constant dense<0.000000e+00> : vector<8x64xf32>
    %219 = tpu.matmul %217, %218, %cst_66 {dimension_numbers = #tpu.dot_dimension_numbers<[1], [0], [0], [1], [0, 0, 1, 1], [], []>} : vector<8x32xbf16>, vector<32x64xbf16>, vector<8x64xf32> -> vector<8x64xf32>
    %220 = arith.addf %196, %219 : vector<8x64xf32>
    %221 = vector.extract_strided_slice %64 {offsets = [8, 64], sizes = [8, 32], strides = [1, 1]} : vector<16x128xbf16> to vector<8x32xbf16>
    %222 = vector.extract_strided_slice %65 {offsets = [8, 32], sizes = [8, 16], strides = [1, 1]} : vector<16x64xbf16> to vector<8x16xbf16>
    %223 = vector.extract_strided_slice %68 {offsets = [8, 64], sizes = [8, 32], strides = [1, 1]} : vector<16x128xbf16> to vector<8x32xbf16>
    %224 = vector.extract_strided_slice %70 {offsets = [8, 64], sizes = [8, 32], strides = [1, 1]} : vector<16x128xbf16> to vector<8x32xbf16>
    %cst_67 = arith.constant dense<0.000000e+00> : vector<8x8xf32>
    %225 = tpu.matmul %221, %223, %cst_67 {dimension_numbers = #tpu.dot_dimension_numbers<[1], [1], [0], [0], [0, 0, 1, 0], [], []>} : vector<8x32xbf16>, vector<8x32xbf16>, vector<8x8xf32> -> vector<8x8xf32>
    %cst_68 = arith.constant dense<0.000000e+00> : vector<8x8xf32>
    %226 = tpu.matmul %222, %171, %cst_68 {dimension_numbers = #tpu.dot_dimension_numbers<[1], [1], [0], [0], [0, 0, 1, 0], [], []>} : vector<8x16xbf16>, vector<8x16xbf16>, vector<8x8xf32> -> vector<8x8xf32>
    %227 = arith.addf %225, %226 : vector<8x8xf32>
    %228 = arith.addf %227, %14 : vector<8x8xf32>
    %cst_69 = arith.constant dense<0xFF800000> : vector<8xf32>
    %229 = vector.multi_reduction <maximumf>, %228, %cst_69 [1] : vector<8x8xf32> to vector<8xf32>
    %230 = vector.shape_cast %229 : vector<8xf32> to vector<8x1xf32>
    %231 = vector.broadcast %230 : vector<8x1xf32> to vector<8x8xf32>
    %232 = arith.subf %228, %231 : vector<8x8xf32>
    %233 = math.exp %232 : vector<8x8xf32>
    %cst_70 = arith.constant dense<0.000000e+00> : vector<8xf32>
    %234 = vector.multi_reduction <add>, %233, %cst_70 [1] : vector<8x8xf32> to vector<8xf32>
    %235 = vector.shape_cast %234 : vector<8xf32> to vector<8x1xf32>
    %236 = tpu.reciprocal %235 {approx = true} : vector<8x1xf32> -> vector<8x1xf32>
    %237 = vector.broadcast %236 : vector<8x1xf32> to vector<8x8xf32>
    %238 = arith.mulf %233, %237 : vector<8x8xf32>
    %239 = arith.truncf %238 : vector<8x8xf32> to vector<8x8xbf16>
    %cst_71 = arith.constant dense<0.000000e+00> : vector<8x32xf32>
    %240 = tpu.matmul %239, %224, %cst_71 {dimension_numbers = #tpu.dot_dimension_numbers<[1], [0], [0], [1], [0, 0, 1, 1], [], []>} : vector<8x8xbf16>, vector<8x32xbf16>, vector<8x32xf32> -> vector<8x32xf32>
    %241 = arith.truncf %240 : vector<8x32xf32> to vector<8x32xbf16>
    %242 = vector.extract_strided_slice %72 {offsets = [64, 0], sizes = [32, 64], strides = [1, 1]} : vector<128x64xbf16> to vector<32x64xbf16>
    %cst_72 = arith.constant dense<0.000000e+00> : vector<8x64xf32>
    %243 = tpu.matmul %241, %242, %cst_72 {dimension_numbers = #tpu.dot_dimension_numbers<[1], [0], [0], [1], [0, 0, 1, 1], [], []>} : vector<8x32xbf16>, vector<32x64xbf16>, vector<8x64xf32> -> vector<8x64xf32>
    %244 = arith.addf %220, %243 : vector<8x64xf32>
    %245 = vector.extract_strided_slice %64 {offsets = [8, 96], sizes = [8, 32], strides = [1, 1]} : vector<16x128xbf16> to vector<8x32xbf16>
    %246 = vector.extract_strided_slice %65 {offsets = [8, 48], sizes = [8, 16], strides = [1, 1]} : vector<16x64xbf16> to vector<8x16xbf16>
    %247 = vector.extract_strided_slice %68 {offsets = [8, 96], sizes = [8, 32], strides = [1, 1]} : vector<16x128xbf16> to vector<8x32xbf16>
    %248 = vector.extract_strided_slice %70 {offsets = [8, 96], sizes = [8, 32], strides = [1, 1]} : vector<16x128xbf16> to vector<8x32xbf16>
    %cst_73 = arith.constant dense<0.000000e+00> : vector<8x8xf32>
    %249 = tpu.matmul %245, %247, %cst_73 {dimension_numbers = #tpu.dot_dimension_numbers<[1], [1], [0], [0], [0, 0, 1, 0], [], []>} : vector<8x32xbf16>, vector<8x32xbf16>, vector<8x8xf32> -> vector<8x8xf32>
    %cst_74 = arith.constant dense<0.000000e+00> : vector<8x8xf32>
    %250 = tpu.matmul %246, %171, %cst_74 {dimension_numbers = #tpu.dot_dimension_numbers<[1], [1], [0], [0], [0, 0, 1, 0], [], []>} : vector<8x16xbf16>, vector<8x16xbf16>, vector<8x8xf32> -> vector<8x8xf32>
    %251 = arith.addf %249, %250 : vector<8x8xf32>
    %252 = arith.addf %251, %14 : vector<8x8xf32>
    %cst_75 = arith.constant dense<0xFF800000> : vector<8xf32>
    %253 = vector.multi_reduction <maximumf>, %252, %cst_75 [1] : vector<8x8xf32> to vector<8xf32>
    %254 = vector.shape_cast %253 : vector<8xf32> to vector<8x1xf32>
    %255 = vector.broadcast %254 : vector<8x1xf32> to vector<8x8xf32>
    %256 = arith.subf %252, %255 : vector<8x8xf32>
    %257 = math.exp %256 : vector<8x8xf32>
    %cst_76 = arith.constant dense<0.000000e+00> : vector<8xf32>
    %258 = vector.multi_reduction <add>, %257, %cst_76 [1] : vector<8x8xf32> to vector<8xf32>
    %259 = vector.shape_cast %258 : vector<8xf32> to vector<8x1xf32>
    %260 = tpu.reciprocal %259 {approx = true} : vector<8x1xf32> -> vector<8x1xf32>
    %261 = vector.broadcast %260 : vector<8x1xf32> to vector<8x8xf32>
    %262 = arith.mulf %257, %261 : vector<8x8xf32>
    %263 = arith.truncf %262 : vector<8x8xf32> to vector<8x8xbf16>
    %cst_77 = arith.constant dense<0.000000e+00> : vector<8x32xf32>
    %264 = tpu.matmul %263, %248, %cst_77 {dimension_numbers = #tpu.dot_dimension_numbers<[1], [0], [0], [1], [0, 0, 1, 1], [], []>} : vector<8x8xbf16>, vector<8x32xbf16>, vector<8x32xf32> -> vector<8x32xf32>
    %265 = arith.truncf %264 : vector<8x32xf32> to vector<8x32xbf16>
    %266 = vector.extract_strided_slice %72 {offsets = [96, 0], sizes = [32, 64], strides = [1, 1]} : vector<128x64xbf16> to vector<32x64xbf16>
    %cst_78 = arith.constant dense<0.000000e+00> : vector<8x64xf32>
    %267 = tpu.matmul %265, %266, %cst_78 {dimension_numbers = #tpu.dot_dimension_numbers<[1], [0], [0], [1], [0, 0, 1, 1], [], []>} : vector<8x32xbf16>, vector<32x64xbf16>, vector<8x64xf32> -> vector<8x64xf32>
    %268 = arith.addf %244, %267 : vector<8x64xf32>
    %269 = tpu.concatenate %170, %268 in 0 : vector<8x64xf32>, vector<8x64xf32> -> vector<16x64xf32>
    %270 = arith.addf %0, %269 : vector<16x64xf32>
    %271 = vector.extract_strided_slice %17 {offsets = [0, 0], sizes = [1, 64], strides = [1, 1]} : vector<2x64xf32> to vector<1x64xf32>
    %272 = arith.mulf %270, %270 : vector<16x64xf32>
    %cst_79 = arith.constant dense<0.000000e+00> : vector<16xf32>
    %273 = vector.multi_reduction <add>, %272, %cst_79 [1] : vector<16x64xf32> to vector<16xf32>
    %274 = vector.shape_cast %273 : vector<16xf32> to vector<16x1xf32>
    %cst_80 = arith.constant 6.400000e+01 : f32
    %275 = vector.broadcast %cst_80 : f32 to vector<16x1xf32>
    %276 = arith.divf %274, %275 : vector<16x1xf32>
    %cst_81 = arith.constant 9.99999997E-7 : f32
    %277 = vector.broadcast %cst_81 : f32 to vector<16x1xf32>
    %278 = arith.addf %276, %277 : vector<16x1xf32>
    %279 = math.rsqrt %278 : vector<16x1xf32>
    %280 = vector.broadcast %279 : vector<16x1xf32> to vector<16x64xf32>
    %281 = arith.mulf %270, %280 : vector<16x64xf32>
    %282 = vector.broadcast %271 : vector<1x64xf32> to vector<16x64xf32>
    %283 = arith.mulf %281, %282 : vector<16x64xf32>
    %284 = arith.truncf %283 : vector<16x64xf32> to vector<16x64xbf16>
    %c0_82 = arith.constant 0 : index
    %c0_83 = arith.constant 0 : index
    %c0_84 = arith.constant 0 : index
    %285 = vector.load %arg9[%c0_82, %c0_83, %c0_84] : memref<2x64x256xbf16, #tpu.memory_space<vmem>>, vector<1x64x256xbf16>
    %286 = vector.shape_cast %285 : vector<1x64x256xbf16> to vector<64x256xbf16>
    %cst_85 = arith.constant dense<0.000000e+00> : vector<16x256xf32>
    %287 = tpu.matmul %284, %286, %cst_85 {dimension_numbers = #tpu.dot_dimension_numbers<[1], [0], [0], [1], [0, 0, 1, 1], [], []>} : vector<16x64xbf16>, vector<64x256xbf16>, vector<16x256xf32> -> vector<16x256xf32>
    %288 = vector.extract_strided_slice %287 {offsets = [0, 0], sizes = [16, 128], strides = [1, 1]} : vector<16x256xf32> to vector<16x128xf32>
    %289 = vector.extract_strided_slice %287 {offsets = [0, 128], sizes = [16, 128], strides = [1, 1]} : vector<16x256xf32> to vector<16x128xf32>
    %290 = arith.negf %288 : vector<16x128xf32>
    %291 = math.exp %290 : vector<16x128xf32>
    %cst_86 = arith.constant 1.000000e+00 : f32
    %292 = vector.broadcast %cst_86 : f32 to vector<16x128xf32>
    %293 = arith.addf %292, %291 : vector<16x128xf32>
    %294 = arith.divf %292, %293 : vector<16x128xf32>
    %295 = arith.mulf %288, %294 : vector<16x128xf32>
    %296 = arith.mulf %295, %289 : vector<16x128xf32>
    %297 = arith.truncf %296 : vector<16x128xf32> to vector<16x128xbf16>
    %c0_87 = arith.constant 0 : index
    %c0_88 = arith.constant 0 : index
    %c0_89 = arith.constant 0 : index
    %298 = vector.load %arg10[%c0_87, %c0_88, %c0_89] : memref<2x128x64xbf16, #tpu.memory_space<vmem>>, vector<1x128x64xbf16>
    %299 = vector.shape_cast %298 : vector<1x128x64xbf16> to vector<128x64xbf16>
    %cst_90 = arith.constant dense<0.000000e+00> : vector<16x64xf32>
    %300 = tpu.matmul %297, %299, %cst_90 {dimension_numbers = #tpu.dot_dimension_numbers<[1], [0], [0], [1], [0, 0, 1, 1], [], []>} : vector<16x128xbf16>, vector<128x64xbf16>, vector<16x64xf32> -> vector<16x64xf32>
    %301 = arith.addf %270, %300 : vector<16x64xf32>
    %302 = vector.extract_strided_slice %15 {offsets = [1, 0], sizes = [1, 64], strides = [1, 1]} : vector<2x64xf32> to vector<1x64xf32>
    %303 = arith.mulf %301, %301 : vector<16x64xf32>
    %cst_91 = arith.constant dense<0.000000e+00> : vector<16xf32>
    %304 = vector.multi_reduction <add>, %303, %cst_91 [1] : vector<16x64xf32> to vector<16xf32>
    %305 = vector.shape_cast %304 : vector<16xf32> to vector<16x1xf32>
    %cst_92 = arith.constant 6.400000e+01 : f32
    %306 = vector.broadcast %cst_92 : f32 to vector<16x1xf32>
    %307 = arith.divf %305, %306 : vector<16x1xf32>
    %cst_93 = arith.constant 9.99999997E-7 : f32
    %308 = vector.broadcast %cst_93 : f32 to vector<16x1xf32>
    %309 = arith.addf %307, %308 : vector<16x1xf32>
    %310 = math.rsqrt %309 : vector<16x1xf32>
    %311 = vector.broadcast %310 : vector<16x1xf32> to vector<16x64xf32>
    %312 = arith.mulf %301, %311 : vector<16x64xf32>
    %313 = vector.broadcast %302 : vector<1x64xf32> to vector<16x64xf32>
    %314 = arith.mulf %312, %313 : vector<16x64xf32>
    %315 = arith.truncf %314 : vector<16x64xf32> to vector<16x64xbf16>
    %c1 = arith.constant 1 : index
    %c0_94 = arith.constant 0 : index
    %c0_95 = arith.constant 0 : index
    %316 = vector.load %arg6[%c1, %c0_94, %c0_95] : memref<2x64x320xbf16, #tpu.memory_space<vmem>>, vector<1x64x320xbf16>
    %317 = vector.shape_cast %316 : vector<1x64x320xbf16> to vector<64x320xbf16>
    %cst_96 = arith.constant dense<0.000000e+00> : vector<16x320xf32>
    %318 = tpu.matmul %315, %317, %cst_96 {dimension_numbers = #tpu.dot_dimension_numbers<[1], [0], [0], [1], [0, 0, 1, 1], [], []>} : vector<16x64xbf16>, vector<64x320xbf16>, vector<16x320xf32> -> vector<16x320xf32>
    %319 = vector.extract_strided_slice %318 {offsets = [0, 0], sizes = [16, 128], strides = [1, 1]} : vector<16x320xf32> to vector<16x128xf32>
    %320 = vector.extract_strided_slice %318 {offsets = [0, 128], sizes = [16, 64], strides = [1, 1]} : vector<16x320xf32> to vector<16x64xf32>
    %321 = arith.mulf %320, %5 : vector<16x64xf32>
    %322 = vector.extract_strided_slice %318 {offsets = [0, 192], sizes = [16, 64], strides = [1, 1]} : vector<16x320xf32> to vector<16x64xf32>
    %323 = arith.mulf %322, %6 : vector<16x64xf32>
    %324 = arith.addf %321, %323 : vector<16x64xf32>
    %325 = vector.extract_strided_slice %318 {offsets = [0, 256], sizes = [16, 32], strides = [1, 1]} : vector<16x320xf32> to vector<16x32xf32>
    %326 = vector.extract_strided_slice %318 {offsets = [0, 288], sizes = [16, 16], strides = [1, 1]} : vector<16x320xf32> to vector<16x16xf32>
    %327 = arith.mulf %326, %7 : vector<16x16xf32>
    %328 = vector.extract_strided_slice %318 {offsets = [0, 304], sizes = [16, 16], strides = [1, 1]} : vector<16x320xf32> to vector<16x16xf32>
    %329 = arith.mulf %328, %8 : vector<16x16xf32>
    %330 = arith.addf %327, %329 : vector<16x16xf32>
    %331 = vector.extract_strided_slice %16 {offsets = [1, 0], sizes = [1, 32], strides = [1, 1]} : vector<2x32xf32> to vector<1x32xf32>
    %332 = arith.mulf %325, %325 : vector<16x32xf32>
    %cst_97 = arith.constant dense<0.000000e+00> : vector<16xf32>
    %333 = vector.multi_reduction <add>, %332, %cst_97 [1] : vector<16x32xf32> to vector<16xf32>
    %334 = vector.shape_cast %333 : vector<16xf32> to vector<16x1xf32>
    %cst_98 = arith.constant 3.200000e+01 : f32
    %335 = vector.broadcast %cst_98 : f32 to vector<16x1xf32>
    %336 = arith.divf %334, %335 : vector<16x1xf32>
    %cst_99 = arith.constant 9.99999997E-7 : f32
    %337 = vector.broadcast %cst_99 : f32 to vector<16x1xf32>
    %338 = arith.addf %336, %337 : vector<16x1xf32>
    %339 = math.rsqrt %338 : vector<16x1xf32>
    %340 = vector.broadcast %339 : vector<16x1xf32> to vector<16x32xf32>
    %341 = arith.mulf %325, %340 : vector<16x32xf32>
    %342 = vector.broadcast %331 : vector<1x32xf32> to vector<16x32xf32>
    %343 = arith.mulf %341, %342 : vector<16x32xf32>
    %344 = arith.truncf %343 : vector<16x32xf32> to vector<16x32xbf16>
    %c1_100 = arith.constant 1 : index
    %c0_101 = arith.constant 0 : index
    %c0_102 = arith.constant 0 : index
    %345 = vector.load %arg7[%c1_100, %c0_101, %c0_102] : memref<2x32x256xbf16, #tpu.memory_space<vmem>>, vector<1x32x256xbf16>
    %346 = vector.shape_cast %345 : vector<1x32x256xbf16> to vector<32x256xbf16>
    %cst_103 = arith.constant dense<0.000000e+00> : vector<16x256xf32>
    %347 = tpu.matmul %344, %346, %cst_103 {dimension_numbers = #tpu.dot_dimension_numbers<[1], [0], [0], [1], [0, 0, 1, 1], [], []>} : vector<16x32xbf16>, vector<32x256xbf16>, vector<16x256xf32> -> vector<16x256xf32>
    %348 = arith.truncf %319 : vector<16x128xf32> to vector<16x128xbf16>
    %349 = arith.truncf %324 : vector<16x64xf32> to vector<16x64xbf16>
    %350 = arith.truncf %330 : vector<16x16xf32> to vector<16x16xbf16>
    %351 = vector.extract_strided_slice %347 {offsets = [0, 0], sizes = [16, 128], strides = [1, 1]} : vector<16x256xf32> to vector<16x128xf32>
    %352 = arith.truncf %351 : vector<16x128xf32> to vector<16x128xbf16>
    %353 = vector.extract_strided_slice %347 {offsets = [0, 128], sizes = [16, 128], strides = [1, 1]} : vector<16x256xf32> to vector<16x128xf32>
    %354 = arith.truncf %353 : vector<16x128xf32> to vector<16x128xbf16>
    %c1_104 = arith.constant 1 : index
    %c0_105 = arith.constant 0 : index
    %c0_106 = arith.constant 0 : index
    %355 = vector.load %arg8[%c1_104, %c0_105, %c0_106] : memref<2x128x64xbf16, #tpu.memory_space<vmem>>, vector<1x128x64xbf16>
    %356 = vector.shape_cast %355 : vector<1x128x64xbf16> to vector<128x64xbf16>
    %357 = vector.extract_strided_slice %350 {offsets = [0, 0], sizes = [8, 16], strides = [1, 1]} : vector<16x16xbf16> to vector<8x16xbf16>
    %cst_107 = arith.constant 0.000000e+00 : f32
    %358 = vector.broadcast %cst_107 : f32 to vector<8x64xf32>
    %359 = vector.extract_strided_slice %348 {offsets = [0, 0], sizes = [8, 32], strides = [1, 1]} : vector<16x128xbf16> to vector<8x32xbf16>
    %360 = vector.extract_strided_slice %349 {offsets = [0, 0], sizes = [8, 16], strides = [1, 1]} : vector<16x64xbf16> to vector<8x16xbf16>
    %361 = vector.extract_strided_slice %352 {offsets = [0, 0], sizes = [8, 32], strides = [1, 1]} : vector<16x128xbf16> to vector<8x32xbf16>
    %362 = vector.extract_strided_slice %354 {offsets = [0, 0], sizes = [8, 32], strides = [1, 1]} : vector<16x128xbf16> to vector<8x32xbf16>
    %cst_108 = arith.constant dense<0.000000e+00> : vector<8x8xf32>
    %363 = tpu.matmul %359, %361, %cst_108 {dimension_numbers = #tpu.dot_dimension_numbers<[1], [1], [0], [0], [0, 0, 1, 0], [], []>} : vector<8x32xbf16>, vector<8x32xbf16>, vector<8x8xf32> -> vector<8x8xf32>
    %cst_109 = arith.constant dense<0.000000e+00> : vector<8x8xf32>
    %364 = tpu.matmul %360, %357, %cst_109 {dimension_numbers = #tpu.dot_dimension_numbers<[1], [1], [0], [0], [0, 0, 1, 0], [], []>} : vector<8x16xbf16>, vector<8x16xbf16>, vector<8x8xf32> -> vector<8x8xf32>
    %365 = arith.addf %363, %364 : vector<8x8xf32>
    %366 = arith.addf %365, %14 : vector<8x8xf32>
    %cst_110 = arith.constant dense<0xFF800000> : vector<8xf32>
    %367 = vector.multi_reduction <maximumf>, %366, %cst_110 [1] : vector<8x8xf32> to vector<8xf32>
    %368 = vector.shape_cast %367 : vector<8xf32> to vector<8x1xf32>
    %369 = vector.broadcast %368 : vector<8x1xf32> to vector<8x8xf32>
    %370 = arith.subf %366, %369 : vector<8x8xf32>
    %371 = math.exp %370 : vector<8x8xf32>
    %cst_111 = arith.constant dense<0.000000e+00> : vector<8xf32>
    %372 = vector.multi_reduction <add>, %371, %cst_111 [1] : vector<8x8xf32> to vector<8xf32>
    %373 = vector.shape_cast %372 : vector<8xf32> to vector<8x1xf32>
    %374 = tpu.reciprocal %373 {approx = true} : vector<8x1xf32> -> vector<8x1xf32>
    %375 = vector.broadcast %374 : vector<8x1xf32> to vector<8x8xf32>
    %376 = arith.mulf %371, %375 : vector<8x8xf32>
    %377 = arith.truncf %376 : vector<8x8xf32> to vector<8x8xbf16>
    %cst_112 = arith.constant dense<0.000000e+00> : vector<8x32xf32>
    %378 = tpu.matmul %377, %362, %cst_112 {dimension_numbers = #tpu.dot_dimension_numbers<[1], [0], [0], [1], [0, 0, 1, 1], [], []>} : vector<8x8xbf16>, vector<8x32xbf16>, vector<8x32xf32> -> vector<8x32xf32>
    %379 = arith.truncf %378 : vector<8x32xf32> to vector<8x32xbf16>
    %380 = vector.extract_strided_slice %356 {offsets = [0, 0], sizes = [32, 64], strides = [1, 1]} : vector<128x64xbf16> to vector<32x64xbf16>
    %cst_113 = arith.constant dense<0.000000e+00> : vector<8x64xf32>
    %381 = tpu.matmul %379, %380, %cst_113 {dimension_numbers = #tpu.dot_dimension_numbers<[1], [0], [0], [1], [0, 0, 1, 1], [], []>} : vector<8x32xbf16>, vector<32x64xbf16>, vector<8x64xf32> -> vector<8x64xf32>
    %382 = arith.addf %358, %381 : vector<8x64xf32>
    %383 = vector.extract_strided_slice %348 {offsets = [0, 32], sizes = [8, 32], strides = [1, 1]} : vector<16x128xbf16> to vector<8x32xbf16>
    %384 = vector.extract_strided_slice %349 {offsets = [0, 16], sizes = [8, 16], strides = [1, 1]} : vector<16x64xbf16> to vector<8x16xbf16>
    %385 = vector.extract_strided_slice %352 {offsets = [0, 32], sizes = [8, 32], strides = [1, 1]} : vector<16x128xbf16> to vector<8x32xbf16>
    %386 = vector.extract_strided_slice %354 {offsets = [0, 32], sizes = [8, 32], strides = [1, 1]} : vector<16x128xbf16> to vector<8x32xbf16>
    %cst_114 = arith.constant dense<0.000000e+00> : vector<8x8xf32>
    %387 = tpu.matmul %383, %385, %cst_114 {dimension_numbers = #tpu.dot_dimension_numbers<[1], [1], [0], [0], [0, 0, 1, 0], [], []>} : vector<8x32xbf16>, vector<8x32xbf16>, vector<8x8xf32> -> vector<8x8xf32>
    %cst_115 = arith.constant dense<0.000000e+00> : vector<8x8xf32>
    %388 = tpu.matmul %384, %357, %cst_115 {dimension_numbers = #tpu.dot_dimension_numbers<[1], [1], [0], [0], [0, 0, 1, 0], [], []>} : vector<8x16xbf16>, vector<8x16xbf16>, vector<8x8xf32> -> vector<8x8xf32>
    %389 = arith.addf %387, %388 : vector<8x8xf32>
    %390 = arith.addf %389, %14 : vector<8x8xf32>
    %cst_116 = arith.constant dense<0xFF800000> : vector<8xf32>
    %391 = vector.multi_reduction <maximumf>, %390, %cst_116 [1] : vector<8x8xf32> to vector<8xf32>
    %392 = vector.shape_cast %391 : vector<8xf32> to vector<8x1xf32>
    %393 = vector.broadcast %392 : vector<8x1xf32> to vector<8x8xf32>
    %394 = arith.subf %390, %393 : vector<8x8xf32>
    %395 = math.exp %394 : vector<8x8xf32>
    %cst_117 = arith.constant dense<0.000000e+00> : vector<8xf32>
    %396 = vector.multi_reduction <add>, %395, %cst_117 [1] : vector<8x8xf32> to vector<8xf32>
    %397 = vector.shape_cast %396 : vector<8xf32> to vector<8x1xf32>
    %398 = tpu.reciprocal %397 {approx = true} : vector<8x1xf32> -> vector<8x1xf32>
    %399 = vector.broadcast %398 : vector<8x1xf32> to vector<8x8xf32>
    %400 = arith.mulf %395, %399 : vector<8x8xf32>
    %401 = arith.truncf %400 : vector<8x8xf32> to vector<8x8xbf16>
    %cst_118 = arith.constant dense<0.000000e+00> : vector<8x32xf32>
    %402 = tpu.matmul %401, %386, %cst_118 {dimension_numbers = #tpu.dot_dimension_numbers<[1], [0], [0], [1], [0, 0, 1, 1], [], []>} : vector<8x8xbf16>, vector<8x32xbf16>, vector<8x32xf32> -> vector<8x32xf32>
    %403 = arith.truncf %402 : vector<8x32xf32> to vector<8x32xbf16>
    %404 = vector.extract_strided_slice %356 {offsets = [32, 0], sizes = [32, 64], strides = [1, 1]} : vector<128x64xbf16> to vector<32x64xbf16>
    %cst_119 = arith.constant dense<0.000000e+00> : vector<8x64xf32>
    %405 = tpu.matmul %403, %404, %cst_119 {dimension_numbers = #tpu.dot_dimension_numbers<[1], [0], [0], [1], [0, 0, 1, 1], [], []>} : vector<8x32xbf16>, vector<32x64xbf16>, vector<8x64xf32> -> vector<8x64xf32>
    %406 = arith.addf %382, %405 : vector<8x64xf32>
    %407 = vector.extract_strided_slice %348 {offsets = [0, 64], sizes = [8, 32], strides = [1, 1]} : vector<16x128xbf16> to vector<8x32xbf16>
    %408 = vector.extract_strided_slice %349 {offsets = [0, 32], sizes = [8, 16], strides = [1, 1]} : vector<16x64xbf16> to vector<8x16xbf16>
    %409 = vector.extract_strided_slice %352 {offsets = [0, 64], sizes = [8, 32], strides = [1, 1]} : vector<16x128xbf16> to vector<8x32xbf16>
    %410 = vector.extract_strided_slice %354 {offsets = [0, 64], sizes = [8, 32], strides = [1, 1]} : vector<16x128xbf16> to vector<8x32xbf16>
    %cst_120 = arith.constant dense<0.000000e+00> : vector<8x8xf32>
    %411 = tpu.matmul %407, %409, %cst_120 {dimension_numbers = #tpu.dot_dimension_numbers<[1], [1], [0], [0], [0, 0, 1, 0], [], []>} : vector<8x32xbf16>, vector<8x32xbf16>, vector<8x8xf32> -> vector<8x8xf32>
    %cst_121 = arith.constant dense<0.000000e+00> : vector<8x8xf32>
    %412 = tpu.matmul %408, %357, %cst_121 {dimension_numbers = #tpu.dot_dimension_numbers<[1], [1], [0], [0], [0, 0, 1, 0], [], []>} : vector<8x16xbf16>, vector<8x16xbf16>, vector<8x8xf32> -> vector<8x8xf32>
    %413 = arith.addf %411, %412 : vector<8x8xf32>
    %414 = arith.addf %413, %14 : vector<8x8xf32>
    %cst_122 = arith.constant dense<0xFF800000> : vector<8xf32>
    %415 = vector.multi_reduction <maximumf>, %414, %cst_122 [1] : vector<8x8xf32> to vector<8xf32>
    %416 = vector.shape_cast %415 : vector<8xf32> to vector<8x1xf32>
    %417 = vector.broadcast %416 : vector<8x1xf32> to vector<8x8xf32>
    %418 = arith.subf %414, %417 : vector<8x8xf32>
    %419 = math.exp %418 : vector<8x8xf32>
    %cst_123 = arith.constant dense<0.000000e+00> : vector<8xf32>
    %420 = vector.multi_reduction <add>, %419, %cst_123 [1] : vector<8x8xf32> to vector<8xf32>
    %421 = vector.shape_cast %420 : vector<8xf32> to vector<8x1xf32>
    %422 = tpu.reciprocal %421 {approx = true} : vector<8x1xf32> -> vector<8x1xf32>
    %423 = vector.broadcast %422 : vector<8x1xf32> to vector<8x8xf32>
    %424 = arith.mulf %419, %423 : vector<8x8xf32>
    %425 = arith.truncf %424 : vector<8x8xf32> to vector<8x8xbf16>
    %cst_124 = arith.constant dense<0.000000e+00> : vector<8x32xf32>
    %426 = tpu.matmul %425, %410, %cst_124 {dimension_numbers = #tpu.dot_dimension_numbers<[1], [0], [0], [1], [0, 0, 1, 1], [], []>} : vector<8x8xbf16>, vector<8x32xbf16>, vector<8x32xf32> -> vector<8x32xf32>
    %427 = arith.truncf %426 : vector<8x32xf32> to vector<8x32xbf16>
    %428 = vector.extract_strided_slice %356 {offsets = [64, 0], sizes = [32, 64], strides = [1, 1]} : vector<128x64xbf16> to vector<32x64xbf16>
    %cst_125 = arith.constant dense<0.000000e+00> : vector<8x64xf32>
    %429 = tpu.matmul %427, %428, %cst_125 {dimension_numbers = #tpu.dot_dimension_numbers<[1], [0], [0], [1], [0, 0, 1, 1], [], []>} : vector<8x32xbf16>, vector<32x64xbf16>, vector<8x64xf32> -> vector<8x64xf32>
    %430 = arith.addf %406, %429 : vector<8x64xf32>
    %431 = vector.extract_strided_slice %348 {offsets = [0, 96], sizes = [8, 32], strides = [1, 1]} : vector<16x128xbf16> to vector<8x32xbf16>
    %432 = vector.extract_strided_slice %349 {offsets = [0, 48], sizes = [8, 16], strides = [1, 1]} : vector<16x64xbf16> to vector<8x16xbf16>
    %433 = vector.extract_strided_slice %352 {offsets = [0, 96], sizes = [8, 32], strides = [1, 1]} : vector<16x128xbf16> to vector<8x32xbf16>
    %434 = vector.extract_strided_slice %354 {offsets = [0, 96], sizes = [8, 32], strides = [1, 1]} : vector<16x128xbf16> to vector<8x32xbf16>
    %cst_126 = arith.constant dense<0.000000e+00> : vector<8x8xf32>
    %435 = tpu.matmul %431, %433, %cst_126 {dimension_numbers = #tpu.dot_dimension_numbers<[1], [1], [0], [0], [0, 0, 1, 0], [], []>} : vector<8x32xbf16>, vector<8x32xbf16>, vector<8x8xf32> -> vector<8x8xf32>
    %cst_127 = arith.constant dense<0.000000e+00> : vector<8x8xf32>
    %436 = tpu.matmul %432, %357, %cst_127 {dimension_numbers = #tpu.dot_dimension_numbers<[1], [1], [0], [0], [0, 0, 1, 0], [], []>} : vector<8x16xbf16>, vector<8x16xbf16>, vector<8x8xf32> -> vector<8x8xf32>
    %437 = arith.addf %435, %436 : vector<8x8xf32>
    %438 = arith.addf %437, %14 : vector<8x8xf32>
    %cst_128 = arith.constant dense<0xFF800000> : vector<8xf32>
    %439 = vector.multi_reduction <maximumf>, %438, %cst_128 [1] : vector<8x8xf32> to vector<8xf32>
    %440 = vector.shape_cast %439 : vector<8xf32> to vector<8x1xf32>
    %441 = vector.broadcast %440 : vector<8x1xf32> to vector<8x8xf32>
    %442 = arith.subf %438, %441 : vector<8x8xf32>
    %443 = math.exp %442 : vector<8x8xf32>
    %cst_129 = arith.constant dense<0.000000e+00> : vector<8xf32>
    %444 = vector.multi_reduction <add>, %443, %cst_129 [1] : vector<8x8xf32> to vector<8xf32>
    %445 = vector.shape_cast %444 : vector<8xf32> to vector<8x1xf32>
    %446 = tpu.reciprocal %445 {approx = true} : vector<8x1xf32> -> vector<8x1xf32>
    %447 = vector.broadcast %446 : vector<8x1xf32> to vector<8x8xf32>
    %448 = arith.mulf %443, %447 : vector<8x8xf32>
    %449 = arith.truncf %448 : vector<8x8xf32> to vector<8x8xbf16>
    %cst_130 = arith.constant dense<0.000000e+00> : vector<8x32xf32>
    %450 = tpu.matmul %449, %434, %cst_130 {dimension_numbers = #tpu.dot_dimension_numbers<[1], [0], [0], [1], [0, 0, 1, 1], [], []>} : vector<8x8xbf16>, vector<8x32xbf16>, vector<8x32xf32> -> vector<8x32xf32>
    %451 = arith.truncf %450 : vector<8x32xf32> to vector<8x32xbf16>
    %452 = vector.extract_strided_slice %356 {offsets = [96, 0], sizes = [32, 64], strides = [1, 1]} : vector<128x64xbf16> to vector<32x64xbf16>
    %cst_131 = arith.constant dense<0.000000e+00> : vector<8x64xf32>
    %453 = tpu.matmul %451, %452, %cst_131 {dimension_numbers = #tpu.dot_dimension_numbers<[1], [0], [0], [1], [0, 0, 1, 1], [], []>} : vector<8x32xbf16>, vector<32x64xbf16>, vector<8x64xf32> -> vector<8x64xf32>
    %454 = arith.addf %430, %453 : vector<8x64xf32>
    %455 = vector.extract_strided_slice %350 {offsets = [8, 0], sizes = [8, 16], strides = [1, 1]} : vector<16x16xbf16> to vector<8x16xbf16>
    %cst_132 = arith.constant 0.000000e+00 : f32
    %456 = vector.broadcast %cst_132 : f32 to vector<8x64xf32>
    %457 = vector.extract_strided_slice %348 {offsets = [8, 0], sizes = [8, 32], strides = [1, 1]} : vector<16x128xbf16> to vector<8x32xbf16>
    %458 = vector.extract_strided_slice %349 {offsets = [8, 0], sizes = [8, 16], strides = [1, 1]} : vector<16x64xbf16> to vector<8x16xbf16>
    %459 = vector.extract_strided_slice %352 {offsets = [8, 0], sizes = [8, 32], strides = [1, 1]} : vector<16x128xbf16> to vector<8x32xbf16>
    %460 = vector.extract_strided_slice %354 {offsets = [8, 0], sizes = [8, 32], strides = [1, 1]} : vector<16x128xbf16> to vector<8x32xbf16>
    %cst_133 = arith.constant dense<0.000000e+00> : vector<8x8xf32>
    %461 = tpu.matmul %457, %459, %cst_133 {dimension_numbers = #tpu.dot_dimension_numbers<[1], [1], [0], [0], [0, 0, 1, 0], [], []>} : vector<8x32xbf16>, vector<8x32xbf16>, vector<8x8xf32> -> vector<8x8xf32>
    %cst_134 = arith.constant dense<0.000000e+00> : vector<8x8xf32>
    %462 = tpu.matmul %458, %455, %cst_134 {dimension_numbers = #tpu.dot_dimension_numbers<[1], [1], [0], [0], [0, 0, 1, 0], [], []>} : vector<8x16xbf16>, vector<8x16xbf16>, vector<8x8xf32> -> vector<8x8xf32>
    %463 = arith.addf %461, %462 : vector<8x8xf32>
    %464 = arith.addf %463, %14 : vector<8x8xf32>
    %cst_135 = arith.constant dense<0xFF800000> : vector<8xf32>
    %465 = vector.multi_reduction <maximumf>, %464, %cst_135 [1] : vector<8x8xf32> to vector<8xf32>
    %466 = vector.shape_cast %465 : vector<8xf32> to vector<8x1xf32>
    %467 = vector.broadcast %466 : vector<8x1xf32> to vector<8x8xf32>
    %468 = arith.subf %464, %467 : vector<8x8xf32>
    %469 = math.exp %468 : vector<8x8xf32>
    %cst_136 = arith.constant dense<0.000000e+00> : vector<8xf32>
    %470 = vector.multi_reduction <add>, %469, %cst_136 [1] : vector<8x8xf32> to vector<8xf32>
    %471 = vector.shape_cast %470 : vector<8xf32> to vector<8x1xf32>
    %472 = tpu.reciprocal %471 {approx = true} : vector<8x1xf32> -> vector<8x1xf32>
    %473 = vector.broadcast %472 : vector<8x1xf32> to vector<8x8xf32>
    %474 = arith.mulf %469, %473 : vector<8x8xf32>
    %475 = arith.truncf %474 : vector<8x8xf32> to vector<8x8xbf16>
    %cst_137 = arith.constant dense<0.000000e+00> : vector<8x32xf32>
    %476 = tpu.matmul %475, %460, %cst_137 {dimension_numbers = #tpu.dot_dimension_numbers<[1], [0], [0], [1], [0, 0, 1, 1], [], []>} : vector<8x8xbf16>, vector<8x32xbf16>, vector<8x32xf32> -> vector<8x32xf32>
    %477 = arith.truncf %476 : vector<8x32xf32> to vector<8x32xbf16>
    %478 = vector.extract_strided_slice %356 {offsets = [0, 0], sizes = [32, 64], strides = [1, 1]} : vector<128x64xbf16> to vector<32x64xbf16>
    %cst_138 = arith.constant dense<0.000000e+00> : vector<8x64xf32>
    %479 = tpu.matmul %477, %478, %cst_138 {dimension_numbers = #tpu.dot_dimension_numbers<[1], [0], [0], [1], [0, 0, 1, 1], [], []>} : vector<8x32xbf16>, vector<32x64xbf16>, vector<8x64xf32> -> vector<8x64xf32>
    %480 = arith.addf %456, %479 : vector<8x64xf32>
    %481 = vector.extract_strided_slice %348 {offsets = [8, 32], sizes = [8, 32], strides = [1, 1]} : vector<16x128xbf16> to vector<8x32xbf16>
    %482 = vector.extract_strided_slice %349 {offsets = [8, 16], sizes = [8, 16], strides = [1, 1]} : vector<16x64xbf16> to vector<8x16xbf16>
    %483 = vector.extract_strided_slice %352 {offsets = [8, 32], sizes = [8, 32], strides = [1, 1]} : vector<16x128xbf16> to vector<8x32xbf16>
    %484 = vector.extract_strided_slice %354 {offsets = [8, 32], sizes = [8, 32], strides = [1, 1]} : vector<16x128xbf16> to vector<8x32xbf16>
    %cst_139 = arith.constant dense<0.000000e+00> : vector<8x8xf32>
    %485 = tpu.matmul %481, %483, %cst_139 {dimension_numbers = #tpu.dot_dimension_numbers<[1], [1], [0], [0], [0, 0, 1, 0], [], []>} : vector<8x32xbf16>, vector<8x32xbf16>, vector<8x8xf32> -> vector<8x8xf32>
    %cst_140 = arith.constant dense<0.000000e+00> : vector<8x8xf32>
    %486 = tpu.matmul %482, %455, %cst_140 {dimension_numbers = #tpu.dot_dimension_numbers<[1], [1], [0], [0], [0, 0, 1, 0], [], []>} : vector<8x16xbf16>, vector<8x16xbf16>, vector<8x8xf32> -> vector<8x8xf32>
    %487 = arith.addf %485, %486 : vector<8x8xf32>
    %488 = arith.addf %487, %14 : vector<8x8xf32>
    %cst_141 = arith.constant dense<0xFF800000> : vector<8xf32>
    %489 = vector.multi_reduction <maximumf>, %488, %cst_141 [1] : vector<8x8xf32> to vector<8xf32>
    %490 = vector.shape_cast %489 : vector<8xf32> to vector<8x1xf32>
    %491 = vector.broadcast %490 : vector<8x1xf32> to vector<8x8xf32>
    %492 = arith.subf %488, %491 : vector<8x8xf32>
    %493 = math.exp %492 : vector<8x8xf32>
    %cst_142 = arith.constant dense<0.000000e+00> : vector<8xf32>
    %494 = vector.multi_reduction <add>, %493, %cst_142 [1] : vector<8x8xf32> to vector<8xf32>
    %495 = vector.shape_cast %494 : vector<8xf32> to vector<8x1xf32>
    %496 = tpu.reciprocal %495 {approx = true} : vector<8x1xf32> -> vector<8x1xf32>
    %497 = vector.broadcast %496 : vector<8x1xf32> to vector<8x8xf32>
    %498 = arith.mulf %493, %497 : vector<8x8xf32>
    %499 = arith.truncf %498 : vector<8x8xf32> to vector<8x8xbf16>
    %cst_143 = arith.constant dense<0.000000e+00> : vector<8x32xf32>
    %500 = tpu.matmul %499, %484, %cst_143 {dimension_numbers = #tpu.dot_dimension_numbers<[1], [0], [0], [1], [0, 0, 1, 1], [], []>} : vector<8x8xbf16>, vector<8x32xbf16>, vector<8x32xf32> -> vector<8x32xf32>
    %501 = arith.truncf %500 : vector<8x32xf32> to vector<8x32xbf16>
    %502 = vector.extract_strided_slice %356 {offsets = [32, 0], sizes = [32, 64], strides = [1, 1]} : vector<128x64xbf16> to vector<32x64xbf16>
    %cst_144 = arith.constant dense<0.000000e+00> : vector<8x64xf32>
    %503 = tpu.matmul %501, %502, %cst_144 {dimension_numbers = #tpu.dot_dimension_numbers<[1], [0], [0], [1], [0, 0, 1, 1], [], []>} : vector<8x32xbf16>, vector<32x64xbf16>, vector<8x64xf32> -> vector<8x64xf32>
    %504 = arith.addf %480, %503 : vector<8x64xf32>
    %505 = vector.extract_strided_slice %348 {offsets = [8, 64], sizes = [8, 32], strides = [1, 1]} : vector<16x128xbf16> to vector<8x32xbf16>
    %506 = vector.extract_strided_slice %349 {offsets = [8, 32], sizes = [8, 16], strides = [1, 1]} : vector<16x64xbf16> to vector<8x16xbf16>
    %507 = vector.extract_strided_slice %352 {offsets = [8, 64], sizes = [8, 32], strides = [1, 1]} : vector<16x128xbf16> to vector<8x32xbf16>
    %508 = vector.extract_strided_slice %354 {offsets = [8, 64], sizes = [8, 32], strides = [1, 1]} : vector<16x128xbf16> to vector<8x32xbf16>
    %cst_145 = arith.constant dense<0.000000e+00> : vector<8x8xf32>
    %509 = tpu.matmul %505, %507, %cst_145 {dimension_numbers = #tpu.dot_dimension_numbers<[1], [1], [0], [0], [0, 0, 1, 0], [], []>} : vector<8x32xbf16>, vector<8x32xbf16>, vector<8x8xf32> -> vector<8x8xf32>
    %cst_146 = arith.constant dense<0.000000e+00> : vector<8x8xf32>
    %510 = tpu.matmul %506, %455, %cst_146 {dimension_numbers = #tpu.dot_dimension_numbers<[1], [1], [0], [0], [0, 0, 1, 0], [], []>} : vector<8x16xbf16>, vector<8x16xbf16>, vector<8x8xf32> -> vector<8x8xf32>
    %511 = arith.addf %509, %510 : vector<8x8xf32>
    %512 = arith.addf %511, %14 : vector<8x8xf32>
    %cst_147 = arith.constant dense<0xFF800000> : vector<8xf32>
    %513 = vector.multi_reduction <maximumf>, %512, %cst_147 [1] : vector<8x8xf32> to vector<8xf32>
    %514 = vector.shape_cast %513 : vector<8xf32> to vector<8x1xf32>
    %515 = vector.broadcast %514 : vector<8x1xf32> to vector<8x8xf32>
    %516 = arith.subf %512, %515 : vector<8x8xf32>
    %517 = math.exp %516 : vector<8x8xf32>
    %cst_148 = arith.constant dense<0.000000e+00> : vector<8xf32>
    %518 = vector.multi_reduction <add>, %517, %cst_148 [1] : vector<8x8xf32> to vector<8xf32>
    %519 = vector.shape_cast %518 : vector<8xf32> to vector<8x1xf32>
    %520 = tpu.reciprocal %519 {approx = true} : vector<8x1xf32> -> vector<8x1xf32>
    %521 = vector.broadcast %520 : vector<8x1xf32> to vector<8x8xf32>
    %522 = arith.mulf %517, %521 : vector<8x8xf32>
    %523 = arith.truncf %522 : vector<8x8xf32> to vector<8x8xbf16>
    %cst_149 = arith.constant dense<0.000000e+00> : vector<8x32xf32>
    %524 = tpu.matmul %523, %508, %cst_149 {dimension_numbers = #tpu.dot_dimension_numbers<[1], [0], [0], [1], [0, 0, 1, 1], [], []>} : vector<8x8xbf16>, vector<8x32xbf16>, vector<8x32xf32> -> vector<8x32xf32>
    %525 = arith.truncf %524 : vector<8x32xf32> to vector<8x32xbf16>
    %526 = vector.extract_strided_slice %356 {offsets = [64, 0], sizes = [32, 64], strides = [1, 1]} : vector<128x64xbf16> to vector<32x64xbf16>
    %cst_150 = arith.constant dense<0.000000e+00> : vector<8x64xf32>
    %527 = tpu.matmul %525, %526, %cst_150 {dimension_numbers = #tpu.dot_dimension_numbers<[1], [0], [0], [1], [0, 0, 1, 1], [], []>} : vector<8x32xbf16>, vector<32x64xbf16>, vector<8x64xf32> -> vector<8x64xf32>
    %528 = arith.addf %504, %527 : vector<8x64xf32>
    %529 = vector.extract_strided_slice %348 {offsets = [8, 96], sizes = [8, 32], strides = [1, 1]} : vector<16x128xbf16> to vector<8x32xbf16>
    %530 = vector.extract_strided_slice %349 {offsets = [8, 48], sizes = [8, 16], strides = [1, 1]} : vector<16x64xbf16> to vector<8x16xbf16>
    %531 = vector.extract_strided_slice %352 {offsets = [8, 96], sizes = [8, 32], strides = [1, 1]} : vector<16x128xbf16> to vector<8x32xbf16>
    %532 = vector.extract_strided_slice %354 {offsets = [8, 96], sizes = [8, 32], strides = [1, 1]} : vector<16x128xbf16> to vector<8x32xbf16>
    %cst_151 = arith.constant dense<0.000000e+00> : vector<8x8xf32>
    %533 = tpu.matmul %529, %531, %cst_151 {dimension_numbers = #tpu.dot_dimension_numbers<[1], [1], [0], [0], [0, 0, 1, 0], [], []>} : vector<8x32xbf16>, vector<8x32xbf16>, vector<8x8xf32> -> vector<8x8xf32>
    %cst_152 = arith.constant dense<0.000000e+00> : vector<8x8xf32>
    %534 = tpu.matmul %530, %455, %cst_152 {dimension_numbers = #tpu.dot_dimension_numbers<[1], [1], [0], [0], [0, 0, 1, 0], [], []>} : vector<8x16xbf16>, vector<8x16xbf16>, vector<8x8xf32> -> vector<8x8xf32>
    %535 = arith.addf %533, %534 : vector<8x8xf32>
    %536 = arith.addf %535, %14 : vector<8x8xf32>
    %cst_153 = arith.constant dense<0xFF800000> : vector<8xf32>
    %537 = vector.multi_reduction <maximumf>, %536, %cst_153 [1] : vector<8x8xf32> to vector<8xf32>
    %538 = vector.shape_cast %537 : vector<8xf32> to vector<8x1xf32>
    %539 = vector.broadcast %538 : vector<8x1xf32> to vector<8x8xf32>
    %540 = arith.subf %536, %539 : vector<8x8xf32>
    %541 = math.exp %540 : vector<8x8xf32>
    %cst_154 = arith.constant dense<0.000000e+00> : vector<8xf32>
    %542 = vector.multi_reduction <add>, %541, %cst_154 [1] : vector<8x8xf32> to vector<8xf32>
    %543 = vector.shape_cast %542 : vector<8xf32> to vector<8x1xf32>
    %544 = tpu.reciprocal %543 {approx = true} : vector<8x1xf32> -> vector<8x1xf32>
    %545 = vector.broadcast %544 : vector<8x1xf32> to vector<8x8xf32>
    %546 = arith.mulf %541, %545 : vector<8x8xf32>
    %547 = arith.truncf %546 : vector<8x8xf32> to vector<8x8xbf16>
    %cst_155 = arith.constant dense<0.000000e+00> : vector<8x32xf32>
    %548 = tpu.matmul %547, %532, %cst_155 {dimension_numbers = #tpu.dot_dimension_numbers<[1], [0], [0], [1], [0, 0, 1, 1], [], []>} : vector<8x8xbf16>, vector<8x32xbf16>, vector<8x32xf32> -> vector<8x32xf32>
    %549 = arith.truncf %548 : vector<8x32xf32> to vector<8x32xbf16>
    %550 = vector.extract_strided_slice %356 {offsets = [96, 0], sizes = [32, 64], strides = [1, 1]} : vector<128x64xbf16> to vector<32x64xbf16>
    %cst_156 = arith.constant dense<0.000000e+00> : vector<8x64xf32>
    %551 = tpu.matmul %549, %550, %cst_156 {dimension_numbers = #tpu.dot_dimension_numbers<[1], [0], [0], [1], [0, 0, 1, 1], [], []>} : vector<8x32xbf16>, vector<32x64xbf16>, vector<8x64xf32> -> vector<8x64xf32>
    %552 = arith.addf %528, %551 : vector<8x64xf32>
    %553 = tpu.concatenate %454, %552 in 0 : vector<8x64xf32>, vector<8x64xf32> -> vector<16x64xf32>
    %554 = arith.addf %301, %553 : vector<16x64xf32>
    %555 = vector.extract_strided_slice %17 {offsets = [1, 0], sizes = [1, 64], strides = [1, 1]} : vector<2x64xf32> to vector<1x64xf32>
    %556 = arith.mulf %554, %554 : vector<16x64xf32>
    %cst_157 = arith.constant dense<0.000000e+00> : vector<16xf32>
    %557 = vector.multi_reduction <add>, %556, %cst_157 [1] : vector<16x64xf32> to vector<16xf32>
    %558 = vector.shape_cast %557 : vector<16xf32> to vector<16x1xf32>
    %cst_158 = arith.constant 6.400000e+01 : f32
    %559 = vector.broadcast %cst_158 : f32 to vector<16x1xf32>
    %560 = arith.divf %558, %559 : vector<16x1xf32>
    %cst_159 = arith.constant 9.99999997E-7 : f32
    %561 = vector.broadcast %cst_159 : f32 to vector<16x1xf32>
    %562 = arith.addf %560, %561 : vector<16x1xf32>
    %563 = math.rsqrt %562 : vector<16x1xf32>
    %564 = vector.broadcast %563 : vector<16x1xf32> to vector<16x64xf32>
    %565 = arith.mulf %554, %564 : vector<16x64xf32>
    %566 = vector.broadcast %555 : vector<1x64xf32> to vector<16x64xf32>
    %567 = arith.mulf %565, %566 : vector<16x64xf32>
    %568 = arith.truncf %567 : vector<16x64xf32> to vector<16x64xbf16>
    %c1_160 = arith.constant 1 : index
    %c0_161 = arith.constant 0 : index
    %c0_162 = arith.constant 0 : index
    %569 = vector.load %arg9[%c1_160, %c0_161, %c0_162] : memref<2x64x256xbf16, #tpu.memory_space<vmem>>, vector<1x64x256xbf16>
    %570 = vector.shape_cast %569 : vector<1x64x256xbf16> to vector<64x256xbf16>
    %cst_163 = arith.constant dense<0.000000e+00> : vector<16x256xf32>
    %571 = tpu.matmul %568, %570, %cst_163 {dimension_numbers = #tpu.dot_dimension_numbers<[1], [0], [0], [1], [0, 0, 1, 1], [], []>} : vector<16x64xbf16>, vector<64x256xbf16>, vector<16x256xf32> -> vector<16x256xf32>
    %572 = vector.extract_strided_slice %571 {offsets = [0, 0], sizes = [16, 128], strides = [1, 1]} : vector<16x256xf32> to vector<16x128xf32>
    %573 = vector.extract_strided_slice %571 {offsets = [0, 128], sizes = [16, 128], strides = [1, 1]} : vector<16x256xf32> to vector<16x128xf32>
    %574 = arith.negf %572 : vector<16x128xf32>
    %575 = math.exp %574 : vector<16x128xf32>
    %cst_164 = arith.constant 1.000000e+00 : f32
    %576 = vector.broadcast %cst_164 : f32 to vector<16x128xf32>
    %577 = arith.addf %576, %575 : vector<16x128xf32>
    %578 = arith.divf %576, %577 : vector<16x128xf32>
    %579 = arith.mulf %572, %578 : vector<16x128xf32>
    %580 = arith.mulf %579, %573 : vector<16x128xf32>
    %581 = arith.truncf %580 : vector<16x128xf32> to vector<16x128xbf16>
    %c1_165 = arith.constant 1 : index
    %c0_166 = arith.constant 0 : index
    %c0_167 = arith.constant 0 : index
    %582 = vector.load %arg10[%c1_165, %c0_166, %c0_167] : memref<2x128x64xbf16, #tpu.memory_space<vmem>>, vector<1x128x64xbf16>
    %583 = vector.shape_cast %582 : vector<1x128x64xbf16> to vector<128x64xbf16>
    %cst_168 = arith.constant dense<0.000000e+00> : vector<16x64xf32>
    %584 = tpu.matmul %581, %583, %cst_168 {dimension_numbers = #tpu.dot_dimension_numbers<[1], [0], [0], [1], [0, 0, 1, 1], [], []>} : vector<16x128xbf16>, vector<128x64xbf16>, vector<16x64xf32> -> vector<16x64xf32>
    %585 = arith.addf %554, %584 : vector<16x64xf32>
    %586 = vector.extract_strided_slice %585 {offsets = [7, 0], sizes = [1, 64], strides = [1, 1]} : vector<16x64xf32> to vector<1x64xf32>
    %587 = vector.extract_strided_slice %585 {offsets = [15, 0], sizes = [1, 64], strides = [1, 1]} : vector<16x64xf32> to vector<1x64xf32>
    %588 = tpu.concatenate %586, %587 in 0 : vector<1x64xf32>, vector<1x64xf32> -> vector<2x64xf32>
    %c0_169 = arith.constant 0 : index
    %c0_170 = arith.constant 0 : index
    %589 = vector.load %arg11[%c0_169, %c0_170] : memref<1x64xf32, #tpu.memory_space<vmem>>, vector<1x64xf32>
    %590 = arith.mulf %588, %588 : vector<2x64xf32>
    %cst_171 = arith.constant dense<0.000000e+00> : vector<2xf32>
    %591 = vector.multi_reduction <add>, %590, %cst_171 [1] : vector<2x64xf32> to vector<2xf32>
    %592 = vector.shape_cast %591 : vector<2xf32> to vector<2x1xf32>
    %cst_172 = arith.constant 6.400000e+01 : f32
    %593 = vector.broadcast %cst_172 : f32 to vector<2x1xf32>
    %594 = arith.divf %592, %593 : vector<2x1xf32>
    %cst_173 = arith.constant 9.99999997E-7 : f32
    %595 = vector.broadcast %cst_173 : f32 to vector<2x1xf32>
    %596 = arith.addf %594, %595 : vector<2x1xf32>
    %597 = math.rsqrt %596 : vector<2x1xf32>
    %598 = vector.broadcast %597 : vector<2x1xf32> to vector<2x64xf32>
    %599 = arith.mulf %588, %598 : vector<2x64xf32>
    %600 = vector.broadcast %589 : vector<1x64xf32> to vector<2x64xf32>
    %601 = arith.mulf %599, %600 : vector<2x64xf32>
    %602 = arith.truncf %601 : vector<2x64xf32> to vector<2x64xbf16>
    %c0_174 = arith.constant 0 : index
    %c0_175 = arith.constant 0 : index
    %603 = vector.load %arg12[%c0_174, %c0_175] : memref<64x32xbf16, #tpu.memory_space<vmem>>, vector<64x32xbf16>
    %cst_176 = arith.constant dense<0.000000e+00> : vector<2x32xf32>
    %604 = tpu.matmul %602, %603, %cst_176 {dimension_numbers = #tpu.dot_dimension_numbers<[1], [0], [0], [1], [0, 0, 1, 1], [], []>} : vector<2x64xbf16>, vector<64x32xbf16>, vector<2x32xf32> -> vector<2x32xf32>
    %c0_177 = arith.constant 0 : index
    %c0_178 = arith.constant 0 : index
    %605 = vector.load %arg13[%c0_177, %c0_178] : memref<1x32xf32, #tpu.memory_space<vmem>>, vector<1x32xf32>
    %606 = vector.broadcast %605 : vector<1x32xf32> to vector<2x32xf32>
    %607 = arith.addf %604, %606 : vector<2x32xf32>
    %c0_179 = arith.constant 0 : index
    %c0_180 = arith.constant 0 : index
    %608 = vector.load %arg14[%c0_179, %c0_180] : memref<2x32xf32, #tpu.memory_space<vmem>>, vector<2x32xf32>
    tpu.vector_store %arg14[%c0_179, %c0_180], %607 {strides = array<i32>} : memref<2x32xf32, #tpu.memory_space<vmem>>, vector<2x32xf32>,
    return
  }
}

</mosaic_0001>

<bundles_post_ra>
// kernel: tile.11
= control target key start
LH: loop header
LB: loop body
LE: loop exit
PB: predicated region body
PF: predicated region fallthrough
CT: control target
= control target key end

     0   :  { %vm42_vm0 = vcmask 1047556   ;;  %vm44_vm1 = vcmask 130048   ;;  %s93_s22 = smov 16   ;;  %s94_s25 = smov 32   ;;  %vm54_vm2 = vcmask 523648   ;;  %vm64_vm3 = vcmask 392448   ;;  %s146_s0 = inlined_call_operand.vmem [shape: f32[8,4,16], index: 0, kind: input, shape index: {}]   ;;  %s147_s1 = inlined_call_operand.vmem [shape: f32[8,64], index: 1, kind: output, shape index: {}]  }
   0x1   :  { %v82_v0 = vld [vmem:[%s146_s0 + $0x1c] sm:$0xf]  ;;  %v83_v1 = vld [vmem:[%s146_s0 + $0x18] sm:$0xf]  ;;  %v84_v2 = vld [vmem:[%s146_s0 + $0x14] sm:$0xf] }
   0x2   :  { %8 = vst [vmem:[#allocation0 + $0x38] sm:$0xf] %v82_v0  ;;  %13 = vst [vmem:[#allocation0 + $0x30] sm:$0xf] %v83_v1  ;;  %v85_v3 = vld [vmem:[%s146_s0 + $0x10] sm:$0xf] }
   0x3   :  { %18 = vst [vmem:[#allocation0 + $0x28] sm:$0xf] %v84_v2  ;;  %v86_v4 = vld [vmem:[%s146_s0 + $0xc] sm:$0xf]  ;;  %v87_v5 = vld [vmem:[%s146_s0 + $0x8] sm:$0xf] }
   0x4   :  { %23 = vst [vmem:[#allocation0 + $0x20] sm:$0xf] %v85_v3  ;;  %28 = vst [vmem:[#allocation0 + $0x18] sm:$0xf] %v86_v4  ;;  %v88_v6 = vld [vmem:[%s146_s0 + $0x4] sm:$0xf] }
   0x5   :  { %33 = vst [vmem:[#allocation0 + $0x10] sm:$0xf] %v87_v5  ;;  %v38_v7 = vld [vmem:[%s146_s0] sm:$0xf]  ;;  %37 = vst [vmem:[#allocation0 + $0x8] sm:$0xf] %v88_v6 }
   0x6   :  { %39 = vst [vmem:[#allocation0] sm:$0xf] %v38_v7  ;;  %s92_s0 = smov 48   ;;  %vm74_vm4 = vcmask 261248  }
   0xb   :  { %v49_v8 = vld [vmem:[#allocation0 + $0x3] ss:$8 sm:$0xf0]   ;;  %v59_v9 = vld [vmem:[#allocation0 + $0x2] ss:$8 sm:$0xf0]  }
   0xc   :  { %v69_v14 = vld [vmem:[#allocation0 + $0x1] ss:$8 sm:$0xf0]   ;;  %v41_v17 = vld [vmem:[#allocation0] ss:$8 sm:$0xf0]  }
   0xd   :  { %v47_v10 = vld [vmem:[#allocation0 + $0x3] ss:$8 sm:$0xf]   ;;  %v57_v11 = vld [vmem:[#allocation0 + $0x2] ss:$8 sm:$0xf]  }
   0xe   :  { %v51_v12 = vsel %vm42_vm0, %v49_v8, %v47_v10  ;;  %v67_v13 = vld [vmem:[#allocation0 + $0x1] ss:$8 sm:$0xf]   ;;  %v40_v16 = vld [vmem:[#allocation0] ss:$8 sm:$0xf]   ;;  %v61_v18 = vsel %vm42_vm0, %v59_v9, %v57_v11 }
   0xf   :  { %52 = vrot.lane.b32.xlu0 %v51_v12, %s92_s0  ;;  %v71_v15 = vsel %vm42_vm0, %v69_v14, %v67_v13  ;;  %v43_v19 = vsel %vm42_vm0, %v41_v17, %v40_v16 }
  0x10   :  { %72 = vrot.lane.b32.xlu1 %v71_v15, %s93_s22  ;;  %45 = vst.msk [vmem:[%s147_s1] sm:$0xff] %vm44_vm1, %v43_v19  }
  0x13   :  { %62 = vrot.lane.b32.xlu0 %v61_v18, %s94_s25 }
  0x81   :  { %v53_v20 = vpop.permute.xlu0 %52  }
  0x82   :  { %55 = vst.msk [vmem:[%s147_s1] sm:$0xff] %vm54_vm2, %v53_v20   ;;  %v73_v21 = vpop.permute.xlu1 %72  }
  0x85   :  { %v63_v22 = vpop.permute.xlu0 %62  }
  0x86   :  { %65 = vst.msk [vmem:[%s147_s1] sm:$0xff] %vm64_vm3, %v63_v22  }
  0x87   :  { %75 = vst.msk [vmem:[%s147_s1] sm:$0xff] %vm74_vm4, %v73_v21  }

// kernel: _lambda_.1
= control target key start
LH: loop header
LB: loop body
LE: loop exit
PB: predicated region body
PF: predicated region fallthrough
CT: control target
= control target key end

     0   :  { %vm64_vm0 = vcmask 523264   ;;  %v53_v9 = vlaneseq  ;;  %v5812_v10 = vmov 0.0   ;;  %v5813_v17 = vmov 0   ;;  %s5815_s27 = smov 112   ;;  %s5816_s28 = smov 64   ;;  %s7003_s0 = inlined_call_operand.vmem [shape: f32[16,64], index: 0, kind: input, shape index: {}]   ;;  %s7004_s1 = inlined_call_operand.vmem [shape: f32[8,80], index: 1, kind: input, shape index: {}]   ;;  %s7005_s2 = inlined_call_operand.vmem [shape: f32[8,80], index: 2, kind: input, shape index: {}]   ;;  %s7006_s3 = inlined_call_operand.vmem [shape: f32[2,64], index: 3, kind: input, shape index: {}, may-alias: {3,5}]   ;;  %s7007_s4 = inlined_call_operand.vmem [shape: f32[2,32], index: 4, kind: input, shape index: {}]   ;;  %s7008_s5 = inlined_call_operand.vmem [shape: f32[2,64], index: 5, kind: input, shape index: {}, may-alias: {3,5}]   ;;  %s7009_s6 = inlined_call_operand.vmem [shape: bf16[2,64,320], index: 6, kind: input, shape index: {}]   ;;  %s7010_s7 = inlined_call_operand.vmem [shape: bf16[2,32,256], index: 7, kind: input, shape index: {}]   ;;  %s7011_s8 = inlined_call_operand.vmem [shape: bf16[2,128,64], index: 8, kind: input, shape index: {}]   ;;  %s7012_s9 = inlined_call_operand.vmem [shape: bf16[2,64,256], index: 9, kind: input, shape index: {}]   ;;  %s7013_s10 = inlined_call_operand.vmem [shape: bf16[2,128,64], index: 10, kind: input, shape index: {}]   ;;  %s7014_s11 = inlined_call_operand.vmem [shape: f32[1,64], index: 11, kind: input, shape index: {}]   ;;  %s7015_s12 = inlined_call_operand.vmem [shape: bf16[64,32], index: 12, kind: input, shape index: {}]   ;;  %s7016_s13 = inlined_call_operand.vmem [shape: f32[1,32], index: 13, kind: input, shape index: {}]   ;;  %s7017_s14 = inlined_call_operand.hbm [shape: f32[2,32], index: 14, kind: output, shape index: {}]  }
   0x1   :  { %v5899_v0 = vld [vmem:[%s7003_s0] sm:$0xff]  ;;  %v5904_v1 = vld [vmem:[%s7003_s0 + $0x8] sm:$0xff]  ;;  %5071 = vmatprep.subr.bf16.mxu1 %v5812_v10  ;;  %v5582_v15 = vld [vmem:[%s7009_s6 + $0x30] ss:$12 sps:$4 sm:$0xff]   ;;  %202 = vmatprep.mubr.bf16.mxu0 %v5813_v17  ;;  %vm5814_vm1 = vmmov 0  }
   0x2   :  { %v62_v2 = vmul.f32 %v5899_v0, %v5899_v0  ;;  %v63_v3 = vmul.f32 %v5904_v1, %v5904_v1  ;;  %v5572_v6 = vld [vmem:[%s7009_s6 + $0x4] ss:$12 sps:$4 sm:$0xff]   ;;  %v5574_v7 = vld [vmem:[%s7009_s6] ss:$12 sps:$4 sm:$0xff]   ;;  %v5575_v8 = vld [vmem:[%s7009_s6 + $0x8] ss:$12 sps:$4 sm:$0xff]   ;;  %5079 = vmatprep.mubr.msk.bf16.mxu1 %vm5814_vm1, %v5812_v10 }
   0x3   :  { %170 = vmatprep.subr.bf16.mxu0 %v5572_v6  ;;  %v5576_v11 = vld [vmem:[%s7009_s6 + $0x1c] ss:$12 sps:$4 sm:$0xff]   ;;  %5072 = vmatpush3.bf16.msra.mxu1 %v5575_v8  ;;  %v5578_v12 = vld [vmem:[%s7009_s6 + $0x18] ss:$12 sps:$4 sm:$0xff]   ;;  %v5579_v13 = vld [vmem:[%s7009_s6 + $0x20] ss:$12 sps:$4 sm:$0xff]  }
   0x4   :  { %v65_v4 = vsel %vm64_vm0, %v62_v2, 0.0  ;;  %v68_v5 = vsel %vm64_vm0, %v63_v3, 0.0  ;;  %171 = vmatpush1.bf16.msra.mxu0 %v5574_v7  ;;  %5073 = vmatprep.subr.bf16.mxu1 %v5812_v10  ;;  %v5580_v14 = vld [vmem:[%s7009_s6 + $0x34] ss:$12 sps:$4 sm:$0xff]   ;;  %v5583_v16 = vld [vmem:[%s7009_s6 + $0x38] ss:$12 sps:$4 sm:$0xff]  }
   0x5   :  { %66 = vadd.xlane.f32.xlu0 %v65_v4  ;;  %172 = vmatprep.subr.bf16.mxu0 %v5576_v11  ;;  %v5942_v18 = vshrl.u32 %v53_v9, 7  ;;  %v5944_v19 = vand.u32 127, %v53_v9  ;;  %v5584_v20 = vld [vmem:[%s7009_s6 + $0x4c] ss:$12 sps:$4 sm:$0xff]   ;;  %v5586_v21 = vld [vmem:[%s7009_s6 + $0x48] ss:$12 sps:$4 sm:$0xff]  }
   0x6   :  { %v5587_v22 = vld [vmem:[%s7009_s6 + $0x50] ss:$12 sps:$4 sm:$0xff]   ;;  %v52_v23 = vld [vmem:[%s7005_s2] sm:$0xff] }
   0x7   :  { %5074 = vmatpush3.bf16.msra.mxu1 %v5579_v13  ;;  %vm57_vm2 = vcmp.gt.s32.totalorder %v5944_v19, %v5942_v18 }
   0x8   :  { %173 = vmatpush1.bf16.msra.mxu0 %v5578_v12  ;;  %5075 = vmatprep.subr.bf16.mxu1 %v5812_v10 }
   0x9   :  { %69 = vadd.xlane.f32.xlu0 %v68_v5  ;;  %174 = vmatprep.subr.bf16.mxu0 %v5580_v14 }
   0xb   :  { %5076 = vmatpush3.bf16.msra.mxu1 %v5583_v16 }
   0xc   :  { %175 = vmatpush1.bf16.msra.mxu0 %v5582_v15  ;;  %5077 = vmatprep.subr.bf16.mxu1 %v5812_v10 }
   0xd   :  { %176 = vmatprep.subr.bf16.mxu0 %v5584_v20 }
   0xf   :  { %5078 = vmatpush3.bf16.msra.mxu1 %v5587_v22 }
  0x10   :  { %177 = vmatpush1.bf16.msra.mxu0 %v5586_v21  ;;  %5083 = vmatprep.subr.bf16.mxu1 %v5812_v10 }
  0x1f   :  { %278 = vrot.lane.b32.xlu0 %v52_v23, %s5815_s27 }
  0x23   :  { %257 = vrot.lane.b32.xlu0 %v52_v23, %s5816_s28 }
  0x24   :  { %19 = vsyncpa [#allocation3], 0  ;;  %v5968_v30 = vsub.s32 0, %v5942_v18  ;;  %v59_v32 = vld [vmem:[%s7006_s3] sm:$0x3]  ;;  %vm295_vm3 = vcmask 261120  }
  0x25   :  { %v51_v56 = vld [vmem:[%s7004_s1] sm:$0xff]  ;;  %s5817_s16 = smov 96   ;;  %v5593_v61 = vld [vmem:[%s7010_s7 + $0x14] ss:$8 sps:$4 sm:$0xff]   ;;  %v5591_v62 = vld [vmem:[%s7010_s7 + $0x10] ss:$8 sps:$4 sm:$0xff]  }
  0x26   :  { %v83_v34 = vrot.slane %v59_v32, %v5968_v30  ;;  %v5590_v59 = vld [vmem:[%s7010_s7 + $0x4] ss:$8 sps:$4 sm:$0xff]   ;;  %v5588_v60 = vld [vmem:[%s7010_s7] ss:$8 sps:$4 sm:$0xff]   ;;  %vm412_vm4 = vcmask 130048   ;;  %vm522_vm5 = vcmask 1043456  }
  0x27   :  { %345 = vmatprep.subr.bf16.mxu0 %v5590_v59  ;;  %v60_v11 = vld [vmem:[%s7007_s4] sm:$0x3]  ;;  %vm506_vm6 = vcmask 64512   ;;  %s5818_s21 = smov 32   ;;  %s5819_s22 = smov 80   ;;  %vm4553_vm7 = vcmask 1040384  }
  0x28   :  { %v314_v16 = vrot.slane %v60_v11, %v5968_v30  ;;  %vm4557_vm8 = vcmask 517120   ;;  %vm4655_vm9 = vcmask 254976  }
  0x92   :  { %v67_v24 = vpop.xlane.xlu0 %66 }
  0x93   :  { %v72_v25 = vmul.f32 0.015625, %v67_v24 }
  0x95   :  { %v74_v26 = vadd.f32 1e-06, %v72_v25 }
  0x96   :  { %v70_v27 = vpop.xlane.xlu0 %69 }
  0x97   :  { %5676 = vrsqrt.f32 %v74_v26  ;;  %v73_v28 = vmul.f32 0.015625, %v70_v27 }
  0x99   :  { %v75_v29 = vadd.f32 1e-06, %v73_v28 }
  0x9a   :  { %v5981_v40 = vpop.permute.xlu0 %278 }
  0x9b   :  { %5678 = vrsqrt.f32 %v75_v29 }
  0x9e   :  { %v5983_v41 = vpop.permute.xlu0 %257 }
  0xa1   :  { %v5677_v31 = vpop.eup %5676 }
  0xa2   :  { %v78_v33 = vmul.f32 %v5677_v31, %v5899_v0 }
  0xa4   :  { %v84_v37 = vmul.f32 %v83_v34, %v78_v33 }
  0xa5   :  { %v5679_v35 = vpop.eup %5678 }
  0xa6   :  { %v79_v36 = vmul.f32 %v5679_v35, %v5904_v1 }
  0xa8   :  { %v85_v38 = vmul.f32 %v83_v34, %v79_v36 }
  0xaa   :  { %v86_v39 = vpack.c.bf16 %v85_v38, %v84_v37 }
  0xac   :  { %4683 = vmatmul.mubr.msk.bf16.vlgmr.msra.gmra.mrb[0].mxu0 %vm64_vm0, %v86_v39  ;;  %5080 = vmatmul.mubr.msk.bf16.vlgmr.msra.gmra.mrb[0].mxu1 %vm64_vm0, %v86_v39 }
  0xad   :  { %377 = vmatprep.mubr.bf16.mxu0 %v5813_v17  ;;  %5085 = vmatprep.mubr.msk.bf16.mxu1 %vm5814_vm1, %v5812_v10 }
  0xae   :  { %346 = vmatpush1.bf16.msra.mxu0 %v5588_v60 }
  0xaf   :  { %347 = vmatprep.subr.bf16.mxu0 %v5593_v61 }
  0xb2   :  { %348 = vmatpush1.bf16.msra.mxu0 %v5591_v62 }
  0xb3   :  { %5089 = vmatprep.subr.bf16.mxu0 %v5812_v10 }
 0x17f   :  { %v204_v42 = vpop.f32.mrb[0].mxu0  ;;  %v247_v43 = vpop.f32.mrb[0].mxu1 }
 0x180   :  { %v5985_v44 = vpop.f32.mrb[1].mxu0  ;;  %v5081_v45 = vpop.f32.mrb[1].mxu1  ;;  %v293_v46 = vmul.f32 %v247_v43, %v247_v43  ;;  %v281_v57 = vmul.f32 %v5981_v40, %v247_v43 }
 0x181   :  { %v208_v47 = vpop.f32.mrb[2].mxu0  ;;  %v250_v48 = vpop.f32.mrb[2].mxu1  ;;  %v260_v49 = vmul.f32 %v5983_v41, %v5985_v44  ;;  %v254_v31 = vmul.f32 %v5985_v44, %v51_v56 }
 0x182   :  { %v5989_v50 = vpack.c.bf16 %v208_v47, %v204_v42  ;;  %v210_v51 = vpop.f32.mrb[3].mxu0  ;;  %v5082_v52 = vpop.f32.mrb[3].mxu1  ;;  %v296_v53 = vsel %vm295_vm3, %v293_v46, 0.0  ;;  %v294_v54 = vmul.f32 %v250_v48, %v250_v48  ;;  %v282_v58 = vmul.f32 %v5981_v40, %v250_v48 }
 0x183   :  { %297 = vadd.xlane.f32.xlu1 %v296_v53  ;;  %264 = vrot.lane.b32.xlu0 %v260_v49, %s5816_s28  ;;  %v261_v25 = vmul.f32 %v5983_v41, %v210_v51  ;;  %v255_v32 = vmul.f32 %v210_v51, %v51_v56  ;;  %v6064_v52 = vsel %vm57_vm2, -1e+30, %v5812_v10 }
 0x184   :  { %v299_v55 = vsel %vm295_vm3, %v294_v54, 0.0 }
 0x187   :  { %300 = vadd.xlane.f32.xlu1 %v299_v55 }
 0x198   :  { %273 = vrot.lane.b32.xlu1 %v51_v56, %s5817_s16 }
 0x19c   :  { %285 = vrot.lane.b32.xlu1 %v281_v57, %s5815_s27 }
 0x1a0   :  { %287 = vrot.lane.b32.xlu1 %v282_v58, %s5815_s27 }
 0x1f5   :  { %v265_v29 = vpop.permute.xlu0 %264 }
 0x1f6   :  { %v270_v34 = vadd.f32 %v265_v29, %v254_v31 }
 0x210   :  { %v298_v63 = vpop.xlane.xlu1 %297 }
 0x211   :  { %v303_v0 = vmul.f32 0.03125, %v298_v63 }
 0x213   :  { %v305_v1 = vadd.f32 1e-06, %v303_v0 }
 0x214   :  { %v301_v2 = vpop.xlane.xlu1 %300 }
 0x215   :  { %5680 = vrsqrt.f32 %v305_v1  ;;  %v304_v3 = vmul.f32 0.03125, %v301_v2 }
 0x217   :  { %v306_v4 = vadd.f32 1e-06, %v304_v3 }
 0x218   :  { %v6015_v5 = vpop.permute.xlu1 %273 }
 0x219   :  { %5682 = vrsqrt.f32 %v306_v4  ;;  %v276_v8 = vmul.f32 %v6015_v5, %v247_v43  ;;  %v277_v9 = vmul.f32 %v6015_v5, %v250_v48 }
 0x21c   :  { %v286_v6 = vpop.permute.xlu1 %285 }
 0x21d   :  { %v291_v13 = vadd.f32 %v286_v6, %v276_v8 }
 0x21f   :  { %v5681_v7 = vpop.eup %5680 }
 0x220   :  { %v288_v12 = vpop.permute.xlu1 %287  ;;  %v309_v15 = vmul.f32 %v5681_v7, %v247_v43 }
 0x221   :  { %v292_v14 = vadd.f32 %v288_v12, %v277_v9 }
 0x222   :  { %v315_v23 = vmul.f32 %v314_v16, %v309_v15 }
 0x223   :  { %v5683_v20 = vpop.eup %5682  ;;  %v6023_v21 = vpack.c.bf16 %v292_v14, %v291_v13 }
 0x224   :  { %v310_v22 = vmul.f32 %v5683_v20, %v250_v48 }
 0x225   :  { %410 = vrot.lane.b32.xlu1 %v6023_v21, %s5817_s16 }
 0x226   :  { %v316_v24 = vmul.f32 %v314_v16, %v310_v22 }
 0x228   :  { %v317_v26 = vpack.c.bf16 %v316_v24, %v315_v23 }
 0x229   :  { %266 = vrot.lane.b32.xlu1 %v261_v25, %s5816_s28 }
 0x22a   :  { %4689 = vmatmul.mubr.msk.bf16.vlgmr.msra.gmra.mrb[4].mxu0 %vm295_vm3, %v317_v26 }
 0x22b   :  { %5091 = vmatprep.mubr.msk.bf16.mxu0 %vm5814_vm1, %v5812_v10 }
 0x297   :  { %v411_v27 = vpop.permute.xlu1 %410 }
 0x298   :  { %v6033_v28 = vsel %vm412_vm4, %v411_v27, 0 }
 0x299   :  { %5084 = vmatpush3.bf16.xpose.msra.mxu1 %v6033_v28 }
 0x29a   :  { %5095 = vmatprep.subr.bf16.mxu1 %v5812_v10 }
 0x29b   :  { %v267_v33 = vpop.permute.xlu1 %266 }
 0x29c   :  { %v271_v35 = vadd.f32 %v267_v33, %v255_v32 }
 0x29e   :  { %v6038_v36 = vpack.c.bf16 %v271_v35, %v270_v34 }
 0x2a0   :  { %5086 = vmatmul.mubr.msk.bf16.vlgmr.msra.gmra.mrb[4].mxu1 %vm412_vm4, %v6038_v36 }
 0x2a1   :  { %5097 = vmatprep.mubr.msk.bf16.mxu1 %vm5814_vm1, %v5812_v10 }
 0x2fd   :  { %v379_v37 = vpop.f32.mrb[4].mxu0 }
 0x2fe   :  { %v381_v38 = vpop.f32.mrb[5].mxu0 }
 0x2ff   :  { %v383_v39 = vpop.f32.mrb[6].mxu0 }
 0x300   :  { %v6044_v42 = vpack.c.bf16 %v383_v39, %v379_v37  ;;  %v385_v43 = vpop.f32.mrb[7].mxu0  ;;  %v6100_v37 = vld [vmem:[%s7011_s8 + $0x10] sm:$0xff]  }
 0x301   :  { %v6046_v44 = vpack.c.bf16 %v385_v43, %v381_v38  ;;  %v6106_v38 = vld [vmem:[%s7011_s8 + $0x18] sm:$0xff]  }
 0x302   :  { %v463_v45 = vsel %vm295_vm3, %v6044_v42, 0 }
 0x303   :  { %5090 = vmatpush3.bf16.xpose.msra.mxu0 %v463_v45  ;;  %v524_v46 = vsel %vm522_vm5, %v6046_v44, 0 }
 0x304   :  { %5096 = vmatpush3.bf16.msra.mxu1 %v524_v46  ;;  %5101 = vmatprep.subr.bf16.mxu0 %v5812_v10 }
 0x305   :  { %5107 = vmatprep.subr.bf16.mxu1 %v5812_v10 }
 0x30a   :  { %5092 = vmatmul.mubr.msk.bf16.vlgmr.msra.gmra.mrb[8].mxu0 %vm295_vm3, %v5989_v50 }
 0x30b   :  { %5102 = vmatpush3.bf16.xpose.msra.mxu0 %v6033_v28  ;;  %5103 = vmatprep.mubr.msk.bf16.mxu0 %vm5814_vm1, %v5812_v10 }
 0x30c   :  { %5113 = vmatprep.subr.bf16.mxu0 %v5812_v10 }
 0x373   :  { %v453_v47 = vpop.f32.mrb[4].mxu1 }
 0x374   :  { %v5087_v48 = vpop.f32.mrb[5].mxu1 }
 0x375   :  { %v456_v49 = vpop.f32.mrb[6].mxu1  ;;  %v6116_v48 = vld [vmem:[%s7011_s8] sm:$0xff]  }
 0x376   :  { %v5088_v51 = vpop.f32.mrb[7].mxu1 }
 0x377   :  { %v6123_v51 = vld [vmem:[%s7011_s8 + $0x8] sm:$0xff]  }
 0x3dd   :  { %v499_v53 = vpop.f32.mrb[8].mxu0 }
 0x3de   :  { %v500_v54 = vadd.f32 %v499_v53, %v453_v47  ;;  %v5093_v55 = vpop.f32.mrb[9].mxu0 }
 0x3df   :  { %v502_v56 = vpop.f32.mrb[10].mxu0 }
 0x3e0   :  { %v5094_v57 = vpop.f32.mrb[11].mxu0  ;;  %v505_v58 = vadd.f32 %v500_v54, %v6064_v52 }
 0x3e2   :  { %v507_v59 = vsel %vm506_vm6, %v505_v58, -inf }
 0x3e3   :  { %508 = vmax.xlane.f32.xlu0 %v507_v59 }
 0x3f9   :  { %617 = vrot.lane.b32.xlu0 %v6044_v42, %s5817_s16 }
 0x3fd   :  { %614 = vrot.lane.b32.xlu0 %v5989_v50, %s5817_s16 }
 0x470   :  { %v509_v19 = vpop.xlane.xlu0 %508 }
 0x471   :  { %v510_v60 = vsub.f32 %v505_v58, %v509_v19 }
 0x473   :  { %v511_v61 = vmul.f32 1.442695, %v510_v60 }
 0x474   :  { %v618_v4 = vpop.permute.xlu0 %617 }
 0x475   :  { %5684 = vpow2.f32 %v511_v61  ;;  %v623_v7 = vsel %vm295_vm3, %v618_v4, 0 }
 0x478   :  { %v615_v8 = vpop.permute.xlu0 %614 }
 0x47f   :  { %v5685_v62 = vpop.eup %5684 }
 0x480   :  { %v513_v63 = vsel %vm506_vm6, %v5685_v62, 0.0 }
 0x481   :  { %514 = vadd.xlane.f32.xlu1 %v513_v63 }
 0x492   :  { %568 = vrot.lane.b32.xlu1 %v6038_v36, %s5815_s27 }
 0x50e   :  { %v515_v0 = vpop.xlane.xlu1 %514 }
 0x50f   :  { %5686 = vrcp.f32 %v515_v0 }
 0x512   :  { %v569_v1 = vpop.permute.xlu1 %568 }
 0x513   :  { %5104 = vmatmul.mubr.msk.bf16.vlgmr.msra.gmra.mrb[12].mxu0 %vm412_vm4, %v569_v1 }
 0x514   :  { %5115 = vmatprep.mubr.msk.bf16.mxu0 %vm5814_vm1, %v5812_v10 }
 0x519   :  { %v5687_v2 = vpop.eup %5686 }
 0x51a   :  { %v517_v3 = vmul.f32 %v5687_v2, %v5685_v62 }
 0x51c   :  { %v518_v6 = vpack.c.bf16 %v517_v3, %v517_v3 }
 0x51e   :  { %5098 = vmatmul.mubr.msk.bf16.vlgmr.msra.gmra.mrb[8].mxu1 %vm506_vm6, %v518_v6 }
 0x51f   :  { %5108 = vmatpush3.bf16.xpose.msra.mxu1 %v623_v7  ;;  %5109 = vmatprep.mubr.msk.bf16.mxu1 %vm5814_vm1, %v5812_v10 }
 0x520   :  { %5119 = vmatprep.subr.bf16.mxu1 %v5812_v10 }
 0x526   :  { %5110 = vmatmul.mubr.msk.bf16.vlgmr.msra.gmra.mrb[12].mxu1 %vm295_vm3, %v615_v8 }
 0x527   :  { %5123 = vmatprep.mubr.msk.bf16.mxu1 %vm5814_vm1, %v5812_v10  ;;  %5120 = vmatpush3.bf16.msra.mxu1 %v6100_v37 }
 0x528   :  { %5121 = vmatprep.subr.bf16.mxu1 %v5812_v10 }
 0x52b   :  { %5122 = vmatpush3.bf16.msra.mxu1 %v6106_v38 }
 0x52c   :  { %5135 = vmatprep.subr.bf16.mxu1 %v5812_v10 }
 0x5e6   :  { %v607_v9 = vpop.f32.mrb[12].mxu0 }
 0x5e7   :  { %v5105_v11 = vpop.f32.mrb[13].mxu0 }
 0x5e8   :  { %v610_v12 = vpop.f32.mrb[14].mxu0 }
 0x5e9   :  { %v5106_v13 = vpop.f32.mrb[15].mxu0 }
 0x5f1   :  { %v560_v14 = vpop.f32.mrb[8].mxu1 }
 0x5f2   :  { %v5099_v15 = vpop.f32.mrb[9].mxu1  ;;  %v566_v53 = vpack.c.bf16 %v560_v14, %v560_v14 }
 0x5f3   :  { %v563_v16 = vpop.f32.mrb[10].mxu1 }
 0x5f4   :  { %v5100_v20 = vpop.f32.mrb[11].mxu1 }
 0x5f9   :  { %v659_v22 = vpop.f32.mrb[12].mxu1 }
 0x5fa   :  { %v660_v23 = vadd.f32 %v659_v22, %v607_v9  ;;  %v5111_v24 = vpop.f32.mrb[13].mxu1 }
 0x5fb   :  { %v662_v25 = vpop.f32.mrb[14].mxu1 }
 0x5fc   :  { %v5112_v26 = vpop.f32.mrb[15].mxu1  ;;  %v665_v27 = vadd.f32 %v660_v23, %v6064_v52 }
 0x5fe   :  { %v666_v29 = vsel %vm506_vm6, %v665_v27, -inf }
 0x5ff   :  { %667 = vmax.xlane.f32.xlu1 %v666_v29 }
 0x610   :  { %885 = vrot.lane.b32.xlu1 %v6044_v42, %s5816_s28 }
 0x614   :  { %838 = vrot.lane.b32.xlu1 %v6038_v36, %s5817_s16 }
 0x68c   :  { %v668_v31 = vpop.xlane.xlu1 %667 }
 0x68d   :  { %v669_v32 = vsub.f32 %v665_v27, %v668_v31  ;;  %v6162_v31 = vld [vmem:[%s7011_s8 + $0x20] sm:$0xff]  }
 0x68f   :  { %v670_v33 = vmul.f32 1.442695, %v669_v32  ;;  %v6168_v32 = vld [vmem:[%s7011_s8 + $0x28] sm:$0xff]  }
 0x690   :  { %v886_v54 = vpop.permute.xlu1 %885 }
 0x691   :  { %5688 = vpow2.f32 %v670_v33  ;;  %v891_v55 = vsel %vm295_vm3, %v886_v54, 0 }
 0x694   :  { %v839_v63 = vpop.permute.xlu1 %838 }
 0x69b   :  { %v5689_v34 = vpop.eup %5688 }
 0x69c   :  { %v672_v35 = vsel %vm506_vm6, %v5689_v34, 0.0 }
 0x69d   :  { %673 = vadd.xlane.f32.xlu0 %v672_v35 }
 0x6b3   :  { %679 = vrot.lane.b32.xlu0 %v6046_v44, %s5817_s16 }
 0x6b7   :  { %883 = vrot.lane.b32.xlu0 %v5989_v50, %s5816_s28 }
 0x72a   :  { %v674_v39 = vpop.xlane.xlu0 %673 }
 0x72b   :  { %5690 = vrcp.f32 %v674_v39 }
 0x72e   :  { %v680_v43 = vpop.permute.xlu0 %679 }
 0x72f   :  { %v685_v45 = vsel %vm522_vm5, %v680_v43, 0 }
 0x730   :  { %5114 = vmatpush3.bf16.msra.mxu0 %v685_v45 }
 0x731   :  { %5127 = vmatprep.subr.bf16.mxu0 %v5812_v10 }
 0x732   :  { %v884_v56 = vpop.permute.xlu0 %883 }
 0x735   :  { %v5691_v46 = vpop.eup %5690 }
 0x736   :  { %v676_v47 = vmul.f32 %v5691_v46, %v5689_v34 }
 0x738   :  { %v677_v49 = vpack.c.bf16 %v676_v47, %v676_v47 }
 0x73a   :  { %5116 = vmatmul.mubr.msk.bf16.vlgmr.msra.gmra.mrb[16].mxu0 %vm506_vm6, %v677_v49 }
 0x73b   :  { %5128 = vmatpush3.bf16.msra.mxu0 %v6116_v48  ;;  %5131 = vmatprep.mubr.msk.bf16.mxu0 %vm5814_vm1, %v5812_v10 }
 0x73c   :  { %5129 = vmatprep.subr.bf16.mxu0 %v5812_v10 }
 0x73f   :  { %5130 = vmatpush3.bf16.msra.mxu0 %v6123_v51 }
 0x740   :  { %5141 = vmatprep.subr.bf16.mxu0 %v5812_v10 }
 0x742   :  { %5132 = vmatmul.mubr.msk.bf16.vlgmr.msra.gmra.mrb[20].mxu0 %vm295_vm3, %v566_v53 }
 0x743   :  { %5143 = vmatprep.mubr.msk.bf16.mxu0 %vm5814_vm1, %v5812_v10 }
 0x748   :  { %5142 = vmatpush3.bf16.xpose.msra.mxu0 %v891_v55 }
 0x749   :  { %5153 = vmatprep.subr.bf16.mxu0 %v5812_v10 }
 0x74f   :  { %5144 = vmatmul.mubr.msk.bf16.vlgmr.msra.gmra.mrb[24].mxu0 %vm295_vm3, %v884_v56 }
 0x750   :  { %5157 = vmatprep.mubr.msk.bf16.mxu0 %vm5814_vm1, %v5812_v10  ;;  %5154 = vmatpush3.bf16.msra.mxu0 %v6162_v31 }
 0x751   :  { %5155 = vmatprep.subr.bf16.mxu0 %v5812_v10 }
 0x754   :  { %5156 = vmatpush3.bf16.msra.mxu0 %v6168_v32 }
 0x755   :  { %5167 = vmatprep.subr.bf16.mxu0 %v5812_v10 }
 0x80d   :  { %v721_v57 = vpop.f32.mrb[16].mxu0 }
 0x80e   :  { %v727_v58 = vpack.c.bf16 %v721_v57, %v721_v57  ;;  %v5117_v59 = vpop.f32.mrb[17].mxu0 }
 0x80f   :  { %v724_v19 = vpop.f32.mrb[18].mxu0 }
 0x810   :  { %v5118_v60 = vpop.f32.mrb[19].mxu0  ;;  %5124 = vmatmul.mubr.msk.bf16.vlgmr.msra.gmra.mrb[16].mxu1 %vm295_vm3, %v727_v58 }
 0x811   :  { %5136 = vmatpush3.bf16.xpose.msra.mxu1 %v6033_v28  ;;  %5137 = vmatprep.mubr.msk.bf16.mxu1 %vm5814_vm1, %v5812_v10 }
 0x812   :  { %5147 = vmatprep.subr.bf16.mxu1 %v5812_v10 }
 0x815   :  { %v832_v61 = vpop.f32.mrb[20].mxu0 }
 0x816   :  { %v5133_v62 = vpop.f32.mrb[21].mxu0 }
 0x817   :  { %v835_v0 = vpop.f32.mrb[22].mxu0 }
 0x818   :  { %v5134_v1 = vpop.f32.mrb[23].mxu0  ;;  %5138 = vmatmul.mubr.msk.bf16.vlgmr.msra.gmra.mrb[20].mxu1 %vm412_vm4, %v839_v63 }
 0x819   :  { %5149 = vmatprep.mubr.msk.bf16.mxu1 %vm5814_vm1, %v5812_v10 }
 0x822   :  { %v927_v2 = vpop.f32.mrb[24].mxu0 }
 0x823   :  { %v5145_v3 = vpop.f32.mrb[25].mxu0 }
 0x824   :  { %v930_v4 = vpop.f32.mrb[26].mxu0 }
 0x825   :  { %v5146_v6 = vpop.f32.mrb[27].mxu0 }
 0x8e3   :  { %v777_v7 = vpop.f32.mrb[16].mxu1 }
 0x8e4   :  { %v6146_v8 = vadd.f32 %v832_v61, %v777_v7  ;;  %v5125_v9 = vpop.f32.mrb[17].mxu1 }
 0x8e5   :  { %v780_v11 = vpop.f32.mrb[18].mxu1 }
 0x8e6   :  { %v5126_v12 = vpop.f32.mrb[19].mxu1 }
 0x8e7   :  { %v1265_v12 = vrot.slane %v6023_v21, 4  ;;  %v6210_v21 = vld [vmem:[%s7011_s8 + $0x38] sm:$0xff]  }
 0x8eb   :  { %v877_v13 = vpop.f32.mrb[20].mxu1 }
 0x8ec   :  { %v928_v14 = vadd.f32 %v927_v2, %v877_v13  ;;  %v5139_v15 = vpop.f32.mrb[21].mxu1 }
 0x8ed   :  { %v880_v16 = vpop.f32.mrb[22].mxu1 }
 0x8ee   :  { %v5140_v20 = vpop.f32.mrb[23].mxu1  ;;  %v933_v22 = vadd.f32 %v928_v14, %v6064_v52 }
 0x8ef   :  { %v6204_v20 = vld [vmem:[%s7011_s8 + $0x30] sm:$0xff]  }
 0x8f0   :  { %v934_v23 = vsel %vm506_vm6, %v933_v22, -inf }
 0x8f1   :  { %935 = vmax.xlane.f32.xlu1 %v934_v23 }
 0x902   :  { %1098 = vrot.lane.b32.xlu1 %v6044_v42, %s5818_s21 }
 0x906   :  { %1051 = vrot.lane.b32.xlu1 %v6038_v36, %s5819_s22 }
 0x97e   :  { %v936_v24 = vpop.xlane.xlu1 %935 }
 0x97f   :  { %v937_v25 = vsub.f32 %v933_v22, %v936_v24 }
 0x981   :  { %v938_v26 = vmul.f32 1.442695, %v937_v25 }
 0x982   :  { %v1099_v46 = vpop.permute.xlu1 %1098 }
 0x983   :  { %5692 = vpow2.f32 %v938_v26  ;;  %v1104_v56 = vsel %vm295_vm3, %v1099_v46, 0 }
 0x986   :  { %v1052_v47 = vpop.permute.xlu1 %1051 }
 0x98d   :  { %v5693_v27 = vpop.eup %5692 }
 0x98e   :  { %v940_v29 = vsel %vm506_vm6, %v5693_v27, 0.0 }
 0x98f   :  { %941 = vadd.xlane.f32.xlu0 %v940_v29 }
 0x9a5   :  { %946 = vrot.lane.b32.xlu0 %v6046_v44, %s5816_s28 }
 0x9a9   :  { %1096 = vrot.lane.b32.xlu0 %v5989_v50, %s5818_s21 }
 0xa1c   :  { %v942_v33 = vpop.xlane.xlu0 %941 }
 0xa1d   :  { %5694 = vrcp.f32 %v942_v33 }
 0xa20   :  { %v947_v34 = vpop.permute.xlu0 %946 }
 0xa21   :  { %v952_v35 = vsel %vm522_vm5, %v947_v34, 0  ;;  %v6226_v34 = vrot.slane %v6046_v44, 4 }
 0xa22   :  { %5148 = vmatpush3.bf16.msra.mxu1 %v952_v35  ;;  %v6229_v35 = vrot.slane %v6038_v36, 4 }
 0xa23   :  { %5161 = vmatprep.subr.bf16.mxu1 %v5812_v10 }
 0xa24   :  { %v1097_v59 = vpop.permute.xlu0 %1096 }
 0xa27   :  { %v5695_v39 = vpop.eup %5694 }
 0xa28   :  { %v944_v43 = vmul.f32 %v5695_v39, %v5693_v27  ;;  %v1380_v39 = vsel %vm522_vm5, %v6226_v34, 0 }
 0xa2a   :  { %v945_v45 = vpack.c.bf16 %v944_v43, %v944_v43  ;;  %v6239_v43 = vrot.slane %v6044_v42, 4  ;;  %v6248_v42 = vrot.slane %v5989_v50, 4 }
 0xa2c   :  { %5150 = vmatmul.mubr.msk.bf16.vlgmr.msra.gmra.mrb[24].mxu1 %vm506_vm6, %v945_v45 }
 0xa2d   :  { %5162 = vmatpush3.bf16.xpose.msra.mxu1 %v6033_v28  ;;  %5163 = vmatprep.mubr.msk.bf16.mxu1 %vm5814_vm1, %v5812_v10 }
 0xa2e   :  { %5173 = vmatprep.subr.bf16.mxu1 %v5812_v10 }
 0xa34   :  { %5164 = vmatmul.mubr.msk.bf16.vlgmr.msra.gmra.mrb[28].mxu1 %vm412_vm4, %v1052_v47 }
 0xa35   :  { %5175 = vmatprep.mubr.msk.bf16.mxu1 %vm5814_vm1, %v5812_v10 }
 0xaff   :  { %v988_v49 = vpop.f32.mrb[24].mxu1 }
 0xb00   :  { %v994_v53 = vpack.c.bf16 %v988_v49, %v988_v49  ;;  %v5151_v54 = vpop.f32.mrb[25].mxu1  ;;  %v1320_v49 = vsel %vm295_vm3, %v6239_v43, 0 }
 0xb01   :  { %v991_v55 = vpop.f32.mrb[26].mxu1 }
 0xb02   :  { %v5152_v57 = vpop.f32.mrb[27].mxu1  ;;  %5158 = vmatmul.mubr.msk.bf16.vlgmr.msra.gmra.mrb[28].mxu0 %vm295_vm3, %v994_v53 }
 0xb03   :  { %5168 = vmatpush3.bf16.xpose.msra.mxu0 %v1104_v56  ;;  %5169 = vmatprep.mubr.msk.bf16.mxu0 %vm5814_vm1, %v5812_v10 }
 0xb04   :  { %5179 = vmatprep.subr.bf16.mxu0 %v5812_v10 }
 0xb07   :  { %v1090_v28 = vpop.f32.mrb[28].mxu1 }
 0xb08   :  { %v5165_v58 = vpop.f32.mrb[29].mxu1 }
 0xb09   :  { %v1093_v19 = vpop.f32.mrb[30].mxu1 }
 0xb0a   :  { %v5166_v60 = vpop.f32.mrb[31].mxu1  ;;  %5170 = vmatmul.mubr.msk.bf16.vlgmr.msra.gmra.mrb[32].mxu0 %vm295_vm3, %v1097_v59 }
 0xb0b   :  { %5183 = vmatprep.mubr.msk.bf16.mxu0 %vm5814_vm1, %v5812_v10  ;;  %5180 = vmatpush3.bf16.msra.mxu0 %v6204_v20 }
 0xb0c   :  { %5181 = vmatprep.subr.bf16.mxu0 %v5812_v10 }
 0xb0f   :  { %5182 = vmatpush3.bf16.msra.mxu0 %v6210_v21 }
 0xb10   :  { %5193 = vmatprep.subr.bf16.mxu0 %v5812_v10 }
 0xbd5   :  { %v1044_v61 = vpop.f32.mrb[28].mxu0 }
 0xbd6   :  { %v6192_v62 = vadd.f32 %v1044_v61, %v6146_v8  ;;  %v5159_v63 = vpop.f32.mrb[29].mxu0 }
 0xbd7   :  { %v1047_v0 = vpop.f32.mrb[30].mxu0 }
 0xbd8   :  { %v5160_v1 = vpop.f32.mrb[31].mxu0 }
 0xbdd   :  { %v1140_v2 = vpop.f32.mrb[32].mxu0 }
 0xbde   :  { %v1141_v3 = vadd.f32 %v1140_v2, %v1090_v28  ;;  %v5171_v4 = vpop.f32.mrb[33].mxu0 }
 0xbdf   :  { %v1143_v6 = vpop.f32.mrb[34].mxu0 }
 0xbe0   :  { %v5172_v7 = vpop.f32.mrb[35].mxu0  ;;  %v1146_v9 = vadd.f32 %v1141_v3, %v6064_v52 }
 0xbe2   :  { %v1147_v11 = vsel %vm506_vm6, %v1146_v9, -inf }
 0xbe3   :  { %1148 = vmax.xlane.f32.xlu1 %v1147_v11 }
 0xbf4   :  { %1266 = vrot.lane.b32.xlu1 %v1265_v12, %s5817_s16 }
 0xc70   :  { %v1149_v13 = vpop.xlane.xlu1 %1148 }
 0xc71   :  { %v1150_v8 = vsub.f32 %v1146_v9, %v1149_v13 }
 0xc73   :  { %v1151_v14 = vmul.f32 1.442695, %v1150_v8 }
 0xc74   :  { %v1267_v27 = vpop.permute.xlu1 %1266 }
 0xc75   :  { %5696 = vpow2.f32 %v1151_v14  ;;  %v6218_v33 = vsel %vm412_vm4, %v1267_v27, 0 }
 0xc7f   :  { %v5697_v15 = vpop.eup %5696 }
 0xc80   :  { %v1153_v16 = vsel %vm506_vm6, %v5697_v15, 0.0 }
 0xc81   :  { %1154 = vadd.xlane.f32.xlu0 %v1153_v16 }
 0xc97   :  { %1159 = vrot.lane.b32.xlu0 %v6046_v44, %s5818_s21 }
 0xd0e   :  { %v1155_v22 = vpop.xlane.xlu0 %1154 }
 0xd0f   :  { %5698 = vrcp.f32 %v1155_v22 }
 0xd12   :  { %v1160_v23 = vpop.permute.xlu0 %1159 }
 0xd13   :  { %v1165_v24 = vsel %vm522_vm5, %v1160_v23, 0 }
 0xd14   :  { %5174 = vmatpush3.bf16.msra.mxu1 %v1165_v24 }
 0xd15   :  { %5187 = vmatprep.subr.bf16.mxu1 %v5812_v10 }
 0xd19   :  { %v5699_v25 = vpop.eup %5698 }
 0xd1a   :  { %v1157_v26 = vmul.f32 %v5699_v25, %v5697_v15 }
 0xd1c   :  { %v1158_v29 = vpack.c.bf16 %v1157_v26, %v1157_v26 }
 0xd1e   :  { %5176 = vmatmul.mubr.msk.bf16.vlgmr.msra.gmra.mrb[32].mxu1 %vm506_vm6, %v1158_v29 }
 0xd1f   :  { %5188 = vmatpush3.bf16.xpose.msra.mxu1 %v6218_v33  ;;  %5189 = vmatprep.mubr.msk.bf16.mxu1 %vm5814_vm1, %v5812_v10 }
 0xd20   :  { %5199 = vmatprep.subr.bf16.mxu1 %v5812_v10 }
 0xd26   :  { %5190 = vmatmul.mubr.msk.bf16.vlgmr.msra.gmra.mrb[36].mxu1 %vm412_vm4, %v6229_v35 }
 0xd27   :  { %5200 = vmatpush3.bf16.msra.mxu1 %v1380_v39  ;;  %5201 = vmatprep.mubr.msk.bf16.mxu1 %vm5814_vm1, %v5812_v10 }
 0xd28   :  { %5211 = vmatprep.subr.bf16.mxu1 %v5812_v10 }
 0xdf1   :  { %v1201_v44 = vpop.f32.mrb[32].mxu1 }
 0xdf2   :  { %v1207_v45 = vpack.c.bf16 %v1201_v44, %v1201_v44  ;;  %v5177_v46 = vpop.f32.mrb[33].mxu1 }
 0xdf3   :  { %v1204_v36 = vpop.f32.mrb[34].mxu1 }
 0xdf4   :  { %v5178_v47 = vpop.f32.mrb[35].mxu1  ;;  %5184 = vmatmul.mubr.msk.bf16.vlgmr.msra.gmra.mrb[36].mxu0 %vm295_vm3, %v1207_v45 }
 0xdf5   :  { %5194 = vmatpush3.bf16.xpose.msra.mxu0 %v1320_v49  ;;  %5195 = vmatprep.mubr.msk.bf16.mxu0 %vm5814_vm1, %v5812_v10 }
 0xdf6   :  { %5205 = vmatprep.subr.bf16.mxu0 %v5812_v10 }
 0xdf9   :  { %v1308_v53 = vpop.f32.mrb[36].mxu1 }
 0xdfa   :  { %v5191_v54 = vpop.f32.mrb[37].mxu1 }
 0xdfb   :  { %v1311_v55 = vpop.f32.mrb[38].mxu1 }
 0xdfc   :  { %v5192_v56 = vpop.f32.mrb[39].mxu1  ;;  %5196 = vmatmul.mubr.msk.bf16.vlgmr.msra.gmra.mrb[40].mxu0 %vm295_vm3, %v6248_v42 }
 0xdfd   :  { %5206 = vmatpush3.bf16.xpose.msra.mxu0 %v6218_v33  ;;  %5207 = vmatprep.mubr.msk.bf16.mxu0 %vm5814_vm1, %v5812_v10 }
 0xdfe   :  { %5217 = vmatprep.subr.bf16.mxu0 %v5812_v10 }
 0xec7   :  { %v1257_v57 = vpop.f32.mrb[36].mxu0 }
 0xec8   :  { %v6257_v28 = vadd.f32 %v1257_v57, %v6192_v62  ;;  %v5185_v58 = vpop.f32.mrb[37].mxu0 }
 0xec9   :  { %v1260_v59 = vpop.f32.mrb[38].mxu0 }
 0xeca   :  { %v5186_v50 = vpop.f32.mrb[39].mxu0 }
 0xecf   :  { %v1356_v19 = vpop.f32.mrb[40].mxu0 }
 0xed0   :  { %v1357_v60 = vadd.f32 %v1356_v19, %v1308_v53  ;;  %v5197_v61 = vpop.f32.mrb[41].mxu0 }
 0xed1   :  { %v1359_v63 = vpop.f32.mrb[42].mxu0 }
 0xed2   :  { %v5198_v0 = vpop.f32.mrb[43].mxu0  ;;  %v1362_v1 = vadd.f32 %v1357_v60, %v6064_v52 }
 0xed4   :  { %v1363_v2 = vsel %vm506_vm6, %v1362_v1, -inf }
 0xed5   :  { %1364 = vmax.xlane.f32.xlu1 %v1363_v2 }
 0xee6   :  { %1423 = vrot.lane.b32.xlu1 %v6229_v35, %s5815_s27 }
 0xeea   :  { %1468 = vrot.lane.b32.xlu1 %v6248_v42, %s5817_s16 }
 0xf62   :  { %v1365_v62 = vpop.xlane.xlu1 %1364 }
 0xf63   :  { %v1366_v3 = vsub.f32 %v1362_v1, %v1365_v62 }
 0xf65   :  { %v1367_v4 = vmul.f32 1.442695, %v1366_v3 }
 0xf66   :  { %v1424_v6 = vpop.permute.xlu1 %1423 }
 0xf67   :  { %5700 = vpow2.f32 %v1367_v4  ;;  %5208 = vmatmul.mubr.msk.bf16.vlgmr.msra.gmra.mrb[44].mxu0 %vm412_vm4, %v1424_v6 }
 0xf68   :  { %5219 = vmatprep.mubr.msk.bf16.mxu0 %vm5814_vm1, %v5812_v10 }
 0xf6a   :  { %v1469_v16 = vpop.permute.xlu1 %1468 }
 0xf71   :  { %v5701_v7 = vpop.eup %5700 }
 0xf72   :  { %v1369_v9 = vsel %vm506_vm6, %v5701_v7, 0.0 }
 0xf73   :  { %1370 = vadd.xlane.f32.xlu0 %v1369_v9 }
 0xf89   :  { %1470 = vrot.lane.b32.xlu0 %v6239_v43, %s5817_s16 }
0x1000   :  { %v1371_v11 = vpop.xlane.xlu0 %1370 }
0x1001   :  { %5702 = vrcp.f32 %v1371_v11 }
0x1004   :  { %v1471_v8 = vpop.permute.xlu0 %1470 }
0x1005   :  { %v1476_v15 = vsel %vm295_vm3, %v1471_v8, 0 }
0x100b   :  { %v5703_v12 = vpop.eup %5702 }
0x100c   :  { %v1373_v13 = vmul.f32 %v5703_v12, %v5701_v7 }
0x100e   :  { %v1374_v14 = vpack.c.bf16 %v1373_v13, %v1373_v13 }
0x1010   :  { %5202 = vmatmul.mubr.msk.bf16.vlgmr.msra.gmra.mrb[40].mxu1 %vm506_vm6, %v1374_v14 }
0x1011   :  { %5212 = vmatpush3.bf16.xpose.msra.mxu1 %v1476_v15  ;;  %5213 = vmatprep.mubr.msk.bf16.mxu1 %vm5814_vm1, %v5812_v10 }
0x1012   :  { %5223 = vmatprep.subr.bf16.mxu1 %v5812_v10 }
0x1018   :  { %5214 = vmatmul.mubr.msk.bf16.vlgmr.msra.gmra.mrb[44].mxu1 %vm295_vm3, %v1469_v16 }
0x1019   :  { %5224 = vmatpush3.bf16.msra.mxu1 %v6100_v37  ;;  %5227 = vmatprep.mubr.msk.bf16.mxu1 %vm5814_vm1, %v5812_v10 }
0x101a   :  { %5225 = vmatprep.subr.bf16.mxu1 %v5812_v10 }
0x101d   :  { %5226 = vmatpush3.bf16.msra.mxu1 %v6106_v38 }
0x101e   :  { %5239 = vmatprep.subr.bf16.mxu1 %v5812_v10 }
0x103a   :  { %v1462_v22 = vpop.f32.mrb[44].mxu0 }
0x103b   :  { %v5209_v23 = vpop.f32.mrb[45].mxu0 }
0x103c   :  { %v1465_v24 = vpop.f32.mrb[46].mxu0 }
0x103d   :  { %v5210_v25 = vpop.f32.mrb[47].mxu0 }
0x10e3   :  { %v1416_v26 = vpop.f32.mrb[40].mxu1 }
0x10e4   :  { %v5203_v27 = vpop.f32.mrb[41].mxu1  ;;  %v1422_v61 = vpack.c.bf16 %v1416_v26, %v1416_v26 }
0x10e5   :  { %v1419_v29 = vpop.f32.mrb[42].mxu1 }
0x10e6   :  { %v5204_v39 = vpop.f32.mrb[43].mxu1 }
0x10eb   :  { %v1512_v44 = vpop.f32.mrb[44].mxu1 }
0x10ec   :  { %v1513_v45 = vadd.f32 %v1512_v44, %v1462_v22  ;;  %v5215_v37 = vpop.f32.mrb[45].mxu1 }
0x10ed   :  { %v1515_v46 = vpop.f32.mrb[46].mxu1 }
0x10ee   :  { %v5216_v36 = vpop.f32.mrb[47].mxu1  ;;  %v1518_v47 = vadd.f32 %v1513_v45, %v6064_v52 }
0x10f0   :  { %v1519_v49 = vsel %vm506_vm6, %v1518_v47, -inf }
0x10f1   :  { %1520 = vmax.xlane.f32.xlu0 %v1519_v49 }
0x1107   :  { %1531 = vrot.lane.b32.xlu0 %v6226_v34, %s5817_s16 }
0x110b   :  { %1666 = vrot.lane.b32.xlu0 %v6229_v35, %s5817_s16 }
0x117e   :  { %v1521_v38 = vpop.xlane.xlu0 %1520 }
0x117f   :  { %v1522_v53 = vsub.f32 %v1518_v47, %v1521_v38 }
0x1181   :  { %v1523_v54 = vmul.f32 1.442695, %v1522_v53 }
0x1182   :  { %v1532_v55 = vpop.permute.xlu0 %1531 }
0x1183   :  { %5704 = vpow2.f32 %v1523_v54  ;;  %v1537_v56 = vsel %vm522_vm5, %v1532_v55, 0 }
0x1184   :  { %5218 = vmatpush3.bf16.msra.mxu0 %v1537_v56 }
0x1185   :  { %5231 = vmatprep.subr.bf16.mxu0 %v5812_v10 }
0x1186   :  { %v1667_v6 = vpop.permute.xlu0 %1666 }
0x118d   :  { %v5705_v57 = vpop.eup %5704 }
0x118e   :  { %v1525_v58 = vsel %vm506_vm6, %v5705_v57, 0.0 }
0x118f   :  { %1526 = vadd.xlane.f32.xlu1 %v1525_v58 }
0x11a0   :  { %1713 = vrot.lane.b32.xlu1 %v6239_v43, %s5816_s28 }
0x11a4   :  { %1711 = vrot.lane.b32.xlu1 %v6248_v42, %s5816_s28 }
0x121c   :  { %v1527_v59 = vpop.xlane.xlu1 %1526 }
0x121d   :  { %5706 = vrcp.f32 %v1527_v59 }
0x1220   :  { %v1714_v63 = vpop.permute.xlu1 %1713 }
0x1221   :  { %v1719_v0 = vsel %vm295_vm3, %v1714_v63, 0 }
0x1227   :  { %v5707_v50 = vpop.eup %5706 }
0x1228   :  { %v1529_v19 = vmul.f32 %v5707_v50, %v5705_v57 }
0x122a   :  { %v1530_v60 = vpack.c.bf16 %v1529_v19, %v1529_v19 }
0x122c   :  { %5220 = vmatmul.mubr.msk.bf16.vlgmr.msra.gmra.mrb[48].mxu0 %vm506_vm6, %v1530_v60 }
0x122d   :  { %5232 = vmatpush3.bf16.msra.mxu0 %v6116_v48  ;;  %5235 = vmatprep.mubr.msk.bf16.mxu0 %vm5814_vm1, %v5812_v10  ;;  %v1712_v48 = vpop.permute.xlu1 %1711 }
0x122e   :  { %5233 = vmatprep.subr.bf16.mxu0 %v5812_v10 }
0x1231   :  { %5234 = vmatpush3.bf16.msra.mxu0 %v6123_v51 }
0x1232   :  { %5245 = vmatprep.subr.bf16.mxu0 %v5812_v10 }
0x1234   :  { %5236 = vmatmul.mubr.msk.bf16.vlgmr.msra.gmra.mrb[52].mxu0 %vm295_vm3, %v1422_v61 }
0x1235   :  { %5247 = vmatprep.mubr.msk.bf16.mxu0 %vm5814_vm1, %v5812_v10 }
0x123a   :  { %5246 = vmatpush3.bf16.xpose.msra.mxu0 %v1719_v0 }
0x123b   :  { %5257 = vmatprep.subr.bf16.mxu0 %v5812_v10 }
0x1241   :  { %5248 = vmatmul.mubr.msk.bf16.vlgmr.msra.gmra.mrb[56].mxu0 %vm295_vm3, %v1712_v48 }
0x1242   :  { %5258 = vmatpush3.bf16.msra.mxu0 %v6162_v31  ;;  %5261 = vmatprep.mubr.msk.bf16.mxu0 %vm5814_vm1, %v5812_v10 }
0x1243   :  { %5259 = vmatprep.subr.bf16.mxu0 %v5812_v10 }
0x1246   :  { %5260 = vmatpush3.bf16.msra.mxu0 %v6168_v32 }
0x1247   :  { %5271 = vmatprep.subr.bf16.mxu0 %v5812_v10 }
0x12ff   :  { %v1573_v51 = vpop.f32.mrb[48].mxu0 }
0x1300   :  { %v1579_v1 = vpack.c.bf16 %v1573_v51, %v1573_v51  ;;  %v5221_v2 = vpop.f32.mrb[49].mxu0 }
0x1301   :  { %v1576_v62 = vpop.f32.mrb[50].mxu0 }
0x1302   :  { %v5222_v3 = vpop.f32.mrb[51].mxu0  ;;  %5228 = vmatmul.mubr.msk.bf16.vlgmr.msra.gmra.mrb[48].mxu1 %vm295_vm3, %v1579_v1 }
0x1303   :  { %5240 = vmatpush3.bf16.xpose.msra.mxu1 %v6218_v33  ;;  %5241 = vmatprep.mubr.msk.bf16.mxu1 %vm5814_vm1, %v5812_v10 }
0x1304   :  { %5251 = vmatprep.subr.bf16.mxu1 %v5812_v10 }
0x1307   :  { %v1660_v31 = vpop.f32.mrb[52].mxu0 }
0x1308   :  { %v5237_v4 = vpop.f32.mrb[53].mxu0 }
0x1309   :  { %v1663_v32 = vpop.f32.mrb[54].mxu0 }
0x130a   :  { %v5238_v7 = vpop.f32.mrb[55].mxu0  ;;  %5242 = vmatmul.mubr.msk.bf16.vlgmr.msra.gmra.mrb[52].mxu1 %vm412_vm4, %v1667_v6 }
0x130b   :  { %5253 = vmatprep.mubr.msk.bf16.mxu1 %vm5814_vm1, %v5812_v10 }
0x1314   :  { %v1755_v9 = vpop.f32.mrb[56].mxu0 }
0x1315   :  { %v5249_v11 = vpop.f32.mrb[57].mxu0 }
0x1316   :  { %v1758_v12 = vpop.f32.mrb[58].mxu0 }
0x1317   :  { %v5250_v13 = vpop.f32.mrb[59].mxu0 }
0x1318   :  { %v5782_v13 = vld [vmem:[%s7003_s0] sm:$0xff] }
0x13d5   :  { %v1617_v8 = vpop.f32.mrb[48].mxu1 }
0x13d6   :  { %v1661_v14 = vadd.f32 %v1660_v31, %v1617_v8  ;;  %v5229_v15 = vpop.f32.mrb[49].mxu1  ;;  %v6365_v8 = vadd.f32 %v5782_v13, %v6257_v28 }
0x13d7   :  { %v1620_v16 = vpop.f32.mrb[50].mxu1 }
0x13d8   :  { %v5230_v22 = vpop.f32.mrb[51].mxu1 }
0x13dd   :  { %v1705_v23 = vpop.f32.mrb[52].mxu1 }
0x13de   :  { %v1756_v24 = vadd.f32 %v1755_v9, %v1705_v23  ;;  %v5243_v25 = vpop.f32.mrb[53].mxu1 }
0x13df   :  { %v1708_v26 = vpop.f32.mrb[54].mxu1 }
0x13e0   :  { %v5244_v27 = vpop.f32.mrb[55].mxu1  ;;  %v1761_v29 = vadd.f32 %v1756_v24, %v6064_v52 }
0x13e2   :  { %v1762_v39 = vsel %vm506_vm6, %v1761_v29, -inf }
0x13e3   :  { %1763 = vmax.xlane.f32.xlu0 %v1762_v39 }
0x13f9   :  { %1774 = vrot.lane.b32.xlu0 %v6226_v34, %s5816_s28 }
0x13fd   :  { %1867 = vrot.lane.b32.xlu0 %v6229_v35, %s5819_s22 }
0x1470   :  { %v1764_v44 = vpop.xlane.xlu0 %1763 }
0x1471   :  { %v1765_v45 = vsub.f32 %v1761_v29, %v1764_v44 }
0x1473   :  { %v1766_v37 = vmul.f32 1.442695, %v1765_v45 }
0x1474   :  { %v1775_v46 = vpop.permute.xlu0 %1774 }
0x1475   :  { %5708 = vpow2.f32 %v1766_v37  ;;  %v1780_v36 = vsel %vm522_vm5, %v1775_v46, 0 }
0x1476   :  { %5252 = vmatpush3.bf16.msra.mxu1 %v1780_v36  ;;  %v5783_v36 = vld [vmem:[%s7003_s0 + $0x8] sm:$0xff] }
0x1477   :  { %5265 = vmatprep.subr.bf16.mxu1 %v5812_v10 }
0x1478   :  { %v1868_v55 = vpop.permute.xlu0 %1867 }
0x147f   :  { %v5709_v47 = vpop.eup %5708 }
0x1480   :  { %v1768_v49 = vsel %vm506_vm6, %v5709_v47, 0.0 }
0x1481   :  { %1769 = vadd.xlane.f32.xlu1 %v1768_v49 }
0x1492   :  { %1914 = vrot.lane.b32.xlu1 %v6239_v43, %s5818_s21 }
0x1496   :  { %1912 = vrot.lane.b32.xlu1 %v6248_v42, %s5818_s21 }
0x150e   :  { %v1770_v35 = vpop.xlane.xlu1 %1769 }
0x150f   :  { %5710 = vrcp.f32 %v1770_v35 }
0x1512   :  { %v1915_v43 = vpop.permute.xlu1 %1914 }
0x1513   :  { %v1920_v59 = vsel %vm295_vm3, %v1915_v43, 0  ;;  %v5605_v43 = vld [vmem:[%s7012_s9 + $0x10] ss:$8 sps:$4 sm:$0xff]  }
0x1516   :  { %v1913_v60 = vpop.permute.xlu1 %1912 }
0x1519   :  { %v5711_v38 = vpop.eup %5710 }
0x151a   :  { %v1772_v53 = vmul.f32 %v5711_v38, %v5709_v47 }
0x151c   :  { %v1773_v54 = vpack.c.bf16 %v1772_v53, %v1772_v53  ;;  %v5604_v53 = vld [vmem:[%s7012_s9 + $0x4] ss:$8 sps:$4 sm:$0xff]  }
0x151e   :  { %5254 = vmatmul.mubr.msk.bf16.vlgmr.msra.gmra.mrb[56].mxu1 %vm506_vm6, %v1773_v54  ;;  %v5602_v54 = vld [vmem:[%s7012_s9] ss:$8 sps:$4 sm:$0xff]  }
0x151f   :  { %5266 = vmatpush3.bf16.xpose.msra.mxu1 %v6218_v33  ;;  %5267 = vmatprep.mubr.msk.bf16.mxu1 %vm5814_vm1, %v5812_v10 }
0x1520   :  { %5277 = vmatprep.subr.bf16.mxu1 %v5812_v10 }
0x1526   :  { %5268 = vmatmul.mubr.msk.bf16.vlgmr.msra.gmra.mrb[60].mxu1 %vm412_vm4, %v1868_v55  ;;  %v5607_v55 = vld [vmem:[%s7012_s9 + $0x14] ss:$8 sps:$4 sm:$0xff]  }
0x1527   :  { %5279 = vmatprep.mubr.msk.bf16.mxu1 %vm5814_vm1, %v5812_v10 }
0x15f1   :  { %v1816_v42 = vpop.f32.mrb[56].mxu1 }
0x15f2   :  { %v1822_v56 = vpack.c.bf16 %v1816_v42, %v1816_v42  ;;  %v5255_v57 = vpop.f32.mrb[57].mxu1  ;;  %v5610_v42 = vld [vmem:[%s7012_s9 + $0x24] ss:$8 sps:$4 sm:$0xff]  }
0x15f3   :  { %v1819_v58 = vpop.f32.mrb[58].mxu1  ;;  %v5611_v57 = vld [vmem:[%s7012_s9 + $0x30] ss:$8 sps:$4 sm:$0xff]  }
0x15f4   :  { %v5256_v50 = vpop.f32.mrb[59].mxu1  ;;  %5262 = vmatmul.mubr.msk.bf16.vlgmr.msra.gmra.mrb[60].mxu0 %vm295_vm3, %v1822_v56  ;;  %v5608_v56 = vld [vmem:[%s7012_s9 + $0x20] ss:$8 sps:$4 sm:$0xff]   ;;  %v5613_v58 = vld [vmem:[%s7012_s9 + $0x34] ss:$8 sps:$4 sm:$0xff]  }
0x15f5   :  { %5272 = vmatpush3.bf16.xpose.msra.mxu0 %v1920_v59  ;;  %5273 = vmatprep.mubr.msk.bf16.mxu0 %vm5814_vm1, %v5812_v10 }
0x15f6   :  { %5283 = vmatprep.subr.bf16.mxu0 %v5812_v10 }
0x15f9   :  { %v1906_v33 = vpop.f32.mrb[60].mxu1 }
0x15fa   :  { %v5269_v19 = vpop.f32.mrb[61].mxu1 }
0x15fb   :  { %v1909_v61 = vpop.f32.mrb[62].mxu1 }
0x15fc   :  { %v5270_v63 = vpop.f32.mrb[63].mxu1  ;;  %5274 = vmatmul.mubr.msk.bf16.vlgmr.msra.gmra.mrb[64].mxu0 %vm295_vm3, %v1913_v60 }
0x15fd   :  { %5284 = vmatpush3.bf16.msra.mxu0 %v6204_v20  ;;  %5287 = vmatprep.mubr.msk.bf16.mxu0 %vm5814_vm1, %v5812_v10 }
0x15fe   :  { %5285 = vmatprep.subr.bf16.mxu0 %v5812_v10 }
0x1601   :  { %5286 = vmatpush3.bf16.msra.mxu0 %v6210_v21 }
0x1602   :  { %5291 = vmatprep.subr.bf16.mxu0 %v5812_v10 }
0x16c7   :  { %v1860_v0 = vpop.f32.mrb[60].mxu0 }
0x16c8   :  { %v1866_v48 = vadd.f32 %v1860_v0, %v1661_v14  ;;  %v5263_v51 = vpop.f32.mrb[61].mxu0  ;;  %v61_v0 = vld [vmem:[%s7008_s5] sm:$0x3] }
0x16c9   :  { %v1863_v1 = vpop.f32.mrb[62].mxu0  ;;  %v2089_v51 = vrot.slane %v61_v0, %v5968_v30  ;;  %v5615_v30 = vld [vmem:[%s7013_s10 + $0x8] sm:$0xff]   ;;  %v6486_v0 = vsub.s32 1, %v5942_v18 }
0x16ca   :  { %v5264_v2 = vpop.f32.mrb[63].mxu0 }
0x16cf   :  { %v1956_v62 = vpop.f32.mrb[64].mxu0 }
0x16d0   :  { %v1957_v3 = vadd.f32 %v1956_v62, %v1906_v33  ;;  %v5275_v31 = vpop.f32.mrb[65].mxu0 }
0x16d1   :  { %v1959_v4 = vpop.f32.mrb[66].mxu0 }
0x16d2   :  { %v5276_v6 = vpop.f32.mrb[67].mxu0  ;;  %v1962_v20 = vadd.f32 %v1957_v3, %v6064_v52  ;;  %v5614_v4 = vld [vmem:[%s7013_s10] sm:$0xff]  }
0x16d3   :  { %v5616_v6 = vld [vmem:[%s7013_s10 + $0x10] sm:$0xff]  }
0x16d4   :  { %v1963_v32 = vsel %vm506_vm6, %v1962_v20, -inf }
0x16d5   :  { %1964 = vmax.xlane.f32.xlu0 %v1963_v32  ;;  %v5618_v32 = vld [vmem:[%s7013_s10 + $0x20] sm:$0xff]  }
0x16eb   :  { %1975 = vrot.lane.b32.xlu0 %v6226_v34, %s5818_s21  ;;  %v2070_v34 = vmul.f32 %v6365_v8, %v6365_v8 }
0x16ed   :  { %v2072_v16 = vsel %vm64_vm0, %v2070_v34, 0.0 }
0x1762   :  { %v1965_v21 = vpop.xlane.xlu0 %1964 }
0x1763   :  { %v1966_v7 = vsub.f32 %v1962_v20, %v1965_v21  ;;  %v5617_v20 = vld [vmem:[%s7013_s10 + $0x18] sm:$0xff]   ;;  %v5619_v21 = vld [vmem:[%s7013_s10 + $0x28] sm:$0xff]  }
0x1765   :  { %v1967_v9 = vmul.f32 1.442695, %v1966_v7  ;;  %v5620_v7 = vld [vmem:[%s7013_s10 + $0x30] sm:$0xff]  }
0x1766   :  { %v1976_v11 = vpop.permute.xlu0 %1975 }
0x1767   :  { %5712 = vpow2.f32 %v1967_v9  ;;  %v1981_v12 = vsel %vm522_vm5, %v1976_v11, 0  ;;  %v5621_v9 = vld [vmem:[%s7013_s10 + $0x38] sm:$0xff]  }
0x1768   :  { %5278 = vmatpush3.bf16.msra.mxu1 %v1981_v12 }
0x1769   :  { %2144 = vmatprep.subr.bf16.mxu1 %v5604_v53 }
0x1771   :  { %v5713_v14 = vpop.eup %5712 }
0x1772   :  { %v1969_v15 = vsel %vm506_vm6, %v5713_v14, 0.0 }
0x1773   :  { %1970 = vadd.xlane.f32.xlu1 %v1969_v15 }
0x1777   :  { %2073 = vadd.xlane.f32.xlu1 %v2072_v16 }
0x1800   :  { %v1971_v22 = vpop.xlane.xlu1 %1970 }
0x1801   :  { %5714 = vrcp.f32 %v1971_v22 }
0x1804   :  { %v2074_v59 = vpop.xlane.xlu1 %2073 }
0x1805   :  { %v2078_v50 = vmul.f32 0.015625, %v2074_v59  ;;  %v5633_v59 = vld [vmem:[%s7009_s6 + $0xac] ss:$12 sps:$4 sm:$0xff]  }
0x1807   :  { %v2080_v33 = vadd.f32 1e-06, %v2078_v50 }
0x1809   :  { %5716 = vrsqrt.f32 %v2080_v33 }
0x180b   :  { %v5715_v23 = vpop.eup %5714 }
0x180c   :  { %v1973_v24 = vmul.f32 %v5715_v23, %v5713_v14 }
0x180e   :  { %v1974_v25 = vpack.c.bf16 %v1973_v24, %v1973_v24 }
0x1810   :  { %5280 = vmatmul.mubr.msk.bf16.vlgmr.msra.gmra.mrb[64].mxu1 %vm506_vm6, %v1974_v25 }
0x1811   :  { %2176 = vmatprep.mubr.bf16.mxu1 %v5813_v17  ;;  %2145 = vmatpush1.bf16.msra.mxu1 %v5602_v54 }
0x1812   :  { %2146 = vmatprep.subr.bf16.mxu1 %v5607_v55 }
0x1813   :  { %v5717_v63 = vpop.eup %5716 }
0x1815   :  { %2147 = vmatpush1.bf16.msra.mxu1 %v5605_v43  ;;  %v5627_v43 = vld [vmem:[%s7009_s6 + $0x7c] ss:$12 sps:$4 sm:$0xff]  }
0x1816   :  { %2148 = vmatprep.subr.bf16.mxu1 %v5610_v42  ;;  %v5625_v42 = vld [vmem:[%s7009_s6 + $0x78] ss:$12 sps:$4 sm:$0xff]  }
0x1819   :  { %2149 = vmatpush1.bf16.msra.mxu1 %v5608_v56  ;;  %v5630_v56 = vld [vmem:[%s7009_s6 + $0x94] ss:$12 sps:$4 sm:$0xff]  }
0x181a   :  { %2150 = vmatprep.subr.bf16.mxu1 %v5613_v58  ;;  %v5631_v58 = vld [vmem:[%s7009_s6 + $0xa8] ss:$12 sps:$4 sm:$0xff]  }
0x181d   :  { %2151 = vmatpush1.bf16.msra.mxu1 %v5611_v57  ;;  %v5628_v57 = vld [vmem:[%s7009_s6 + $0x90] ss:$12 sps:$4 sm:$0xff]  }
0x18e3   :  { %v2017_v28 = vpop.f32.mrb[64].mxu1 }
0x18e4   :  { %v2023_v26 = vpack.c.bf16 %v2017_v28, %v2017_v28  ;;  %v5281_v27 = vpop.f32.mrb[65].mxu1 }
0x18e5   :  { %v2020_v29 = vpop.f32.mrb[66].mxu1 }
0x18e6   :  { %v5282_v39 = vpop.f32.mrb[67].mxu1  ;;  %5288 = vmatmul.mubr.msk.bf16.vlgmr.msra.gmra.mrb[68].mxu0 %vm295_vm3, %v2023_v26 }
0x18e7   :  { %5307 = vmatprep.mubr.msk.bf16.mxu0 %vm5814_vm1, %v5812_v10  ;;  %5292 = vmatpush3.bf16.msra.mxu0 %v5614_v4 }
0x18e8   :  { %5293 = vmatprep.subr.bf16.mxu0 %v5812_v10 }
0x18eb   :  { %5294 = vmatpush3.bf16.msra.mxu0 %v5615_v30  ;;  %v5634_v30 = vld [vmem:[%s7009_s6 + $0x68] ss:$12 sps:$4 sm:$0xff]  }
0x18ec   :  { %5295 = vmatprep.subr.bf16.mxu0 %v5812_v10 }
0x18ef   :  { %5296 = vmatpush3.bf16.msra.mxu0 %v5616_v6  ;;  %v5635_v6 = vld [vmem:[%s7009_s6 + $0x80] ss:$12 sps:$4 sm:$0xff]  }
0x18f0   :  { %5297 = vmatprep.subr.bf16.mxu0 %v5812_v10 }
0x18f3   :  { %5298 = vmatpush3.bf16.msra.mxu0 %v5617_v20  ;;  %v5636_v20 = vld [vmem:[%s7009_s6 + $0x98] ss:$12 sps:$4 sm:$0xff]  }
0x18f4   :  { %5299 = vmatprep.subr.bf16.mxu0 %v5812_v10 }
0x18f7   :  { %5300 = vmatpush3.bf16.msra.mxu0 %v5618_v32  ;;  %v5637_v32 = vld [vmem:[%s7009_s6 + $0xb0] ss:$12 sps:$4 sm:$0xff]  }
0x18f8   :  { %5301 = vmatprep.subr.bf16.mxu0 %v5812_v10 }
0x18fb   :  { %5302 = vmatpush3.bf16.msra.mxu0 %v5619_v21 }
0x18fc   :  { %5303 = vmatprep.subr.bf16.mxu0 %v5812_v10 }
0x18ff   :  { %5304 = vmatpush3.bf16.msra.mxu0 %v5620_v7 }
0x1900   :  { %5305 = vmatprep.subr.bf16.mxu0 %v5812_v10 }
0x1903   :  { %5306 = vmatpush3.bf16.msra.mxu0 %v5621_v9 }
0x19b9   :  { %v2061_v44 = vpop.f32.mrb[68].mxu0 }
0x19ba   :  { %v2067_v45 = vadd.f32 %v2061_v44, %v1866_v48  ;;  %v5289_v37 = vpop.f32.mrb[69].mxu0  ;;  %v2084_v48 = vmul.f32 %v5717_v63, %v6365_v8 }
0x19bb   :  { %v2064_v46 = vpop.f32.mrb[70].mxu0 }
0x19bc   :  { %v6379_v47 = vadd.f32 %v5783_v36, %v2067_v45  ;;  %v5290_v49 = vpop.f32.mrb[71].mxu0  ;;  %v2090_v62 = vmul.f32 %v2089_v51, %v2084_v48 }
0x19be   :  { %v2071_v35 = vmul.f32 %v6379_v47, %v6379_v47 }
0x19c0   :  { %v2075_v38 = vsel %vm64_vm0, %v2071_v35, 0.0 }
0x19c1   :  { %2076 = vadd.xlane.f32.xlu1 %v2075_v38 }
0x1a4e   :  { %v2077_v19 = vpop.xlane.xlu1 %2076 }
0x1a4f   :  { %v2079_v60 = vmul.f32 0.015625, %v2077_v19 }
0x1a51   :  { %v2081_v61 = vadd.f32 1e-06, %v2079_v60 }
0x1a53   :  { %5718 = vrsqrt.f32 %v2081_v61 }
0x1a5d   :  { %v5719_v1 = vpop.eup %5718 }
0x1a5e   :  { %v2085_v2 = vmul.f32 %v5719_v1, %v6379_v47 }
0x1a60   :  { %v2091_v3 = vmul.f32 %v2089_v51, %v2085_v2  ;;  %v5784_v51 = vld [vmem:[%s7006_s3] sm:$0x3] }
0x1a61   :  { %v2330_v1 = vrot.slane %v5784_v51, %v6486_v0 }
0x1a62   :  { %v2092_v31 = vpack.c.bf16 %v2091_v3, %v2090_v62 }
0x1a64   :  { %4738 = vmatmul.mubr.msk.bf16.vlgmr.msra.gmra.mrb[68].mxu1 %vm64_vm0, %v2092_v31 }
0x1a65   :  { %2450 = vmatprep.mubr.bf16.mxu1 %v5813_v17 }
0x1b37   :  { %v2178_v11 = vpop.f32.mrb[68].mxu1 }
0x1b38   :  { %v4739_v12 = vmul.f32 -1.442695, %v2178_v11  ;;  %v2180_v13 = vpop.f32.mrb[69].mxu1 }
0x1b39   :  { %v2182_v14 = vpop.f32.mrb[70].mxu1 }
0x1b3a   :  { %5720 = vpow2.f32 %v4739_v12  ;;  %v4740_v15 = vmul.f32 -1.442695, %v2182_v14  ;;  %v2184_v34 = vpop.f32.mrb[71].mxu1 }
0x1b3c   :  { %5722 = vpow2.f32 %v4740_v15 }
0x1b44   :  { %v5721_v16 = vpop.eup %5720 }
0x1b45   :  { %v2193_v22 = vadd.f32 1.0, %v5721_v16 }
0x1b46   :  { %v5723_v23 = vpop.eup %5722 }
0x1b47   :  { %5724 = vrcp.f32 %v2193_v22  ;;  %v2194_v24 = vadd.f32 1.0, %v5723_v23 }
0x1b49   :  { %5726 = vrcp.f32 %v2194_v24 }
0x1b51   :  { %v5725_v25 = vpop.eup %5724 }
0x1b52   :  { %v2199_v28 = vmul.f32 %v5725_v25, %v2178_v11 }
0x1b53   :  { %v5727_v26 = vpop.eup %5726 }
0x1b54   :  { %v2201_v27 = vmul.f32 %v2199_v28, %v2180_v13  ;;  %v2200_v29 = vmul.f32 %v5727_v26, %v2182_v14 }
0x1b56   :  { %v2202_v39 = vmul.f32 %v2200_v29, %v2184_v34  ;;  %v5638_v29 = vld [vmem:[%s7010_s7 + $0x20] ss:$8 sps:$4 sm:$0xff]  }
0x1b58   :  { %v2203_v44 = vpack.c.bf16 %v2202_v39, %v2201_v27  ;;  %v5640_v27 = vld [vmem:[%s7010_s7 + $0x24] ss:$8 sps:$4 sm:$0xff]   ;;  %v5643_v39 = vld [vmem:[%s7010_s7 + $0x34] ss:$8 sps:$4 sm:$0xff]  }
0x1b59   :  { %2581 = vmatprep.subr.bf16.mxu0 %v5640_v27 }
0x1b5a   :  { %5308 = vmatmul.mubr.bf16.vlgmr.msra.gmra.mrb[72].mxu0 %v2203_v44 }
0x1b5b   :  { %2613 = vmatprep.mubr.bf16.mxu0 %v5813_v17  ;;  %2582 = vmatpush1.bf16.msra.mxu0 %v5638_v29 }
0x1b5c   :  { %2583 = vmatprep.subr.bf16.mxu0 %v5643_v39 }
0x1c2d   :  { %v2302_v45 = vpop.f32.mrb[72].mxu0 }
0x1c2e   :  { %v6449_v37 = vadd.f32 %v2302_v45, %v6365_v8  ;;  %v5309_v46 = vpop.f32.mrb[73].mxu0  ;;  %v5624_v8 = vld [vmem:[%s7009_s6 + $0x64] ss:$12 sps:$4 sm:$0xff]  }
0x1c2f   :  { %v2305_v36 = vpop.f32.mrb[74].mxu0  ;;  %2418 = vmatprep.subr.bf16.mxu1 %v5624_v8 }
0x1c30   :  { %v6452_v49 = vadd.f32 %v2305_v36, %v6379_v47  ;;  %v5310_v35 = vpop.f32.mrb[75].mxu0  ;;  %v2311_v38 = vmul.f32 %v6449_v37, %v6449_v37  ;;  %v5622_v47 = vld [vmem:[%s7009_s6 + $0x60] ss:$12 sps:$4 sm:$0xff]  }
0x1c31   :  { %2419 = vmatpush1.bf16.msra.mxu1 %v5622_v47 }
0x1c32   :  { %v2313_v53 = vsel %vm64_vm0, %v2311_v38, 0.0  ;;  %v2312_v54 = vmul.f32 %v6452_v49, %v6452_v49  ;;  %2420 = vmatprep.subr.bf16.mxu1 %v5627_v43 }
0x1c33   :  { %2314 = vadd.xlane.f32.xlu1 %v2313_v53 }
0x1c34   :  { %v2316_v55 = vsel %vm64_vm0, %v2312_v54, 0.0 }
0x1c35   :  { %2421 = vmatpush1.bf16.msra.mxu1 %v5625_v42 }
0x1c36   :  { %2422 = vmatprep.subr.bf16.mxu1 %v5630_v56 }
0x1c37   :  { %2317 = vadd.xlane.f32.xlu1 %v2316_v55 }
0x1c39   :  { %2423 = vmatpush1.bf16.msra.mxu1 %v5628_v57 }
0x1c3a   :  { %2424 = vmatprep.subr.bf16.mxu1 %v5633_v59 }
0x1c3d   :  { %2425 = vmatpush1.bf16.msra.mxu1 %v5631_v58  ;;  %v5785_v58 = vld [vmem:[%s7007_s4] sm:$0x3] }
0x1c3e   :  { %5311 = vmatprep.subr.bf16.mxu1 %v5812_v10  ;;  %v2549_v59 = vrot.slane %v5785_v58, %v6486_v0 }
0x1cc0   :  { %v2315_v50 = vpop.xlane.xlu1 %2314 }
0x1cc1   :  { %v2319_v33 = vmul.f32 0.015625, %v2315_v50 }
0x1cc3   :  { %v2321_v19 = vadd.f32 1e-06, %v2319_v33 }
0x1cc4   :  { %v2318_v60 = vpop.xlane.xlu1 %2317 }
0x1cc5   :  { %5728 = vrsqrt.f32 %v2321_v19  ;;  %v2320_v61 = vmul.f32 0.015625, %v2318_v60 }
0x1cc7   :  { %v2322_v63 = vadd.f32 1e-06, %v2320_v61 }
0x1cc9   :  { %5730 = vrsqrt.f32 %v2322_v63 }
0x1ccf   :  { %v5729_v48 = vpop.eup %5728 }
0x1cd0   :  { %v2325_v2 = vmul.f32 %v5729_v48, %v6449_v37 }
0x1cd2   :  { %v2331_v31 = vmul.f32 %v2330_v1, %v2325_v2 }
0x1cd3   :  { %v5731_v62 = vpop.eup %5730 }
0x1cd4   :  { %v2326_v3 = vmul.f32 %v5731_v62, %v6452_v49 }
0x1cd6   :  { %v2332_v4 = vmul.f32 %v2330_v1, %v2326_v3 }
0x1cd8   :  { %v2333_v18 = vpack.c.bf16 %v2332_v4, %v2331_v31 }
0x1cda   :  { %4777 = vmatmul.mubr.msk.bf16.vlgmr.msra.gmra.mrb[72].mxu1 %vm64_vm0, %v2333_v18 }
0x1cdb   :  { %5312 = vmatpush3.bf16.msra.mxu1 %v5634_v30  ;;  %5319 = vmatprep.mubr.msk.bf16.mxu1 %vm5814_vm1, %v5812_v10 }
0x1cdc   :  { %5313 = vmatprep.subr.bf16.mxu1 %v5812_v10 }
0x1cdf   :  { %5314 = vmatpush3.bf16.msra.mxu1 %v5635_v6 }
0x1ce0   :  { %5315 = vmatprep.subr.bf16.mxu1 %v5812_v10 }
0x1ce3   :  { %5316 = vmatpush3.bf16.msra.mxu1 %v5636_v20 }
0x1ce4   :  { %5317 = vmatprep.subr.bf16.mxu1 %v5812_v10 }
0x1ce7   :  { %5318 = vmatpush3.bf16.msra.mxu1 %v5637_v32 }
0x1ce8   :  { %5329 = vmatprep.subr.bf16.mxu1 %v5812_v10 }
0x1cea   :  { %5320 = vmatmul.mubr.msk.bf16.vlgmr.msra.gmra.mrb[76].mxu1 %vm64_vm0, %v2333_v18 }
0x1ceb   :  { %5331 = vmatprep.mubr.msk.bf16.mxu1 %vm5814_vm1, %v5812_v10 }
0x1dad   :  { %v2452_v21 = vpop.f32.mrb[72].mxu1 }
0x1dae   :  { %v6516_v7 = vpop.f32.mrb[73].mxu1 }
0x1daf   :  { %v2456_v9 = vpop.f32.mrb[74].mxu1  ;;  %v2504_v28 = vmul.f32 %v6516_v7, %v5983_v41 }
0x1db0   :  { %v6518_v11 = vpack.c.bf16 %v2456_v9, %v2452_v21  ;;  %v2458_v12 = vpop.f32.mrb[75].mxu1 }
0x1db1   :  { %v2505_v33 = vmul.f32 %v2458_v12, %v5983_v41  ;;  %v5786_v41 = vld [vmem:[%s7004_s1] sm:$0xff] }
0x1db2   :  { %v2502_v1 = vmul.f32 %v5786_v41, %v6516_v7  ;;  %v2503_v2 = vmul.f32 %v5786_v41, %v2458_v12 }
0x1dbd   :  { %v2495_v13 = vpop.f32.mrb[76].mxu1 }
0x1dbe   :  { %v5321_v14 = vpop.f32.mrb[77].mxu1  ;;  %v2530_v15 = vmul.f32 %v2495_v13, %v2495_v13  ;;  %v2518_v25 = vmul.f32 %v2495_v13, %v5981_v40  ;;  %v2516_v54 = vmul.f32 %v2495_v13, %v6015_v5 }
0x1dbf   :  { %v2498_v34 = vpop.f32.mrb[78].mxu1 }
0x1dc0   :  { %v5322_v16 = vpop.f32.mrb[79].mxu1  ;;  %v2532_v22 = vsel %vm295_vm3, %v2530_v15, 0.0  ;;  %v2531_v23 = vmul.f32 %v2498_v34, %v2498_v34  ;;  %v2519_v26 = vmul.f32 %v2498_v34, %v5981_v40  ;;  %v5641_v40 = vld [vmem:[%s7010_s7 + $0x30] ss:$8 sps:$4 sm:$0xff]   ;;  %v2517_v55 = vmul.f32 %v2498_v34, %v6015_v5 }
0x1dc1   :  { %2533 = vadd.xlane.f32.xlu0 %v2532_v22  ;;  %2584 = vmatpush1.bf16.msra.mxu0 %v5641_v40 }
0x1dc2   :  { %v2535_v24 = vsel %vm295_vm3, %v2531_v23, 0.0  ;;  %5323 = vmatprep.subr.bf16.mxu0 %v5812_v10 }
0x1dc3   :  { %2536 = vadd.xlane.f32.xlu1 %v2535_v24 }
0x1dd4   :  { %2522 = vrot.lane.b32.xlu1 %v2518_v25, %s5815_s27 }
0x1dd7   :  { %2508 = vrot.lane.b32.xlu0 %v2504_v28, %s5816_s28 }
0x1dd8   :  { %2524 = vrot.lane.b32.xlu1 %v2519_v26, %s5815_s27 }
0x1e4e   :  { %v2534_v44 = vpop.xlane.xlu0 %2533 }
0x1e4f   :  { %v2538_v45 = vmul.f32 0.03125, %v2534_v44 }
0x1e50   :  { %v2537_v46 = vpop.xlane.xlu1 %2536 }
0x1e51   :  { %v2540_v36 = vadd.f32 1e-06, %v2538_v45  ;;  %v2539_v35 = vmul.f32 0.03125, %v2537_v46 }
0x1e52   :  { %v2509_v51 = vpop.permute.xlu0 %2508 }
0x1e53   :  { %5732 = vrsqrt.f32 %v2540_v36  ;;  %v2541_v38 = vadd.f32 1e-06, %v2539_v35  ;;  %v2514_v3 = vadd.f32 %v2509_v51, %v2502_v1 }
0x1e54   :  { %v2523_v53 = vpop.permute.xlu1 %2522 }
0x1e55   :  { %5734 = vrsqrt.f32 %v2541_v38  ;;  %v2528_v47 = vadd.f32 %v2523_v53, %v2516_v54 }
0x1e58   :  { %v2525_v8 = vpop.permute.xlu1 %2524 }
0x1e59   :  { %v2529_v43 = vadd.f32 %v2525_v8, %v2517_v55 }
0x1e5b   :  { %v6544_v42 = vpack.c.bf16 %v2529_v43, %v2528_v47 }
0x1e5d   :  { %v5733_v56 = vpop.eup %5732  ;;  %2647 = vrot.lane.b32.xlu1 %v6544_v42, %s5817_s16 }
0x1e5e   :  { %v2544_v57 = vmul.f32 %v5733_v56, %v2495_v13 }
0x1e5f   :  { %v5735_v50 = vpop.eup %5734 }
0x1e60   :  { %v2545_v5 = vmul.f32 %v5735_v50, %v2498_v34  ;;  %v2550_v19 = vmul.f32 %v2549_v59, %v2544_v57 }
0x1e61   :  { %2510 = vrot.lane.b32.xlu1 %v2505_v33, %s5816_s28 }
0x1e62   :  { %v2551_v60 = vmul.f32 %v2549_v59, %v2545_v5 }
0x1e64   :  { %v2552_v61 = vpack.c.bf16 %v2551_v60, %v2550_v19 }
0x1e66   :  { %4787 = vmatmul.mubr.msk.bf16.vlgmr.msra.gmra.mrb[76].mxu0 %vm295_vm3, %v2552_v61 }
0x1e67   :  { %5325 = vmatprep.mubr.msk.bf16.mxu0 %vm5814_vm1, %v5812_v10 }
0x1ecf   :  { %v2648_v63 = vpop.permute.xlu1 %2647 }
0x1ed0   :  { %v6558_v48 = vsel %vm412_vm4, %v2648_v63, 0 }
0x1ed1   :  { %5324 = vmatpush3.bf16.xpose.msra.mxu0 %v6558_v48 }
0x1ed2   :  { %5335 = vmatprep.subr.bf16.mxu0 %v5812_v10 }
0x1ed3   :  { %v2511_v62 = vpop.permute.xlu1 %2510 }
0x1ed4   :  { %v2515_v31 = vadd.f32 %v2511_v62, %v2503_v2 }
0x1ed6   :  { %v6566_v4 = vpack.c.bf16 %v2515_v31, %v2514_v3 }
0x1ed8   :  { %5326 = vmatmul.mubr.msk.bf16.vlgmr.msra.gmra.mrb[80].mxu0 %vm412_vm4, %v6566_v4 }
0x1ed9   :  { %5337 = vmatprep.mubr.msk.bf16.mxu0 %vm5814_vm1, %v5812_v10 }
0x1f39   :  { %v2615_v30 = vpop.f32.mrb[76].mxu0 }
0x1f3a   :  { %v2617_v18 = vpop.f32.mrb[77].mxu0 }
0x1f3b   :  { %v2619_v6 = vpop.f32.mrb[78].mxu0 }
0x1f3c   :  { %v6572_v20 = vpack.c.bf16 %v2619_v6, %v2615_v30  ;;  %v2621_v32 = vpop.f32.mrb[79].mxu0  ;;  %v6624_v30 = vld [vmem:[%s7011_s8 + $0x50] sm:$0xff]  }
0x1f3d   :  { %v6574_v21 = vpack.c.bf16 %v2621_v32, %v2617_v18  ;;  %v6630_v18 = vld [vmem:[%s7011_s8 + $0x58] sm:$0xff]  }
0x1f3e   :  { %v2699_v7 = vsel %vm295_vm3, %v6572_v20, 0 }
0x1f3f   :  { %5330 = vmatpush3.bf16.xpose.msra.mxu1 %v2699_v7  ;;  %v2758_v9 = vsel %vm522_vm5, %v6574_v21, 0 }
0x1f40   :  { %5336 = vmatpush3.bf16.msra.mxu0 %v2758_v9  ;;  %5341 = vmatprep.subr.bf16.mxu1 %v5812_v10  ;;  %v6638_v9 = vld [vmem:[%s7011_s8 + $0x40] sm:$0xff]  }
0x1f41   :  { %5347 = vmatprep.subr.bf16.mxu0 %v5812_v10 }
0x1f46   :  { %5332 = vmatmul.mubr.msk.bf16.vlgmr.msra.gmra.mrb[80].mxu1 %vm295_vm3, %v6518_v11 }
0x1f47   :  { %5342 = vmatpush3.bf16.xpose.msra.mxu1 %v6558_v48  ;;  %5343 = vmatprep.mubr.msk.bf16.mxu1 %vm5814_vm1, %v5812_v10 }
0x1f48   :  { %5353 = vmatprep.subr.bf16.mxu1 %v5812_v10 }
0x1fab   :  { %v2689_v12 = vpop.f32.mrb[80].mxu0 }
0x1fac   :  { %v5327_v13 = vpop.f32.mrb[81].mxu0 }
0x1fad   :  { %v2692_v14 = vpop.f32.mrb[82].mxu0  ;;  %v6645_v13 = vld [vmem:[%s7011_s8 + $0x48] sm:$0xff]  }
0x1fae   :  { %v5328_v15 = vpop.f32.mrb[83].mxu0 }
0x2019   :  { %v2735_v34 = vpop.f32.mrb[80].mxu1 }
0x201a   :  { %v2736_v16 = vadd.f32 %v2735_v34, %v2689_v12  ;;  %v5333_v22 = vpop.f32.mrb[81].mxu1 }
0x201b   :  { %v2738_v23 = vpop.f32.mrb[82].mxu1 }
0x201c   :  { %v5334_v24 = vpop.f32.mrb[83].mxu1  ;;  %v2741_v25 = vadd.f32 %v2736_v16, %v6064_v52 }
0x201e   :  { %v2742_v28 = vsel %vm506_vm6, %v2741_v25, -inf }
0x201f   :  { %2743 = vmax.xlane.f32.xlu1 %v2742_v28 }
0x2030   :  { %2851 = vrot.lane.b32.xlu1 %v6572_v20, %s5817_s16 }
0x2034   :  { %2848 = vrot.lane.b32.xlu1 %v6518_v11, %s5817_s16 }
0x20ac   :  { %v2744_v26 = vpop.xlane.xlu1 %2743 }
0x20ad   :  { %v2745_v27 = vsub.f32 %v2741_v25, %v2744_v26 }
0x20af   :  { %v2746_v29 = vmul.f32 1.442695, %v2745_v27 }
0x20b0   :  { %v2852_v35 = vpop.permute.xlu1 %2851 }
0x20b1   :  { %5736 = vpow2.f32 %v2746_v29  ;;  %v2857_v53 = vsel %vm295_vm3, %v2852_v35, 0 }
0x20b4   :  { %v2849_v54 = vpop.permute.xlu1 %2848 }
0x20bb   :  { %v5737_v39 = vpop.eup %5736 }
0x20bc   :  { %v2748_v40 = vsel %vm506_vm6, %v5737_v39, 0.0 }
0x20bd   :  { %2749 = vadd.xlane.f32.xlu0 %v2748_v40 }
0x20d3   :  { %2802 = vrot.lane.b32.xlu0 %v6566_v4, %s5815_s27 }
0x214a   :  { %v2750_v44 = vpop.xlane.xlu0 %2749 }
0x214b   :  { %5738 = vrcp.f32 %v2750_v44 }
0x214e   :  { %v2803_v45 = vpop.permute.xlu0 %2802 }
0x214f   :  { %5344 = vmatmul.mubr.msk.bf16.vlgmr.msra.gmra.mrb[84].mxu1 %vm412_vm4, %v2803_v45 }
0x2150   :  { %5355 = vmatprep.mubr.msk.bf16.mxu1 %vm5814_vm1, %v5812_v10 }
0x2155   :  { %v5739_v46 = vpop.eup %5738 }
0x2156   :  { %v2752_v36 = vmul.f32 %v5739_v46, %v5737_v39 }
0x2158   :  { %v2753_v38 = vpack.c.bf16 %v2752_v36, %v2752_v36 }
0x215a   :  { %5338 = vmatmul.mubr.msk.bf16.vlgmr.msra.gmra.mrb[84].mxu0 %vm506_vm6, %v2753_v38 }
0x215b   :  { %5348 = vmatpush3.bf16.xpose.msra.mxu0 %v2857_v53  ;;  %5349 = vmatprep.mubr.msk.bf16.mxu0 %vm5814_vm1, %v5812_v10 }
0x215c   :  { %5359 = vmatprep.subr.bf16.mxu0 %v5812_v10 }
0x2162   :  { %5350 = vmatmul.mubr.msk.bf16.vlgmr.msra.gmra.mrb[88].mxu0 %vm295_vm3, %v2849_v54 }
0x2163   :  { %5363 = vmatprep.mubr.msk.bf16.mxu0 %vm5814_vm1, %v5812_v10  ;;  %5360 = vmatpush3.bf16.msra.mxu0 %v6624_v30 }
0x2164   :  { %5361 = vmatprep.subr.bf16.mxu0 %v5812_v10 }
0x2167   :  { %5362 = vmatpush3.bf16.msra.mxu0 %v6630_v18 }
0x2168   :  { %5375 = vmatprep.subr.bf16.mxu0 %v5812_v10 }
0x2222   :  { %v2841_v55 = vpop.f32.mrb[84].mxu1 }
0x2223   :  { %v5345_v8 = vpop.f32.mrb[85].mxu1 }
0x2224   :  { %v2844_v47 = vpop.f32.mrb[86].mxu1 }
0x2225   :  { %v5346_v43 = vpop.f32.mrb[87].mxu1 }
0x222d   :  { %v2794_v56 = vpop.f32.mrb[84].mxu0 }
0x222e   :  { %v5339_v57 = vpop.f32.mrb[85].mxu0  ;;  %v2800_v14 = vpack.c.bf16 %v2794_v56, %v2794_v56 }
0x222f   :  { %v2797_v58 = vpop.f32.mrb[86].mxu0 }
0x2230   :  { %v5340_v59 = vpop.f32.mrb[87].mxu0 }
0x2235   :  { %v2893_v50 = vpop.f32.mrb[88].mxu0 }
0x2236   :  { %v2894_v33 = vadd.f32 %v2893_v50, %v2841_v55  ;;  %v5351_v5 = vpop.f32.mrb[89].mxu0 }
0x2237   :  { %v2896_v19 = vpop.f32.mrb[90].mxu0 }
0x2238   :  { %v5352_v60 = vpop.f32.mrb[91].mxu0  ;;  %v2899_v61 = vadd.f32 %v2894_v33, %v6064_v52 }
0x223a   :  { %v2900_v63 = vsel %vm506_vm6, %v2899_v61, -inf }
0x223b   :  { %2901 = vmax.xlane.f32.xlu1 %v2900_v63 }
0x224c   :  { %2913 = vrot.lane.b32.xlu1 %v6574_v21, %s5817_s16 }
0x2250   :  { %3072 = vrot.lane.b32.xlu1 %v6566_v4, %s5817_s16 }
0x2254   :  { %3117 = vrot.lane.b32.xlu1 %v6518_v11, %s5816_s28 }
0x22c8   :  { %v2902_v51 = vpop.xlane.xlu1 %2901 }
0x22c9   :  { %v2903_v41 = vsub.f32 %v2899_v61, %v2902_v51  ;;  %v6686_v51 = vld [vmem:[%s7011_s8 + $0x60] sm:$0xff]  }
0x22cb   :  { %v2904_v1 = vmul.f32 1.442695, %v2903_v41  ;;  %v6692_v41 = vld [vmem:[%s7011_s8 + $0x68] sm:$0xff]  }
0x22cc   :  { %v2914_v2 = vpop.permute.xlu1 %2913 }
0x22cd   :  { %5740 = vpow2.f32 %v2904_v1  ;;  %v2919_v62 = vsel %vm522_vm5, %v2914_v2, 0 }
0x22ce   :  { %5354 = vmatpush3.bf16.msra.mxu1 %v2919_v62 }
0x22cf   :  { %5367 = vmatprep.subr.bf16.mxu1 %v5812_v10 }
0x22d0   :  { %v3073_v16 = vpop.permute.xlu1 %3072 }
0x22d4   :  { %v3118_v22 = vpop.permute.xlu1 %3117 }
0x22d7   :  { %v5741_v3 = vpop.eup %5740 }
0x22d8   :  { %v2906_v31 = vsel %vm506_vm6, %v5741_v3, 0.0 }
0x22d9   :  { %2907 = vadd.xlane.f32.xlu0 %v2906_v31 }
0x22ef   :  { %3119 = vrot.lane.b32.xlu0 %v6572_v20, %s5816_s28 }
0x2366   :  { %v2908_v6 = vpop.xlane.xlu0 %2907 }
0x2367   :  { %5742 = vrcp.f32 %v2908_v6 }
0x236a   :  { %v3120_v15 = vpop.permute.xlu0 %3119 }
0x236b   :  { %v3125_v34 = vsel %vm295_vm3, %v3120_v15, 0 }
0x2371   :  { %v5743_v32 = vpop.eup %5742 }
0x2372   :  { %v2910_v7 = vmul.f32 %v5743_v32, %v5741_v3 }
0x2374   :  { %v2911_v12 = vpack.c.bf16 %v2910_v7, %v2910_v7 }
0x2376   :  { %5356 = vmatmul.mubr.msk.bf16.vlgmr.msra.gmra.mrb[88].mxu1 %vm506_vm6, %v2911_v12 }
0x2377   :  { %5368 = vmatpush3.bf16.msra.mxu1 %v6638_v9  ;;  %5371 = vmatprep.mubr.msk.bf16.mxu1 %vm5814_vm1, %v5812_v10 }
0x2378   :  { %5369 = vmatprep.subr.bf16.mxu1 %v5812_v10 }
0x237b   :  { %5370 = vmatpush3.bf16.msra.mxu1 %v6645_v13 }
0x237c   :  { %5381 = vmatprep.subr.bf16.mxu1 %v5812_v10 }
0x237e   :  { %5372 = vmatmul.mubr.msk.bf16.vlgmr.msra.gmra.mrb[92].mxu1 %vm295_vm3, %v2800_v14 }
0x237f   :  { %5383 = vmatprep.mubr.msk.bf16.mxu1 %vm5814_vm1, %v5812_v10 }
0x2384   :  { %5382 = vmatpush3.bf16.xpose.msra.mxu1 %v3125_v34 }
0x2385   :  { %5393 = vmatprep.subr.bf16.mxu1 %v5812_v10 }
0x238b   :  { %5384 = vmatmul.mubr.msk.bf16.vlgmr.msra.gmra.mrb[96].mxu1 %vm295_vm3, %v3118_v22 }
0x238c   :  { %5397 = vmatprep.mubr.msk.bf16.mxu1 %vm5814_vm1, %v5812_v10  ;;  %5394 = vmatpush3.bf16.msra.mxu1 %v6686_v51 }
0x238d   :  { %5395 = vmatprep.subr.bf16.mxu1 %v5812_v10 }
0x2390   :  { %5396 = vmatpush3.bf16.msra.mxu1 %v6692_v41 }
0x2391   :  { %5407 = vmatprep.subr.bf16.mxu1 %v5812_v10 }
0x2449   :  { %v2955_v23 = vpop.f32.mrb[88].mxu1 }
0x244a   :  { %v2961_v24 = vpack.c.bf16 %v2955_v23, %v2955_v23  ;;  %v5357_v25 = vpop.f32.mrb[89].mxu1 }
0x244b   :  { %v2958_v28 = vpop.f32.mrb[90].mxu1 }
0x244c   :  { %v5358_v26 = vpop.f32.mrb[91].mxu1  ;;  %5364 = vmatmul.mubr.msk.bf16.vlgmr.msra.gmra.mrb[92].mxu0 %vm295_vm3, %v2961_v24 }
0x244d   :  { %5376 = vmatpush3.bf16.xpose.msra.mxu0 %v6558_v48  ;;  %5377 = vmatprep.mubr.msk.bf16.mxu0 %vm5814_vm1, %v5812_v10 }
0x244e   :  { %5387 = vmatprep.subr.bf16.mxu0 %v5812_v10 }
0x2451   :  { %v3066_v27 = vpop.f32.mrb[92].mxu1 }
0x2452   :  { %v5373_v29 = vpop.f32.mrb[93].mxu1 }
0x2453   :  { %v3069_v39 = vpop.f32.mrb[94].mxu1 }
0x2454   :  { %v5374_v40 = vpop.f32.mrb[95].mxu1  ;;  %5378 = vmatmul.mubr.msk.bf16.vlgmr.msra.gmra.mrb[96].mxu0 %vm412_vm4, %v3073_v16 }
0x2455   :  { %5389 = vmatprep.mubr.msk.bf16.mxu0 %vm5814_vm1, %v5812_v10 }
0x245e   :  { %v3161_v44 = vpop.f32.mrb[96].mxu1 }
0x245f   :  { %v5385_v45 = vpop.f32.mrb[97].mxu1 }
0x2460   :  { %v3164_v46 = vpop.f32.mrb[98].mxu1 }
0x2461   :  { %v5386_v36 = vpop.f32.mrb[99].mxu1 }
0x251f   :  { %v3011_v35 = vpop.f32.mrb[92].mxu0 }
0x2520   :  { %v6668_v38 = vadd.f32 %v3066_v27, %v3011_v35  ;;  %v5365_v53 = vpop.f32.mrb[93].mxu0 }
0x2521   :  { %v3014_v54 = vpop.f32.mrb[94].mxu0 }
0x2522   :  { %v5366_v55 = vpop.f32.mrb[95].mxu0 }
0x2527   :  { %v3111_v8 = vpop.f32.mrb[96].mxu0 }
0x2528   :  { %v3162_v47 = vadd.f32 %v3161_v44, %v3111_v8  ;;  %v5379_v43 = vpop.f32.mrb[97].mxu0 }
0x2529   :  { %v3114_v56 = vpop.f32.mrb[98].mxu0 }
0x252a   :  { %v5380_v57 = vpop.f32.mrb[99].mxu0  ;;  %v3167_v58 = vadd.f32 %v3162_v47, %v6064_v52  ;;  %v3499_v56 = vrot.slane %v6544_v42, 4 }
0x252b   :  { %v6728_v57 = vld [vmem:[%s7011_s8 + $0x70] sm:$0xff]  }
0x252c   :  { %v3168_v59 = vsel %vm506_vm6, %v3167_v58, -inf }
0x252d   :  { %3169 = vmax.xlane.f32.xlu1 %v3168_v59 }
0x253e   :  { %3180 = vrot.lane.b32.xlu1 %v6574_v21, %s5816_s28 }
0x2542   :  { %3285 = vrot.lane.b32.xlu1 %v6566_v4, %s5819_s22 }
0x2546   :  { %3330 = vrot.lane.b32.xlu1 %v6518_v11, %s5818_s21 }
0x25ba   :  { %v3170_v50 = vpop.xlane.xlu1 %3169 }
0x25bb   :  { %v3171_v33 = vsub.f32 %v3167_v58, %v3170_v50  ;;  %v6734_v58 = vld [vmem:[%s7011_s8 + $0x78] sm:$0xff]  }
0x25bd   :  { %v3172_v5 = vmul.f32 1.442695, %v3171_v33 }
0x25be   :  { %v3181_v19 = vpop.permute.xlu1 %3180 }
0x25bf   :  { %5744 = vpow2.f32 %v3172_v5  ;;  %v3186_v60 = vsel %vm522_vm5, %v3181_v19, 0 }
0x25c0   :  { %5388 = vmatpush3.bf16.msra.mxu0 %v3186_v60  ;;  %v6748_v60 = vrot.slane %v6574_v21, 4 }
0x25c1   :  { %5401 = vmatprep.subr.bf16.mxu0 %v5812_v10 }
0x25c2   :  { %v3286_v31 = vpop.permute.xlu1 %3285 }
0x25c6   :  { %v3331_v22 = vpop.permute.xlu1 %3330 }
0x25c9   :  { %v5745_v61 = vpop.eup %5744 }
0x25ca   :  { %v3174_v63 = vsel %vm506_vm6, %v5745_v61, 0.0 }
0x25cb   :  { %3175 = vadd.xlane.f32.xlu0 %v3174_v63  ;;  %v3614_v63 = vsel %vm522_vm5, %v6748_v60, 0 }
0x25e1   :  { %3332 = vrot.lane.b32.xlu0 %v6572_v20, %s5818_s21 }
0x2658   :  { %v3176_v1 = vpop.xlane.xlu0 %3175 }
0x2659   :  { %5746 = vrcp.f32 %v3176_v1  ;;  %v6761_v1 = vrot.slane %v6572_v20, 4  ;;  %v6770_v20 = vrot.slane %v6518_v11, 4 }
0x265c   :  { %v3333_v6 = vpop.permute.xlu0 %3332 }
0x265d   :  { %v3338_v15 = vsel %vm295_vm3, %v3333_v6, 0 }
0x2663   :  { %v5747_v2 = vpop.eup %5746 }
0x2664   :  { %v3178_v62 = vmul.f32 %v5747_v2, %v5745_v61  ;;  %v6751_v61 = vrot.slane %v6566_v4, 4 }
0x2666   :  { %v3179_v3 = vpack.c.bf16 %v3178_v62, %v3178_v62 }
0x2668   :  { %5390 = vmatmul.mubr.msk.bf16.vlgmr.msra.gmra.mrb[100].mxu0 %vm506_vm6, %v3179_v3 }
0x2669   :  { %5402 = vmatpush3.bf16.xpose.msra.mxu0 %v6558_v48  ;;  %5403 = vmatprep.mubr.msk.bf16.mxu0 %vm5814_vm1, %v5812_v10 }
0x266a   :  { %5413 = vmatprep.subr.bf16.mxu0 %v5812_v10 }
0x2670   :  { %5404 = vmatmul.mubr.msk.bf16.vlgmr.msra.gmra.mrb[104].mxu0 %vm412_vm4, %v3286_v31  ;;  %v3554_v31 = vsel %vm295_vm3, %v6761_v1, 0 }
0x2671   :  { %5415 = vmatprep.mubr.msk.bf16.mxu0 %vm5814_vm1, %v5812_v10 }
0x273b   :  { %v3222_v32 = vpop.f32.mrb[100].mxu0 }
0x273c   :  { %v3228_v7 = vpack.c.bf16 %v3222_v32, %v3222_v32  ;;  %v5391_v12 = vpop.f32.mrb[101].mxu0 }
0x273d   :  { %v3225_v14 = vpop.f32.mrb[102].mxu0 }
0x273e   :  { %v5392_v34 = vpop.f32.mrb[103].mxu0  ;;  %5398 = vmatmul.mubr.msk.bf16.vlgmr.msra.gmra.mrb[100].mxu1 %vm295_vm3, %v3228_v7 }
0x273f   :  { %5408 = vmatpush3.bf16.xpose.msra.mxu1 %v3338_v15  ;;  %5409 = vmatprep.mubr.msk.bf16.mxu1 %vm5814_vm1, %v5812_v10 }
0x2740   :  { %5419 = vmatprep.subr.bf16.mxu1 %v5812_v10 }
0x2743   :  { %v3324_v48 = vpop.f32.mrb[104].mxu0 }
0x2744   :  { %v5405_v16 = vpop.f32.mrb[105].mxu0 }
0x2745   :  { %v3327_v23 = vpop.f32.mrb[106].mxu0 }
0x2746   :  { %v5406_v24 = vpop.f32.mrb[107].mxu0  ;;  %5410 = vmatmul.mubr.msk.bf16.vlgmr.msra.gmra.mrb[104].mxu1 %vm295_vm3, %v3331_v22 }
0x2747   :  { %5423 = vmatprep.mubr.msk.bf16.mxu1 %vm5814_vm1, %v5812_v10  ;;  %5420 = vmatpush3.bf16.msra.mxu1 %v6728_v57 }
0x2748   :  { %5421 = vmatprep.subr.bf16.mxu1 %v5812_v10 }
0x274b   :  { %5422 = vmatpush3.bf16.msra.mxu1 %v6734_v58 }
0x274c   :  { %5433 = vmatprep.subr.bf16.mxu1 %v5812_v10 }
0x2811   :  { %v3278_v25 = vpop.f32.mrb[100].mxu1 }
0x2812   :  { %v6714_v28 = vadd.f32 %v3278_v25, %v6668_v38  ;;  %v5399_v26 = vpop.f32.mrb[101].mxu1 }
0x2813   :  { %v3281_v27 = vpop.f32.mrb[102].mxu1 }
0x2814   :  { %v5400_v29 = vpop.f32.mrb[103].mxu1 }
0x2819   :  { %v3374_v39 = vpop.f32.mrb[104].mxu1 }
0x281a   :  { %v3375_v40 = vadd.f32 %v3374_v39, %v3324_v48  ;;  %v5411_v44 = vpop.f32.mrb[105].mxu1 }
0x281b   :  { %v3377_v45 = vpop.f32.mrb[106].mxu1 }
0x281c   :  { %v5412_v46 = vpop.f32.mrb[107].mxu1  ;;  %v3380_v36 = vadd.f32 %v3375_v40, %v6064_v52 }
0x281e   :  { %v3381_v35 = vsel %vm506_vm6, %v3380_v36, -inf }
0x281f   :  { %3382 = vmax.xlane.f32.xlu0 %v3381_v35 }
0x2835   :  { %3393 = vrot.lane.b32.xlu0 %v6574_v21, %s5818_s21 }
0x28ac   :  { %v3383_v53 = vpop.xlane.xlu0 %3382 }
0x28ad   :  { %v3384_v54 = vsub.f32 %v3380_v36, %v3383_v53 }
0x28af   :  { %v3385_v38 = vmul.f32 1.442695, %v3384_v54 }
0x28b0   :  { %v3394_v55 = vpop.permute.xlu0 %3393 }
0x28b1   :  { %5748 = vpow2.f32 %v3385_v38  ;;  %v3399_v8 = vsel %vm522_vm5, %v3394_v55, 0 }
0x28b2   :  { %5414 = vmatpush3.bf16.msra.mxu0 %v3399_v8 }
0x28b3   :  { %5427 = vmatprep.subr.bf16.mxu0 %v5812_v10 }
0x28bb   :  { %v5749_v47 = vpop.eup %5748 }
0x28bc   :  { %v3387_v43 = vsel %vm506_vm6, %v5749_v47, 0.0 }
0x28bd   :  { %3388 = vadd.xlane.f32.xlu1 %v3387_v43 }
0x28ce   :  { %3500 = vrot.lane.b32.xlu1 %v3499_v56, %s5817_s16 }
0x294a   :  { %v3389_v42 = vpop.xlane.xlu1 %3388 }
0x294b   :  { %5750 = vrcp.f32 %v3389_v42 }
0x294e   :  { %v3501_v33 = vpop.permute.xlu1 %3500 }
0x294f   :  { %v6740_v19 = vsel %vm412_vm4, %v3501_v33, 0 }
0x2955   :  { %v5751_v59 = vpop.eup %5750 }
0x2956   :  { %v3391_v50 = vmul.f32 %v5751_v59, %v5749_v47 }
0x2958   :  { %v3392_v5 = vpack.c.bf16 %v3391_v50, %v3391_v50 }
0x295a   :  { %5416 = vmatmul.mubr.msk.bf16.vlgmr.msra.gmra.mrb[108].mxu0 %vm506_vm6, %v3392_v5 }
0x295b   :  { %5428 = vmatpush3.bf16.xpose.msra.mxu0 %v6740_v19  ;;  %5429 = vmatprep.mubr.msk.bf16.mxu0 %vm5814_vm1, %v5812_v10 }
0x295c   :  { %5439 = vmatprep.subr.bf16.mxu0 %v5812_v10 }
0x2962   :  { %5430 = vmatmul.mubr.msk.bf16.vlgmr.msra.gmra.mrb[112].mxu0 %vm412_vm4, %v6751_v61 }
0x2963   :  { %5440 = vmatpush3.bf16.msra.mxu0 %v3614_v63  ;;  %5441 = vmatprep.mubr.msk.bf16.mxu0 %vm5814_vm1, %v5812_v10 }
0x2964   :  { %5451 = vmatprep.subr.bf16.mxu0 %v5812_v10 }
0x2a2d   :  { %v3435_v21 = vpop.f32.mrb[108].mxu0 }
0x2a2e   :  { %v3441_v2 = vpack.c.bf16 %v3435_v21, %v3435_v21  ;;  %v5417_v62 = vpop.f32.mrb[109].mxu0 }
0x2a2f   :  { %v3438_v4 = vpop.f32.mrb[110].mxu0 }
0x2a30   :  { %v5418_v3 = vpop.f32.mrb[111].mxu0  ;;  %5424 = vmatmul.mubr.msk.bf16.vlgmr.msra.gmra.mrb[108].mxu1 %vm295_vm3, %v3441_v2 }
0x2a31   :  { %5434 = vmatpush3.bf16.xpose.msra.mxu1 %v3554_v31  ;;  %5435 = vmatprep.mubr.msk.bf16.mxu1 %vm5814_vm1, %v5812_v10 }
0x2a32   :  { %5445 = vmatprep.subr.bf16.mxu1 %v5812_v10 }
0x2a35   :  { %v3542_v6 = vpop.f32.mrb[112].mxu0 }
0x2a36   :  { %v5431_v32 = vpop.f32.mrb[113].mxu0 }
0x2a37   :  { %v3545_v7 = vpop.f32.mrb[114].mxu0 }
0x2a38   :  { %v5432_v12 = vpop.f32.mrb[115].mxu0  ;;  %5436 = vmatmul.mubr.msk.bf16.vlgmr.msra.gmra.mrb[112].mxu1 %vm295_vm3, %v6770_v20 }
0x2a39   :  { %5446 = vmatpush3.bf16.xpose.msra.mxu1 %v6740_v19  ;;  %5447 = vmatprep.mubr.msk.bf16.mxu1 %vm5814_vm1, %v5812_v10 }
0x2a3a   :  { %5457 = vmatprep.subr.bf16.mxu1 %v5812_v10 }
0x2b03   :  { %v3491_v14 = vpop.f32.mrb[108].mxu1 }
0x2b04   :  { %v6779_v15 = vadd.f32 %v3491_v14, %v6714_v28  ;;  %v5425_v34 = vpop.f32.mrb[109].mxu1 }
0x2b05   :  { %v3494_v48 = vpop.f32.mrb[110].mxu1 }
0x2b06   :  { %v5426_v11 = vpop.f32.mrb[111].mxu1 }
0x2b0b   :  { %v3590_v16 = vpop.f32.mrb[112].mxu1 }
0x2b0c   :  { %v3591_v22 = vadd.f32 %v3590_v16, %v3542_v6  ;;  %v5437_v23 = vpop.f32.mrb[113].mxu1 }
0x2b0d   :  { %v3593_v24 = vpop.f32.mrb[114].mxu1 }
0x2b0e   :  { %v5438_v25 = vpop.f32.mrb[115].mxu1  ;;  %v3596_v26 = vadd.f32 %v3591_v22, %v6064_v52 }
0x2b10   :  { %v3597_v27 = vsel %vm506_vm6, %v3596_v26, -inf }
0x2b11   :  { %3598 = vmax.xlane.f32.xlu0 %v3597_v27 }
0x2b27   :  { %3704 = vrot.lane.b32.xlu0 %v6761_v1, %s5817_s16 }
0x2b2b   :  { %3702 = vrot.lane.b32.xlu0 %v6770_v20, %s5817_s16 }
0x2b9e   :  { %v3599_v28 = vpop.xlane.xlu0 %3598 }
0x2b9f   :  { %v3600_v29 = vsub.f32 %v3596_v26, %v3599_v28 }
0x2ba1   :  { %v3601_v39 = vmul.f32 1.442695, %v3600_v29 }
0x2ba2   :  { %v3705_v53 = vpop.permute.xlu0 %3704 }
0x2ba3   :  { %5752 = vpow2.f32 %v3601_v39  ;;  %v3710_v38 = vsel %vm295_vm3, %v3705_v53, 0 }
0x2ba6   :  { %v3703_v55 = vpop.permute.xlu0 %3702 }
0x2bad   :  { %v5753_v40 = vpop.eup %5752 }
0x2bae   :  { %v3603_v44 = vsel %vm506_vm6, %v5753_v40, 0.0 }
0x2baf   :  { %3604 = vadd.xlane.f32.xlu1 %v3603_v44 }
0x2bc0   :  { %3657 = vrot.lane.b32.xlu1 %v6751_v61, %s5815_s27 }
0x2c3c   :  { %v3605_v45 = vpop.xlane.xlu1 %3604 }
0x2c3d   :  { %5754 = vrcp.f32 %v3605_v45 }
0x2c40   :  { %v3658_v46 = vpop.permute.xlu1 %3657 }
0x2c41   :  { %5448 = vmatmul.mubr.msk.bf16.vlgmr.msra.gmra.mrb[116].mxu1 %vm412_vm4, %v3658_v46 }
0x2c42   :  { %5459 = vmatprep.mubr.msk.bf16.mxu1 %vm5814_vm1, %v5812_v10 }
0x2c47   :  { %v5755_v36 = vpop.eup %5754 }
0x2c48   :  { %v3607_v35 = vmul.f32 %v5755_v36, %v5753_v40 }
0x2c4a   :  { %v3608_v54 = vpack.c.bf16 %v3607_v35, %v3607_v35 }
0x2c4c   :  { %5442 = vmatmul.mubr.msk.bf16.vlgmr.msra.gmra.mrb[116].mxu0 %vm506_vm6, %v3608_v54 }
0x2c4d   :  { %5452 = vmatpush3.bf16.xpose.msra.mxu0 %v3710_v38  ;;  %5453 = vmatprep.mubr.msk.bf16.mxu0 %vm5814_vm1, %v5812_v10 }
0x2c4e   :  { %5463 = vmatprep.subr.bf16.mxu0 %v5812_v10 }
0x2c54   :  { %5454 = vmatmul.mubr.msk.bf16.vlgmr.msra.gmra.mrb[120].mxu0 %vm295_vm3, %v3703_v55 }
0x2c55   :  { %5464 = vmatpush3.bf16.msra.mxu0 %v6624_v30  ;;  %5467 = vmatprep.mubr.msk.bf16.mxu0 %vm5814_vm1, %v5812_v10 }
0x2c56   :  { %5465 = vmatprep.subr.bf16.mxu0 %v5812_v10 }
0x2c59   :  { %5466 = vmatpush3.bf16.msra.mxu0 %v6630_v18 }
0x2c5a   :  { %5479 = vmatprep.subr.bf16.mxu0 %v5812_v10 }
0x2d14   :  { %v3696_v8 = vpop.f32.mrb[116].mxu1 }
0x2d15   :  { %v5449_v47 = vpop.f32.mrb[117].mxu1 }
0x2d16   :  { %v3699_v43 = vpop.f32.mrb[118].mxu1 }
0x2d17   :  { %v5450_v56 = vpop.f32.mrb[119].mxu1 }
0x2d1f   :  { %v3650_v42 = vpop.f32.mrb[116].mxu0 }
0x2d20   :  { %v5443_v59 = vpop.f32.mrb[117].mxu0  ;;  %v3656_v16 = vpack.c.bf16 %v3650_v42, %v3650_v42 }
0x2d21   :  { %v3653_v50 = vpop.f32.mrb[118].mxu0 }
0x2d22   :  { %v5444_v33 = vpop.f32.mrb[119].mxu0 }
0x2d27   :  { %v3746_v5 = vpop.f32.mrb[120].mxu0 }
0x2d28   :  { %v3747_v63 = vadd.f32 %v3746_v5, %v3696_v8  ;;  %v5455_v30 = vpop.f32.mrb[121].mxu0 }
0x2d29   :  { %v3749_v21 = vpop.f32.mrb[122].mxu0 }
0x2d2a   :  { %v3752_v2 = vadd.f32 %v3747_v63, %v6064_v52  ;;  %v5456_v62 = vpop.f32.mrb[123].mxu0 }
0x2d2c   :  { %v3753_v4 = vsel %vm506_vm6, %v3752_v2, -inf }
0x2d2d   :  { %3754 = vmax.xlane.f32.xlu1 %v3753_v4 }
0x2d3e   :  { %3947 = vrot.lane.b32.xlu1 %v6761_v1, %s5816_s28 }
0x2d42   :  { %3900 = vrot.lane.b32.xlu1 %v6751_v61, %s5817_s16 }
0x2dba   :  { %v3755_v18 = vpop.xlane.xlu1 %3754 }
0x2dbb   :  { %v3756_v3 = vsub.f32 %v3752_v2, %v3755_v18 }
0x2dbd   :  { %v3757_v31 = vmul.f32 1.442695, %v3756_v3 }
0x2dbe   :  { %v3948_v22 = vpop.permute.xlu1 %3947 }
0x2dbf   :  { %5756 = vpow2.f32 %v3757_v31  ;;  %v3953_v23 = vsel %vm295_vm3, %v3948_v22, 0 }
0x2dc2   :  { %v3901_v29 = vpop.permute.xlu1 %3900 }
0x2dc9   :  { %v5757_v6 = vpop.eup %5756 }
0x2dca   :  { %v3759_v32 = vsel %vm506_vm6, %v5757_v6, 0.0 }
0x2dcb   :  { %3760 = vadd.xlane.f32.xlu0 %v3759_v32 }
0x2de1   :  { %3765 = vrot.lane.b32.xlu0 %v6748_v60, %s5817_s16 }
0x2de5   :  { %3945 = vrot.lane.b32.xlu0 %v6770_v20, %s5816_s28 }
0x2e58   :  { %v3761_v7 = vpop.xlane.xlu0 %3760 }
0x2e59   :  { %5758 = vrcp.f32 %v3761_v7 }
0x2e5c   :  { %v3766_v12 = vpop.permute.xlu0 %3765 }
0x2e5d   :  { %v3771_v14 = vsel %vm522_vm5, %v3766_v12, 0 }
0x2e5e   :  { %5458 = vmatpush3.bf16.msra.mxu1 %v3771_v14 }
0x2e5f   :  { %5471 = vmatprep.subr.bf16.mxu1 %v5812_v10 }
0x2e63   :  { %v5759_v34 = vpop.eup %5758 }
0x2e64   :  { %v3763_v48 = vmul.f32 %v5759_v34, %v5757_v6 }
0x2e66   :  { %v3764_v11 = vpack.c.bf16 %v3763_v48, %v3763_v48 }
0x2e68   :  { %5460 = vmatmul.mubr.msk.bf16.vlgmr.msra.gmra.mrb[120].mxu1 %vm506_vm6, %v3764_v11 }
0x2e69   :  { %5472 = vmatpush3.bf16.msra.mxu1 %v6638_v9  ;;  %5475 = vmatprep.mubr.msk.bf16.mxu1 %vm5814_vm1, %v5812_v10  ;;  %v3946_v9 = vpop.permute.xlu0 %3945 }
0x2e6a   :  { %5473 = vmatprep.subr.bf16.mxu1 %v5812_v10 }
0x2e6d   :  { %5474 = vmatpush3.bf16.msra.mxu1 %v6645_v13 }
0x2e6e   :  { %5485 = vmatprep.subr.bf16.mxu1 %v5812_v10 }
0x2e70   :  { %5476 = vmatmul.mubr.msk.bf16.vlgmr.msra.gmra.mrb[124].mxu1 %vm295_vm3, %v3656_v16 }
0x2e71   :  { %5487 = vmatprep.mubr.msk.bf16.mxu1 %vm5814_vm1, %v5812_v10 }
0x2e76   :  { %5486 = vmatpush3.bf16.xpose.msra.mxu1 %v3953_v23 }
0x2e77   :  { %5497 = vmatprep.subr.bf16.mxu1 %v5812_v10 }
0x2e7d   :  { %5488 = vmatmul.mubr.msk.bf16.vlgmr.msra.gmra.mrb[128].mxu1 %vm295_vm3, %v3946_v9 }
0x2e7e   :  { %5498 = vmatpush3.bf16.msra.mxu1 %v6686_v51  ;;  %5501 = vmatprep.mubr.msk.bf16.mxu1 %vm5814_vm1, %v5812_v10 }
0x2e7f   :  { %5499 = vmatprep.subr.bf16.mxu1 %v5812_v10 }
0x2e82   :  { %5500 = vmatpush3.bf16.msra.mxu1 %v6692_v41 }
0x2e83   :  { %5511 = vmatprep.subr.bf16.mxu1 %v5812_v10 }
0x2f3b   :  { %v3807_v13 = vpop.f32.mrb[120].mxu1 }
0x2f3c   :  { %v3813_v24 = vpack.c.bf16 %v3807_v13, %v3807_v13  ;;  %v5461_v25 = vpop.f32.mrb[121].mxu1 }
0x2f3d   :  { %v3810_v26 = vpop.f32.mrb[122].mxu1  ;;  %v6880_v25 = vadd.f32 %v6779_v15, %v6449_v37 }
0x2f3e   :  { %v5462_v27 = vpop.f32.mrb[123].mxu1  ;;  %5468 = vmatmul.mubr.msk.bf16.vlgmr.msra.gmra.mrb[124].mxu0 %vm295_vm3, %v3813_v24 }
0x2f3f   :  { %5480 = vmatpush3.bf16.xpose.msra.mxu0 %v6740_v19  ;;  %5481 = vmatprep.mubr.msk.bf16.mxu0 %vm5814_vm1, %v5812_v10 }
0x2f40   :  { %5491 = vmatprep.subr.bf16.mxu0 %v5812_v10 }
0x2f43   :  { %v3894_v51 = vpop.f32.mrb[124].mxu1 }
0x2f44   :  { %v5477_v28 = vpop.f32.mrb[125].mxu1 }
0x2f45   :  { %v3897_v41 = vpop.f32.mrb[126].mxu1 }
0x2f46   :  { %v5478_v39 = vpop.f32.mrb[127].mxu1  ;;  %5482 = vmatmul.mubr.msk.bf16.vlgmr.msra.gmra.mrb[128].mxu0 %vm412_vm4, %v3901_v29  ;;  %v4304_v29 = vmul.f32 %v6880_v25, %v6880_v25 }
0x2f47   :  { %5493 = vmatprep.mubr.msk.bf16.mxu0 %vm5814_vm1, %v5812_v10 }
0x2f48   :  { %v4306_v41 = vsel %vm64_vm0, %v4304_v29, 0.0 }
0x2f50   :  { %v3989_v40 = vpop.f32.mrb[128].mxu1 }
0x2f51   :  { %v5489_v44 = vpop.f32.mrb[129].mxu1 }
0x2f52   :  { %v3992_v45 = vpop.f32.mrb[130].mxu1 }
0x2f53   :  { %v5490_v46 = vpop.f32.mrb[131].mxu1 }
0x3011   :  { %v3851_v36 = vpop.f32.mrb[124].mxu0 }
0x3012   :  { %v3895_v35 = vadd.f32 %v3894_v51, %v3851_v36  ;;  %v5469_v53 = vpop.f32.mrb[125].mxu0 }
0x3013   :  { %v3854_v54 = vpop.f32.mrb[126].mxu0 }
0x3014   :  { %v5470_v38 = vpop.f32.mrb[127].mxu0 }
0x3019   :  { %v3939_v55 = vpop.f32.mrb[128].mxu0 }
0x301a   :  { %v3990_v8 = vadd.f32 %v3989_v40, %v3939_v55  ;;  %v5483_v47 = vpop.f32.mrb[129].mxu0 }
0x301b   :  { %v3942_v43 = vpop.f32.mrb[130].mxu0 }
0x301c   :  { %v3995_v56 = vadd.f32 %v3990_v8, %v6064_v52  ;;  %v5484_v42 = vpop.f32.mrb[131].mxu0 }
0x301e   :  { %v3996_v59 = vsel %vm506_vm6, %v3995_v56, -inf }
0x301f   :  { %3997 = vmax.xlane.f32.xlu1 %v3996_v59 }
0x3030   :  { %4148 = vrot.lane.b32.xlu1 %v6761_v1, %s5818_s21 }
0x3034   :  { %4101 = vrot.lane.b32.xlu1 %v6751_v61, %s5819_s22 }
0x30ac   :  { %v3998_v50 = vpop.xlane.xlu1 %3997 }
0x30ad   :  { %v3999_v33 = vsub.f32 %v3995_v56, %v3998_v50 }
0x30af   :  { %v4000_v5 = vmul.f32 1.442695, %v3999_v33 }
0x30b0   :  { %v4149_v18 = vpop.permute.xlu1 %4148 }
0x30b1   :  { %5760 = vpow2.f32 %v4000_v5  ;;  %v4154_v7 = vsel %vm295_vm3, %v4149_v18, 0  ;;  %v5654_v5 = vld [vmem:[%s7012_s9 + $0x44] ss:$8 sps:$4 sm:$0xff]  }
0x30bb   :  { %v5761_v63 = vpop.eup %5760 }
0x30bc   :  { %v4002_v30 = vsel %vm506_vm6, %v5761_v63, 0.0 }
0x30bd   :  { %4003 = vadd.xlane.f32.xlu0 %v4002_v30  ;;  %v5655_v30 = vld [vmem:[%s7012_s9 + $0x50] ss:$8 sps:$4 sm:$0xff]  }
0x30d3   :  { %4008 = vrot.lane.b32.xlu0 %v6748_v60, %s5816_s28 }
0x30d7   :  { %4146 = vrot.lane.b32.xlu0 %v6770_v20, %s5818_s21  ;;  %v4102_v20 = vpop.permute.xlu1 %4101 }
0x314a   :  { %v4004_v21 = vpop.xlane.xlu0 %4003 }
0x314b   :  { %5762 = vrcp.f32 %v4004_v21  ;;  %v5660_v21 = vld [vmem:[%s7012_s9 + $0x64] ss:$8 sps:$4 sm:$0xff]  }
0x314e   :  { %v4009_v1 = vpop.permute.xlu0 %4008 }
0x314f   :  { %v4014_v2 = vsel %vm522_vm5, %v4009_v1, 0  ;;  %v5658_v1 = vld [vmem:[%s7012_s9 + $0x60] ss:$8 sps:$4 sm:$0xff]  }
0x3150   :  { %5492 = vmatpush3.bf16.msra.mxu0 %v4014_v2  ;;  %v5661_v2 = vld [vmem:[%s7012_s9 + $0x70] ss:$8 sps:$4 sm:$0xff]  }
0x3151   :  { %5505 = vmatprep.subr.bf16.mxu0 %v5812_v10 }
0x3152   :  { %v4147_v34 = vpop.permute.xlu0 %4146 }
0x3155   :  { %v5763_v61 = vpop.eup %5762 }
0x3156   :  { %v4006_v62 = vmul.f32 %v5763_v61, %v5761_v63  ;;  %v5652_v63 = vld [vmem:[%s7012_s9 + $0x40] ss:$8 sps:$4 sm:$0xff]   ;;  %v5663_v61 = vld [vmem:[%s7012_s9 + $0x74] ss:$8 sps:$4 sm:$0xff]  }
0x3158   :  { %v4007_v4 = vpack.c.bf16 %v4006_v62, %v4006_v62 }
0x315a   :  { %5494 = vmatmul.mubr.msk.bf16.vlgmr.msra.gmra.mrb[132].mxu0 %vm506_vm6, %v4007_v4 }
0x315b   :  { %5506 = vmatpush3.bf16.xpose.msra.mxu0 %v6740_v19  ;;  %5507 = vmatprep.mubr.msk.bf16.mxu0 %vm5814_vm1, %v5812_v10 }
0x315c   :  { %5517 = vmatprep.subr.bf16.mxu0 %v5812_v10 }
0x3162   :  { %5508 = vmatmul.mubr.msk.bf16.vlgmr.msra.gmra.mrb[136].mxu0 %vm412_vm4, %v4102_v20 }
0x3163   :  { %5519 = vmatprep.mubr.msk.bf16.mxu0 %vm5814_vm1, %v5812_v10 }
0x322d   :  { %v4050_v3 = vpop.f32.mrb[132].mxu0 }
0x322e   :  { %v4056_v31 = vpack.c.bf16 %v4050_v3, %v4050_v3  ;;  %v5495_v6 = vpop.f32.mrb[133].mxu0 }
0x322f   :  { %v4053_v32 = vpop.f32.mrb[134].mxu0 }
0x3230   :  { %v5496_v12 = vpop.f32.mrb[135].mxu0  ;;  %5502 = vmatmul.mubr.msk.bf16.vlgmr.msra.gmra.mrb[132].mxu1 %vm295_vm3, %v4056_v31 }
0x3231   :  { %5512 = vmatpush3.bf16.xpose.msra.mxu1 %v4154_v7  ;;  %5513 = vmatprep.mubr.msk.bf16.mxu1 %vm5814_vm1, %v5812_v10  ;;  %v5787_v7 = vld [vmem:[%s7008_s5] sm:$0x3] }
0x3232   :  { %5523 = vmatprep.subr.bf16.mxu1 %v5812_v10  ;;  %v4323_v12 = vrot.slane %v5787_v7, %v6486_v0  ;;  %v5665_v0 = vld [vmem:[%s7013_s10 + $0x48] sm:$0xff]  }
0x3235   :  { %v4140_v19 = vpop.f32.mrb[136].mxu0 }
0x3236   :  { %v5509_v14 = vpop.f32.mrb[137].mxu0 }
0x3237   :  { %v4143_v48 = vpop.f32.mrb[138].mxu0 }
0x3238   :  { %v5510_v11 = vpop.f32.mrb[139].mxu0  ;;  %5514 = vmatmul.mubr.msk.bf16.vlgmr.msra.gmra.mrb[136].mxu1 %vm295_vm3, %v4147_v34 }
0x3239   :  { %5524 = vmatpush3.bf16.msra.mxu1 %v6728_v57  ;;  %5527 = vmatprep.mubr.msk.bf16.mxu1 %vm5814_vm1, %v5812_v10 }
0x323a   :  { %5525 = vmatprep.subr.bf16.mxu1 %v5812_v10 }
0x323d   :  { %5526 = vmatpush3.bf16.msra.mxu1 %v6734_v58 }
0x323e   :  { %5531 = vmatprep.subr.bf16.mxu1 %v5812_v10 }
0x3303   :  { %v4094_v16 = vpop.f32.mrb[132].mxu1 }
0x3304   :  { %v4100_v22 = vadd.f32 %v4094_v16, %v3895_v35  ;;  %v5503_v23 = vpop.f32.mrb[133].mxu1  ;;  %v5664_v16 = vld [vmem:[%s7013_s10 + $0x40] sm:$0xff]  }
0x3305   :  { %v4097_v9 = vpop.f32.mrb[134].mxu1  ;;  %v5667_v23 = vld [vmem:[%s7013_s10 + $0x58] sm:$0xff]  }
0x3306   :  { %v5504_v13 = vpop.f32.mrb[135].mxu1  ;;  %v5668_v9 = vld [vmem:[%s7013_s10 + $0x60] sm:$0xff]  }
0x3307   :  { %v5669_v13 = vld [vmem:[%s7013_s10 + $0x68] sm:$0xff]  }
0x330b   :  { %v4190_v24 = vpop.f32.mrb[136].mxu1 }
0x330c   :  { %v4191_v57 = vadd.f32 %v4190_v24, %v4140_v19  ;;  %v5515_v26 = vpop.f32.mrb[137].mxu1  ;;  %v5670_v24 = vld [vmem:[%s7013_s10 + $0x70] sm:$0xff]  }
0x330d   :  { %v4193_v27 = vpop.f32.mrb[138].mxu1 }
0x330e   :  { %v4196_v51 = vadd.f32 %v4191_v57, %v6064_v52  ;;  %v5516_v28 = vpop.f32.mrb[139].mxu1  ;;  %v5671_v57 = vld [vmem:[%s7013_s10 + $0x78] sm:$0xff]  }
0x3310   :  { %v4197_v58 = vsel %vm506_vm6, %v4196_v51, -inf }
0x3311   :  { %4198 = vmax.xlane.f32.xlu1 %v4197_v58 }
0x3315   :  { %4307 = vadd.xlane.f32.xlu1 %v4306_v41 }
0x339e   :  { %v4199_v39 = vpop.xlane.xlu1 %4198 }
0x339f   :  { %v4200_v40 = vsub.f32 %v4196_v51, %v4199_v39 }
0x33a1   :  { %v4201_v44 = vmul.f32 1.442695, %v4200_v40 }
0x33a2   :  { %v4308_v62 = vpop.xlane.xlu1 %4307 }
0x33a3   :  { %5764 = vpow2.f32 %v4201_v44  ;;  %v4312_v4 = vmul.f32 0.015625, %v4308_v62  ;;  %v4888_v62 = vld [vmem:[%s7016_s13] ss:$0 sm:$0xff] }
0x33a5   :  { %v4314_v18 = vadd.f32 1e-06, %v4312_v4 }
0x33ad   :  { %v5765_v37 = vpop.eup %5764 }
0x33ae   :  { %v4203_v15 = vsel %vm506_vm6, %v5765_v37, 0.0 }
0x33af   :  { %4204 = vadd.xlane.f32.xlu0 %v4203_v15 }
0x33c5   :  { %4209 = vrot.lane.b32.xlu0 %v6748_v60, %s5818_s21 }
0x343c   :  { %v4205_v52 = vpop.xlane.xlu0 %4204 }
0x343d   :  { %5766 = vrcp.f32 %v4205_v52 }
0x343e   :  { %5768 = vrsqrt.f32 %v4314_v18 }
0x3440   :  { %v4210_v45 = vpop.permute.xlu0 %4209 }
0x3441   :  { %v4215_v46 = vsel %vm522_vm5, %v4210_v45, 0 }
0x3442   :  { %5518 = vmatpush3.bf16.msra.mxu0 %v4215_v46 }
0x3443   :  { %4379 = vmatprep.subr.bf16.mxu0 %v5654_v5 }
0x3447   :  { %v5767_v36 = vpop.eup %5766 }
0x3448   :  { %v4207_v35 = vmul.f32 %v5767_v36, %v5765_v37  ;;  %v5769_v6 = vpop.eup %5768 }
0x3449   :  { %v4318_v32 = vmul.f32 %v5769_v6, %v6880_v25 }
0x344a   :  { %v4208_v53 = vpack.c.bf16 %v4207_v35, %v4207_v35 }
0x344b   :  { %v4324_v34 = vmul.f32 %v4323_v12, %v4318_v32 }
0x344c   :  { %5520 = vmatmul.mubr.msk.bf16.vlgmr.msra.gmra.mrb[140].mxu0 %vm506_vm6, %v4208_v53 }
0x344d   :  { %4411 = vmatprep.mubr.bf16.mxu0 %v5813_v17  ;;  %4380 = vmatpush1.bf16.msra.mxu0 %v5652_v63 }
0x351f   :  { %v4251_v54 = vpop.f32.mrb[140].mxu0 }
0x3520   :  { %v4257_v38 = vpack.c.bf16 %v4251_v54, %v4251_v54  ;;  %v5521_v55 = vpop.f32.mrb[141].mxu0 }
0x3521   :  { %v4254_v8 = vpop.f32.mrb[142].mxu0 }
0x3522   :  { %v5522_v47 = vpop.f32.mrb[143].mxu0  ;;  %5528 = vmatmul.mubr.msk.bf16.vlgmr.msra.gmra.mrb[140].mxu1 %vm295_vm3, %v4257_v38 }
0x3523   :  { %5547 = vmatprep.mubr.msk.bf16.mxu1 %vm5814_vm1, %v5812_v10  ;;  %5532 = vmatpush3.bf16.msra.mxu1 %v5664_v16 }
0x3524   :  { %5533 = vmatprep.subr.bf16.mxu1 %v5812_v10 }
0x3527   :  { %5534 = vmatpush3.bf16.msra.mxu1 %v5665_v0 }
0x3528   :  { %5535 = vmatprep.subr.bf16.mxu1 %v5812_v10 }
0x35f5   :  { %v4295_v60 = vpop.f32.mrb[140].mxu1 }
0x35f6   :  { %v4301_v43 = vadd.f32 %v4295_v60, %v4100_v22  ;;  %v5529_v56 = vpop.f32.mrb[141].mxu1  ;;  %v5666_v22 = vld [vmem:[%s7013_s10 + $0x50] sm:$0xff]  }
0x35f7   :  { %v4298_v42 = vpop.f32.mrb[142].mxu1  ;;  %5536 = vmatpush3.bf16.msra.mxu1 %v5666_v22 }
0x35f8   :  { %v6897_v59 = vadd.f32 %v4301_v43, %v6452_v49  ;;  %v5530_v50 = vpop.f32.mrb[143].mxu1  ;;  %v5657_v49 = vld [vmem:[%s7012_s9 + $0x54] ss:$8 sps:$4 sm:$0xff]   ;;  %5537 = vmatprep.subr.bf16.mxu1 %v5812_v10 }
0x35f9   :  { %4381 = vmatprep.subr.bf16.mxu0 %v5657_v49 }
0x35fa   :  { %v4305_v17 = vmul.f32 %v6897_v59, %v6897_v59  ;;  %4382 = vmatpush1.bf16.msra.mxu0 %v5655_v30 }
0x35fb   :  { %4383 = vmatprep.subr.bf16.mxu0 %v5660_v21  ;;  %5538 = vmatpush3.bf16.msra.mxu1 %v5667_v23  ;;  %v4887_v21 = vld [vmem:[%s7014_s11] ss:$0 sm:$0xff] }
0x35fc   :  { %v4309_v33 = vsel %vm64_vm0, %v4305_v17, 0.0  ;;  %5539 = vmatprep.subr.bf16.mxu1 %v5812_v10  ;;  %v5672_v17 = vld [vmem:[%s7015_s12] sm:$0xff]  }
0x35fd   :  { %4310 = vadd.xlane.f32.xlu1 %v4309_v33  ;;  %v5675_v33 = vld [vmem:[%s7015_s12 + $0x18] sm:$0xff]  }
0x35fe   :  { %4384 = vmatpush1.bf16.msra.mxu0 %v5658_v1 }
0x35ff   :  { %4385 = vmatprep.subr.bf16.mxu0 %v5663_v61  ;;  %5540 = vmatpush3.bf16.msra.mxu1 %v5668_v9 }
0x3600   :  { %5541 = vmatprep.subr.bf16.mxu1 %v5812_v10 }
0x3602   :  { %4386 = vmatpush1.bf16.msra.mxu0 %v5661_v2 }
0x3603   :  { %5551 = vmatprep.subr.bf16.mxu0 %v5812_v10  ;;  %5542 = vmatpush3.bf16.msra.mxu1 %v5669_v13 }
0x3604   :  { %5543 = vmatprep.subr.bf16.mxu1 %v5812_v10 }
0x3607   :  { %5544 = vmatpush3.bf16.msra.mxu1 %v5670_v24 }
0x3608   :  { %5545 = vmatprep.subr.bf16.mxu1 %v5812_v10 }
0x360b   :  { %5546 = vmatpush3.bf16.msra.mxu1 %v5671_v57 }
0x368a   :  { %v4311_v20 = vpop.xlane.xlu1 %4310 }
0x368b   :  { %v4313_v3 = vmul.f32 0.015625, %v4311_v20 }
0x368d   :  { %v4315_v31 = vadd.f32 1e-06, %v4313_v3 }
0x368f   :  { %5770 = vrsqrt.f32 %v4315_v31 }
0x3699   :  { %v5771_v19 = vpop.eup %5770 }
0x369a   :  { %v4319_v14 = vmul.f32 %v5771_v19, %v6897_v59 }
0x369c   :  { %v4325_v48 = vmul.f32 %v4323_v12, %v4319_v14 }
0x369e   :  { %v4326_v11 = vpack.c.bf16 %v4325_v48, %v4324_v34 }
0x36a0   :  { %4860 = vmatmul.mubr.msk.bf16.vlgmr.msra.gmra.mrb[144].mxu0 %vm64_vm0, %v4326_v11 }
0x36a1   :  { %5559 = vmatprep.mubr.msk.bf16.mxu0 %vm5814_vm1, %v5812_v10  ;;  %5552 = vmatpush3.bf16.msra.mxu0 %v5672_v17 }
0x36a2   :  { %5553 = vmatprep.subr.bf16.mxu0 %v5812_v10 }
0x3773   :  { %v4413_v26 = vpop.f32.mrb[144].mxu0 }
0x3774   :  { %v4861_v27 = vmul.f32 -1.442695, %v4413_v26  ;;  %v4415_v51 = vpop.f32.mrb[145].mxu0 }
0x3775   :  { %v4417_v28 = vpop.f32.mrb[146].mxu0 }
0x3776   :  { %5772 = vpow2.f32 %v4861_v27  ;;  %v4862_v58 = vmul.f32 -1.442695, %v4417_v28  ;;  %v4419_v29 = vpop.f32.mrb[147].mxu0 }
0x3778   :  { %5774 = vpow2.f32 %v4862_v58 }
0x3780   :  { %v5773_v41 = vpop.eup %5772 }
0x3781   :  { %v4428_v39 = vadd.f32 1.0, %v5773_v41 }
0x3782   :  { %v5775_v40 = vpop.eup %5774 }
0x3783   :  { %5776 = vrcp.f32 %v4428_v39  ;;  %v4429_v44 = vadd.f32 1.0, %v5775_v40 }
0x3785   :  { %5778 = vrcp.f32 %v4429_v44 }
0x378d   :  { %v5777_v37 = vpop.eup %5776 }
0x378e   :  { %v4434_v15 = vmul.f32 %v5777_v37, %v4413_v26 }
0x378f   :  { %v5779_v52 = vpop.eup %5778 }
0x3790   :  { %v4436_v45 = vmul.f32 %v4434_v15, %v4415_v51  ;;  %v4435_v46 = vmul.f32 %v5779_v52, %v4417_v28 }
0x3792   :  { %v4437_v36 = vmul.f32 %v4435_v46, %v4419_v29 }
0x3794   :  { %v4438_v35 = vpack.c.bf16 %v4437_v36, %v4436_v45 }
0x3796   :  { %5548 = vmatmul.mubr.bf16.vlgmr.msra.gmra.mrb[144].mxu1 %v4438_v35 }
0x3869   :  { %v4538_v53 = vpop.f32.mrb[144].mxu1 }
0x386a   :  { %v4545_v54 = vadd.f32 %v4538_v53, %v6880_v25  ;;  %v5549_v38 = vpop.f32.mrb[145].mxu1  ;;  %v5673_v25 = vld [vmem:[%s7015_s12 + $0x8] sm:$0xff]  }
0x386b   :  { %v4541_v55 = vpop.f32.mrb[146].mxu1  ;;  %5554 = vmatpush3.bf16.msra.mxu0 %v5673_v25 }
0x386c   :  { %v4546_v8 = vadd.f32 %v4541_v55, %v6897_v59  ;;  %v5550_v47 = vpop.f32.mrb[147].mxu1  ;;  %v4548_v60 = vrot.slane %v4545_v54, 7  ;;  %5555 = vmatprep.subr.bf16.mxu0 %v5812_v10  ;;  %v5674_v59 = vld [vmem:[%s7015_s12 + $0x10] sm:$0xff]   ;;  %s5820_s12 = smov [#allocation2]  }
0x386d   :  { %s4663_s18 = sshll.u32 %s5820_s12, 4  ;;  %s4664_s18 = int_to_ptr.vmem [resolvable:$true] %s4663_s18 }
0x386e   :  { %v4551_v43 = vrot.slane %v4546_v8, 6  ;;  %s5788_s11 = scalar_lea.vmem %s4664_s18, 32  ;;  %p5793_p1 = scmp.lt.s32.totalorder %s4664_s18, %s4664_s18 }
0x386f   :  { %5556 = vmatpush3.bf16.msra.mxu0 %v5674_v59  ;;  %p5789_p0 = scmp.ne.s32.totalorder %s4664_s18, %s5788_s11  ;;  %p5794_p2 = scmp.lt.s32.totalorder %s5788_s11, %s5788_s11 }
0x3870   :  { %v4554_v56 = vsel %vm4553_vm7, %v4548_v60, %v4551_v43  ;;  %5557 = vmatprep.subr.bf16.mxu0 %v5812_v10 }
0x3871   :  { %v4556_v42 = vmul.f32 %v4554_v56, %v4554_v56  ;;  %p5795_p3 = por %p5794_p2, %p5793_p1 }
0x3873   :  { %v4558_v50 = vsel %vm4557_vm8, %v4556_v42, 0.0  ;;  %5558 = vmatpush3.bf16.msra.mxu0 %v5675_v33  ;;  %p5796_p4 = pnand %p5795_p3, %p5789_p0 }
0x3874   :  { %4559 = vadd.xlane.f32.xlu1 %v4558_v50 }
0x3901   :  { %v4560_v5 = vpop.xlane.xlu1 %4559 }
0x3902   :  { %v4561_v63 = vmul.f32 0.015625, %v4560_v5 }
0x3904   :  { %v4562_v49 = vadd.f32 1e-06, %v4561_v63 }
0x3906   :  { %5780 = vrsqrt.f32 %v4562_v49 }
0x3910   :  { %v5781_v30 = vpop.eup %5780 }
0x3911   :  { %v4564_v1 = vmul.f32 %v5781_v30, %v4554_v56 }
0x3913   :  { %v4571_v2 = vmul.f32 %v4887_v21, %v4564_v1 }
0x3915   :  { %v4572_v61 = vpack.c.bf16 %v4571_v2, %v4571_v2 }
0x3917   :  { %5560 = vmatmul.mubr.msk.bf16.vlgmr.msra.gmra.mrb[148].mxu0 %vm64_vm0, %v4572_v61 }
0x39ea   :  { %v4649_v10 = vpop.f32.mrb[148].mxu0 }
0x39eb   :  { %v4650_v4 = vadd.f32 %v4888_v62, %v4649_v10  ;;  %v5561_v18 = vpop.f32.mrb[149].mxu0 }
0x39ec   :  { %v4652_v20 = vpop.f32.mrb[150].mxu0 }
0x39ed   :  { %v5562_v3 = vpop.f32.mrb[151].mxu0  ;;  %4656 = vst.msk [vmem:[#allocation2] sm:$0x3] %vm4655_vm9, %v4650_v4 }
0x39ee   :  { %5799 = shalt.err (!%p5796_p4)
}
0x39ef   :  { %s5800_s13 = scalar_lea.hbm %s7017_s14, 32 }
0x39f0   :  { %p5801_p5 = scmp.ne.s32.totalorder %s7017_s14, %s5800_s13  ;;  %p5804_p6 = scmp.lt.u32.totalorder %s5800_s13, %s7017_s14 }
0x39f2   :  { %p5806_p7 = pnand %p5804_p6, %p5801_p5 }
0x39f4   :  { %5809 = shalt.err (!%p5806_p7)
}
0x39f5   :  { %4666 = dma.vmem_to_hbm [thread:$0]  %s4664_s18, 32, %s7017_s14, [#allocation3]  }
0x39f6   :  { %5810 = dma.done.wait [#allocation3], 32  }
0x39f7   :  { %5811 = vsyncadd [#allocation3], 4294967264 }
0x39f8   :  { %4670 = vsyncpa [#allocation3], 1 }

</bundles_post_ra>
